<compile_context>
chip_gen: v6e
topology: v6e:2x2x1
jax: 0.10.0
libtpu: 0.0.40
codegen_flags: <defaults>
</compile_context>

<pallas_src>
import functools
import math

import jax
import jax.numpy as jnp
from jax.experimental import pallas as pl
from jax.experimental.pallas import tpu as pltpu

CLASS_NUM = 75
D_MODEL = 64
HEADS = 4
FFN_DIM = 256
FM_LEN = 32           # 2 x 16 feature map flattened
LP_LEN = 16           # learned LP-slot queries
CLS_PAD = 128         # classifier lanes padded to 128 (lane-dense stores)
VMEM_LIMIT = 32 * 1024 * 1024


def round_up(x, m):
    return (x + m - 1) // m * m


def choose_tm(m):
    """Largest row tile that still leaves >= 2 grid steps (keeps both v7x TCs busy)."""
    for tm in (1024, 512, 256, 128):
        if m >= 2 * tm:
            return tm
    return round_up(m, 8)


# ---------------------------------------------------------------------------
# Pallas kernels
# ---------------------------------------------------------------------------
def _mm_kernel(a_ref, w_ref, bias_ref, o_ref, *, relu):
    acc = jnp.dot(a_ref[...], w_ref[...],
                  preferred_element_type=jnp.float32) + bias_ref[...]
    if relu:
        acc = jnp.maximum(acc, 0.0)
    o_ref[...] = acc


def pallas_linear(a, w, b, relu=False, bf16=False):
    """O = act(A @ W + b). A:(M,K), W:(K,N), b:(N,). N padded to 128 lanes internally.
    With bf16=True the operands are cast in the wrapper (halves DMA bytes); the
    accumulation is always f32 on the MXU."""
    M, K = a.shape
    N = w.shape[1]
    Np = round_up(N, 128)
    tm = choose_tm(M)
    Mp = round_up(M, tm)
    in_dtype = jnp.bfloat16 if bf16 else jnp.float32

    a_p = a.astype(in_dtype)
    if Mp != M:
        a_p = jnp.pad(a_p, ((0, Mp - M), (0, 0)))
    w_p = w.astype(in_dtype)
    if Np != N:
        w_p = jnp.pad(w_p, ((0, 0), (0, Np - N)))
    b_p = (jnp.pad(b, (0, Np - N)) if Np != N else b).reshape(1, Np).astype(jnp.float32)

    out = pl.pallas_call(
        functools.partial(_mm_kernel, relu=relu),
        out_shape=jax.ShapeDtypeStruct((Mp, Np), jnp.float32),
        grid=(Mp // tm,),
        in_specs=[
            pl.BlockSpec((tm, K), lambda i: (i, 0)),
            pl.BlockSpec((K, Np), lambda i: (0, 0)),
            pl.BlockSpec((1, Np), lambda i: (0, 0)),
        ],
        out_specs=pl.BlockSpec((tm, Np), lambda i: (i, 0)),
        compiler_params=pltpu.CompilerParams(
            dimension_semantics=("parallel",), vmem_limit_bytes=VMEM_LIMIT),
    )(a_p, w_p, b_p)
    if Mp != M or Np != N:
        out = out[:M, :N]
    return out


def _stn_kernel(x_ref, w1_ref, b1_ref, w2_ref, b2_ref, o_ref):
    """Fused STN localization MLP: relu(x@W1+b1) @ W2 + b2 (all lane-dense, 128 wide)."""
    h = jnp.dot(x_ref[...], w1_ref[...], preferred_element_type=jnp.float32) + b1_ref[...]
    h = jnp.maximum(h, 0.0)
    o_ref[...] = jnp.dot(h, w2_ref[...], preferred_element_type=jnp.float32) + b2_ref[...]


def stn_localization(pooled, params):
    """pooled: (B, 384) -> theta (B, 6). One fused Pallas launch."""
    B, K = pooled.shape
    Mp = round_up(B, 8)
    xp = jnp.pad(pooled, ((0, Mp - B), (0, 0))) if Mp != B else pooled
    out = pl.pallas_call(
        _stn_kernel,
        out_shape=jax.ShapeDtypeStruct((Mp, 128), jnp.float32),
        grid=(1,),
        in_specs=[
            pl.BlockSpec((Mp, K), lambda i: (0, 0)),
            pl.BlockSpec((K, 128), lambda i: (0, 0)),
            pl.BlockSpec((1, 128), lambda i: (0, 0)),
            pl.BlockSpec((128, 128), lambda i: (0, 0)),
            pl.BlockSpec((1, 128), lambda i: (0, 0)),
        ],
        out_specs=pl.BlockSpec((Mp, 128), lambda i: (0, 0)),
        compiler_params=pltpu.CompilerParams(vmem_limit_bytes=VMEM_LIMIT),
    )(xp, params["stn_w1"], params["stn_b1"], params["stn_w2"], params["stn_b2"])
    return out[:B, :6]


def _head_kernel(mem_ref, pos_ref, qe_ref,
                 sa_wqkv_ref, sa_bqkv_ref, sa_wo_ref, sa_bo_ref,
                 ca_wq_ref, ca_bq_ref, ca_wkv_ref, ca_bkv_ref, ca_wo_ref, ca_bo_ref,
                 ln1_g_ref, ln1_b_ref, ln2_g_ref, ln2_b_ref, ln3_g_ref, ln3_b_ref,
                 ffn_w1_ref, ffn_b1_ref, ffn_w2_ref, ffn_b2_ref,
                 cls_w_ref, cls_b_ref, out_ref, *, heads, eps):
    """Entire transformer decoder head for one batch element, fully VMEM-resident."""
    d = D_MODEL
    dh = d // heads
    scale = 1.0 / math.sqrt(dh)

    mem = mem_ref[0] + pos_ref[...]            # (FM_LEN, D)  pos-embed add fused in
    tgt = qe_ref[...]                          # (LP_LEN, D)  learned LP-slot queries

    def matmul(x, w_ref, b_ref):
        return jnp.dot(x, w_ref[...], preferred_element_type=jnp.float32) + b_ref[...]

    def layernorm(x, g_ref, b_ref):
        mu = jnp.mean(x, axis=-1, keepdims=True)
        var = jnp.mean((x - mu) ** 2, axis=-1, keepdims=True)
        return (x - mu) * jax.lax.rsqrt(var + eps) * g_ref[...] + b_ref[...]

    def attn_block(q, k, v, wo_ref, bo_ref):
        # Multi-head attention with the output projection fused per head
        # (sum of per-head projections == projection of the concatenated heads),
        # so no lane-concatenate is needed.
        out = None
        for h in range(heads):
            lo, hi = h * dh, (h + 1) * dh
            qh, kh, vh = q[:, lo:hi], k[:, lo:hi], v[:, lo:hi]
            s = jax.lax.dot_general(qh, kh, (((1,), (1,)), ((), ())),
                                    preferred_element_type=jnp.float32) * scale
            p = jnp.exp(s - jnp.max(s, axis=-1, keepdims=True))
            p = p * pl.reciprocal(jnp.sum(p, axis=-1, keepdims=True), approx=True)
            oh = jnp.dot(p, vh, preferred_element_type=jnp.float32)          # (Lq, dh)
            proj = jnp.dot(oh, wo_ref[lo:hi, :], preferred_element_type=jnp.float32)
            out = proj if out is None else out + proj
        return out + bo_ref[...]

    # --- self-attention over the LP-slot queries (fused QKV projection) ---
    qkv = matmul(tgt, sa_wqkv_ref, sa_bqkv_ref)                              # (LP, 3D)
    a = attn_block(qkv[:, :d], qkv[:, d:2 * d], qkv[:, 2 * d:], sa_wo_ref, sa_bo_ref)
    tgt = layernorm(tgt + a, ln1_g_ref, ln1_b_ref)

    # --- cross-attention over the feature-map sequence (fused KV projection) ---
    q = matmul(tgt, ca_wq_ref, ca_bq_ref)
    kv = matmul(mem, ca_wkv_ref, ca_bkv_ref)                                 # (FM, 2D)
    a = attn_block(q, kv[:, :d], kv[:, d:], ca_wo_ref, ca_bo_ref)
    tgt = layernorm(tgt + a, ln2_g_ref, ln2_b_ref)

    # --- FFN ---
    ff = jnp.maximum(matmul(tgt, ffn_w1_ref, ffn_b1_ref), 0.0)
    ff = matmul(ff, ffn_w2_ref, ffn_b2_ref)
    tgt = layernorm(tgt + ff, ln3_g_ref, ln3_b_ref)

    # --- classifier, lane-dense (75 padded to 128) ---
    out_ref[0] = matmul(tgt, cls_w_ref, cls_b_ref)


def transformer_head(mem, hp):
    """mem: (B, FM_LEN, D_MODEL) -> logits (B, LP_LEN, CLASS_NUM). One fused launch."""
    B = mem.shape[0]
    weights = [hp["pos_fm"], hp["query"],
               hp["sa_wqkv"], hp["sa_bqkv"], hp["sa_wo"], hp["sa_bo"],
               hp["ca_wq"], hp["ca_bq"], hp["ca_wkv"], hp["ca_bkv"], hp["ca_wo"], hp["ca_bo"],
               hp["ln1_g"], hp["ln1_b"], hp["ln2_g"], hp["ln2_b"], hp["ln3_g"], hp["ln3_b"],
               hp["ffn_w1"], hp["ffn_b1"], hp["ffn_w2"], hp["ffn_b2"],
               hp["cls_w"], hp["cls_b"]]
    # Constant index maps -> weight blocks stay resident in VMEM across the B grid.
    w_specs = [pl.BlockSpec(w.shape, lambda b: (0, 0)) for w in weights]
    out = pl.pallas_call(
        functools.partial(_head_kernel, heads=HEADS, eps=1e-5),
        out_shape=jax.ShapeDtypeStruct((B, LP_LEN, CLS_PAD), jnp.float32),
        grid=(B,),
        in_specs=[pl.BlockSpec((1, FM_LEN, D_MODEL), lambda b: (b, 0, 0))] + w_specs,
        out_specs=pl.BlockSpec((1, LP_LEN, CLS_PAD), lambda b: (b, 0, 0)),
        compiler_params=pltpu.CompilerParams(
            dimension_semantics=("parallel",), vmem_limit_bytes=VMEM_LIMIT),
    )(mem, *weights)
    return out[:, :, :CLASS_NUM]


# ---------------------------------------------------------------------------
# Glue: NHWC im2col, STN grid sample
# ---------------------------------------------------------------------------
def im2col_3x3_nhwc(x, stride, pad):
    """x: (B, H, W, C) -> patches (B*Ho*Wo, 9*C) with channel-innermost feature order."""
    B, H, W, C = x.shape
    xp = jnp.pad(x, ((0, 0), (pad, pad), (pad, pad), (0, 0)))
    Ho = (H + 2 * pad - 3) // stride + 1
    Wo = (W + 2 * pad - 3) // stride + 1
    cols = []
    for i in range(3):
        for j in range(3):
            cols.append(xp[:, i:i + stride * (Ho - 1) + 1:stride,
                              j:j + stride * (Wo - 1) + 1:stride, :])
    p = jnp.concatenate(cols, axis=-1)                    # (B, Ho, Wo, 9*C)
    return p.reshape(B * Ho * Wo, 9 * C), Ho, Wo


def conv3x3_s2_relu_nhwc(x, w, b):
    """x: (B,H,W,Cin) NHWC, w: (Cout,Cin,3,3) -> (B,Ho,Wo,Cout)."""
    B = x.shape[0]
    Cout = w.shape[0]
    patches, Ho, Wo = im2col_3x3_nhwc(x, stride=2, pad=1)
    wm = w.transpose(2, 3, 1, 0).reshape(-1, Cout)        # (9*Cin, Cout)
    K = patches.shape[1]
    y = pallas_linear(patches, wm, b, relu=True, bf16=(K >= 128))
    return y.reshape(B, Ho, Wo, Cout)


def affine_grid_sample_nhwc(x, theta):
    """Bilinear grid_sample, affine theta (align_corners=False, zeros padding), NHWC.
    TODO(synk): data-dependent gather; left as JAX glue (no rectangular-DMA Pallas form)."""
    B, H, W, C = x.shape
    xs = (2.0 * jnp.arange(W, dtype=jnp.float32) + 1.0) / W - 1.0
    ys = (2.0 * jnp.arange(H, dtype=jnp.float32) + 1.0) / H - 1.0
    gy, gx = jnp.meshgrid(ys, xs, indexing="ij")
    grid = jnp.stack([gx, gy, jnp.ones_like(gx)], axis=-1)                # (H, W, 3)
    src = jnp.einsum("hwk,bjk->bhwj", grid, theta.reshape(B, 2, 3))       # (B, H, W, 2)
    sx = ((src[..., 0] + 1.0) * W - 1.0) * 0.5
    sy = ((src[..., 1] + 1.0) * H - 1.0) * 0.5
    x0 = jnp.floor(sx); y0 = jnp.floor(sy)
    x1 = x0 + 1.0;      y1 = y0 + 1.0
    wx1 = sx - x0; wx0 = 1.0 - wx1
    wy1 = sy - y0; wy0 = 1.0 - wy1

    def corner(yc, xc, wgt):
        valid = (xc >= 0) & (xc < W) & (yc >= 0) & (yc < H)
        xi = jnp.clip(xc, 0, W - 1).astype(jnp.int32)
        yi = jnp.clip(yc, 0, H - 1).astype(jnp.int32)
        wv = wgt * valid.astype(jnp.float32)

        def one(img_b, yi_b, xi_b, w_b):
            return img_b[yi_b, xi_b, :] * w_b[..., None]

        return jax.vmap(one)(x, yi, xi, wv)               # (B, H, W, C)

    return (corner(y0, x0, wy0 * wx0) + corner(y0, x1, wy0 * wx1)
            + corner(y1, x0, wy1 * wx0) + corner(y1, x1, wy1 * wx1))


# ---------------------------------------------------------------------------
# Parameters (deterministic, synthetic) — stored directly in fused/padded layouts
# ---------------------------------------------------------------------------
def init_params(key):
    keys = iter(jax.random.split(key, 64))

    def dense(fan_in, shape):
        return jax.random.normal(next(keys), shape, jnp.float32) / jnp.sqrt(float(fan_in))

    def emb(shape):
        return 0.02 * jax.random.normal(next(keys), shape, jnp.float32)

    p = {}
    # Backbone conv stack: 3 -> 16 -> 32 -> 64 -> 64, each 3x3 stride 2
    chans = [3, 16, 32, 64, D_MODEL]
    p["convs"] = [
        (dense(cin * 9, (cout, cin, 3, 3)), jnp.zeros((cout,), jnp.float32))
        for cin, cout in zip(chans[:-1], chans[1:])
    ]
    # STN localization: avgpool -> flatten(384) -> 32 -> 6 (identity init), pre-padded
    # to 128-lane widths so the fused kernel does unmasked stores.
    loc_in = 3 * 8 * 16
    p["stn_w1"] = jnp.pad(dense(loc_in, (loc_in, 32)), ((0, 0), (0, 96)))
    p["stn_b1"] = jnp.zeros((1, 128), jnp.float32)
    p["stn_w2"] = jnp.zeros((128, 128), jnp.float32)
    p["stn_b2"] = jnp.zeros((1, 128), jnp.float32).at[0, :6].set(
        jnp.array([1., 0., 0., 0., 1., 0.], jnp.float32))

    # Transformer head (fused/padded layouts so everything is one Pallas kernel)
    h = {}
    h["pos_fm"] = emb((FM_LEN, D_MODEL))
    h["query"] = emb((LP_LEN, D_MODEL))

    def proj():
        return dense(D_MODEL, (D_MODEL, D_MODEL))

    h["sa_wqkv"] = jnp.concatenate([proj(), proj(), proj()], axis=1)      # (64, 192)
    h["sa_bqkv"] = jnp.zeros((1, 3 * D_MODEL), jnp.float32)
    h["sa_wo"] = proj(); h["sa_bo"] = jnp.zeros((1, D_MODEL), jnp.float32)
    h["ca_wq"] = proj(); h["ca_bq"] = jnp.zeros((1, D_MODEL), jnp.float32)
    h["ca_wkv"] = jnp.concatenate([proj(), proj()], axis=1)               # (64, 128)
    h["ca_bkv"] = jnp.zeros((1, 2 * D_MODEL), jnp.float32)
    h["ca_wo"] = proj(); h["ca_bo"] = jnp.zeros((1, D_MODEL), jnp.float32)
    for i in (1, 2, 3):
        h[f"ln{i}_g"] = jnp.ones((1, D_MODEL), jnp.float32)
        h[f"ln{i}_b"] = jnp.zeros((1, D_MODEL), jnp.float32)
    h["ffn_w1"] = dense(D_MODEL, (D_MODEL, FFN_DIM))
    h["ffn_b1"] = jnp.zeros((1, FFN_DIM), jnp.float32)
    h["ffn_w2"] = dense(FFN_DIM, (FFN_DIM, D_MODEL))
    h["ffn_b2"] = jnp.zeros((1, D_MODEL), jnp.float32)
    h["cls_w"] = jnp.pad(dense(D_MODEL, (D_MODEL, CLASS_NUM)),
                         ((0, 0), (0, CLS_PAD - CLASS_NUM)))              # (64, 128)
    h["cls_b"] = jnp.zeros((1, CLS_PAD), jnp.float32)
    p["head"] = h
    return p


# ---------------------------------------------------------------------------
# Forward pass
# ---------------------------------------------------------------------------
@jax.jit
def forward(params, img):
    B, C, H, W = img.shape                        # (B, 3, 32, 256) NCHW like PyTorch
    x = img.transpose(0, 2, 3, 1)                 # single NCHW -> NHWC conversion

    # ---- bone: STN -----------------------------------------------------
    pooled = x.reshape(B, 8, H // 8, 16, W // 16, C).mean(axis=(2, 4))    # (B,8,16,3)
    theta = stn_localization(pooled.reshape(B, -1), params)               # (B, 6)
    x = affine_grid_sample_nhwc(x, theta)

    # ---- bone: conv stack 32x256 -> 2x16, NHWC throughout --------------
    for w, b in params["convs"]:
        x = conv3x3_s2_relu_nhwc(x, w, b)         # (B, 2, 16, 64) at the end

    # ---- neck: flatten feature map to sequence (free reshape in NHWC) --
    mem = x.reshape(B, FM_LEN, D_MODEL)           # (B, 32, 64)

    # ---- head: fully fused transformer decoder over LP slots -----------
    logits = transformer_head(mem, params["head"])          # (B, 16, 75)
    return logits


if __name__ == "__main__":
    key = jax.random.PRNGKey(0)
    pkey, xkey = jax.random.split(key)
    params = init_params(pkey)
    img = jax.random.normal(xkey, (2, 3, 32, 256), jnp.float32)   # (B, C, H, W) NCHW
    out = forward(params, img)
    out = jax.block_until_ready(out)
    assert out.shape == (2, LP_LEN, CLASS_NUM), out.shape
    assert bool(jnp.all(jnp.isfinite(out)))
    print("KERNEL_OK")
</pallas_src>

<mosaic_0001>
module attributes {stable_mosaic.version = 11 : i64} {
  func.func @_stn_kernel(%arg0: i32, %arg1: memref<8x384xf32, #tpu.memory_space<vmem>>, %arg2: memref<384x128xf32, #tpu.memory_space<vmem>>, %arg3: memref<1x128xf32, #tpu.memory_space<vmem>>, %arg4: memref<128x128xf32, #tpu.memory_space<vmem>>, %arg5: memref<1x128xf32, #tpu.memory_space<vmem>>, %arg6: memref<8x128xf32, #tpu.memory_space<vmem>>) attributes {dimension_semantics = [#tpu.dimension_semantics<arbitrary>], iteration_bounds = array<i64: 1>, scalar_prefetch = 0 : i64, scratch_operands = 0 : i64, tpu.core_type = #tpu.core_type<tc>, window_params = [{pipeline_mode = #tpu.pipeline_mode<synchronous>, transform_indices = @transform_0, window_bounds = array<i64: 8, 384>}, {pipeline_mode = #tpu.pipeline_mode<synchronous>, transform_indices = @transform_1, window_bounds = array<i64: 384, 128>}, {pipeline_mode = #tpu.pipeline_mode<synchronous>, transform_indices = @transform_2, window_bounds = array<i64: 1, 128>}, {pipeline_mode = #tpu.pipeline_mode<synchronous>, transform_indices = @transform_3, window_bounds = array<i64: 128, 128>}, {pipeline_mode = #tpu.pipeline_mode<synchronous>, transform_indices = @transform_4, window_bounds = array<i64: 1, 128>}, {pipeline_mode = #tpu.pipeline_mode<synchronous>, transform_indices = @transform_5, window_bounds = array<i64: 8, 128>}]} {
    %c0 = arith.constant 0 : index
    %c0_0 = arith.constant 0 : index
    %0 = vector.load %arg1[%c0, %c0_0] : memref<8x384xf32, #tpu.memory_space<vmem>>, vector<8x384xf32>
    %c0_1 = arith.constant 0 : index
    %c0_2 = arith.constant 0 : index
    %1 = vector.load %arg2[%c0_1, %c0_2] : memref<384x128xf32, #tpu.memory_space<vmem>>, vector<384x128xf32>
    %cst = arith.constant dense<0.000000e+00> : vector<8x128xf32>
    %2 = tpu.matmul %0, %1, %cst {dimension_numbers = #tpu.dot_dimension_numbers<[1], [0], [0], [1], [0, 0, 1, 1], [], []>} : vector<8x384xf32>, vector<384x128xf32>, vector<8x128xf32> -> vector<8x128xf32>
    %c0_3 = arith.constant 0 : index
    %c0_4 = arith.constant 0 : index
    %3 = vector.load %arg3[%c0_3, %c0_4] : memref<1x128xf32, #tpu.memory_space<vmem>>, vector<1x128xf32>
    %4 = vector.broadcast %3 : vector<1x128xf32> to vector<8x128xf32>
    %5 = arith.addf %2, %4 : vector<8x128xf32>
    %cst_5 = arith.constant 0.000000e+00 : f32
    %6 = vector.broadcast %cst_5 : f32 to vector<8x128xf32>
    %7 = arith.maximumf %5, %6 : vector<8x128xf32>
    %c0_6 = arith.constant 0 : index
    %c0_7 = arith.constant 0 : index
    %8 = vector.load %arg4[%c0_6, %c0_7] : memref<128x128xf32, #tpu.memory_space<vmem>>, vector<128x128xf32>
    %cst_8 = arith.constant dense<0.000000e+00> : vector<8x128xf32>
    %9 = tpu.matmul %7, %8, %cst_8 {dimension_numbers = #tpu.dot_dimension_numbers<[1], [0], [0], [1], [0, 0, 1, 1], [], []>} : vector<8x128xf32>, vector<128x128xf32>, vector<8x128xf32> -> vector<8x128xf32>
    %c0_9 = arith.constant 0 : index
    %c0_10 = arith.constant 0 : index
    %10 = vector.load %arg5[%c0_9, %c0_10] : memref<1x128xf32, #tpu.memory_space<vmem>>, vector<1x128xf32>
    %11 = vector.broadcast %10 : vector<1x128xf32> to vector<8x128xf32>
    %12 = arith.addf %9, %11 : vector<8x128xf32>
    %c0_11 = arith.constant 0 : index
    %c0_12 = arith.constant 0 : index
    %13 = vector.load %arg6[%c0_11, %c0_12] : memref<8x128xf32, #tpu.memory_space<vmem>>, vector<8x128xf32>
    tpu.vector_store %arg6[%c0_11, %c0_12], %12 {strides = array<i32>} : memref<8x128xf32, #tpu.memory_space<vmem>>, vector<8x128xf32>,
    return
  }
  func.func @transform_0(%arg0: i32) -> (i32, i32) {
    %c0_i32 = arith.constant 0 : i32
    %c0_i32_0 = arith.constant 0 : i32
    %c0_i32_1 = arith.constant 0 : i32
    return %c0_i32, %c0_i32_0 : i32, i32
  }
  func.func @transform_1(%arg0: i32) -> (i32, i32) {
    %c0_i32 = arith.constant 0 : i32
    %c0_i32_0 = arith.constant 0 : i32
    %c0_i32_1 = arith.constant 0 : i32
    return %c0_i32, %c0_i32_0 : i32, i32
  }
  func.func @transform_2(%arg0: i32) -> (i32, i32) {
    %c0_i32 = arith.constant 0 : i32
    %c0_i32_0 = arith.constant 0 : i32
    %c0_i32_1 = arith.constant 0 : i32
    return %c0_i32, %c0_i32_0 : i32, i32
  }
  func.func @transform_3(%arg0: i32) -> (i32, i32) {
    %c0_i32 = arith.constant 0 : i32
    %c0_i32_0 = arith.constant 0 : i32
    %c0_i32_1 = arith.constant 0 : i32
    return %c0_i32, %c0_i32_0 : i32, i32
  }
  func.func @transform_4(%arg0: i32) -> (i32, i32) {
    %c0_i32 = arith.constant 0 : i32
    %c0_i32_0 = arith.constant 0 : i32
    %c0_i32_1 = arith.constant 0 : i32
    return %c0_i32, %c0_i32_0 : i32, i32
  }
  func.func @transform_5(%arg0: i32) -> (i32, i32) {
    %c0_i32 = arith.constant 0 : i32
    %c0_i32_0 = arith.constant 0 : i32
    %c0_i32_1 = arith.constant 0 : i32
    return %c0_i32, %c0_i32_0 : i32, i32
  }
}

module attributes {stable_mosaic.version = 11 : i64} {
  func.func @_mm_kernel(%arg0: i32, %arg1: memref<1024x27xf32, #tpu.memory_space<vmem>>, %arg2: memref<27x128xf32, #tpu.memory_space<vmem>>, %arg3: memref<1x128xf32, #tpu.memory_space<vmem>>, %arg4: memref<1024x128xf32, #tpu.memory_space<vmem>>) attributes {dimension_semantics = [#tpu.dimension_semantics<parallel>], iteration_bounds = array<i64: 4>, scalar_prefetch = 0 : i64, scratch_operands = 0 : i64, tpu.core_type = #tpu.core_type<tc>, window_params = [{transform_indices = @transform_0, window_bounds = array<i64: 1024, 27>}, {pipeline_mode = #tpu.pipeline_mode<synchronous>, transform_indices = @transform_1, window_bounds = array<i64: 27, 128>}, {pipeline_mode = #tpu.pipeline_mode<synchronous>, transform_indices = @transform_2, window_bounds = array<i64: 1, 128>}, {transform_indices = @transform_3, window_bounds = array<i64: 1024, 128>}]} {
    %c0 = arith.constant 0 : index
    %c0_0 = arith.constant 0 : index
    %0 = vector.load %arg1[%c0, %c0_0] : memref<1024x27xf32, #tpu.memory_space<vmem>>, vector<1024x27xf32>
    %c0_1 = arith.constant 0 : index
    %c0_2 = arith.constant 0 : index
    %1 = vector.load %arg2[%c0_1, %c0_2] : memref<27x128xf32, #tpu.memory_space<vmem>>, vector<27x128xf32>
    %cst = arith.constant dense<0.000000e+00> : vector<1024x128xf32>
    %2 = tpu.matmul %0, %1, %cst {dimension_numbers = #tpu.dot_dimension_numbers<[1], [0], [0], [1], [0, 0, 1, 1], [], []>} : vector<1024x27xf32>, vector<27x128xf32>, vector<1024x128xf32> -> vector<1024x128xf32>
    %c0_3 = arith.constant 0 : index
    %c0_4 = arith.constant 0 : index
    %3 = vector.load %arg3[%c0_3, %c0_4] : memref<1x128xf32, #tpu.memory_space<vmem>>, vector<1x128xf32>
    %4 = vector.broadcast %3 : vector<1x128xf32> to vector<1024x128xf32>
    %5 = arith.addf %2, %4 : vector<1024x128xf32>
    %cst_5 = arith.constant 0.000000e+00 : f32
    %6 = vector.broadcast %cst_5 : f32 to vector<1024x128xf32>
    %7 = arith.maximumf %5, %6 : vector<1024x128xf32>
    %c0_6 = arith.constant 0 : index
    %c0_7 = arith.constant 0 : index
    %8 = vector.load %arg4[%c0_6, %c0_7] : memref<1024x128xf32, #tpu.memory_space<vmem>>, vector<1024x128xf32>
    tpu.vector_store %arg4[%c0_6, %c0_7], %7 {strides = array<i32>} : memref<1024x128xf32, #tpu.memory_space<vmem>>, vector<1024x128xf32>,
    return
  }
  func.func @transform_0(%arg0: i32) -> (i32, i32) {
    %c0_i32 = arith.constant 0 : i32
    %c0_i32_0 = arith.constant 0 : i32
    return %arg0, %c0_i32 : i32, i32
  }
  func.func @transform_1(%arg0: i32) -> (i32, i32) {
    %c0_i32 = arith.constant 0 : i32
    %c0_i32_0 = arith.constant 0 : i32
    %c0_i32_1 = arith.constant 0 : i32
    return %c0_i32, %c0_i32_0 : i32, i32
  }
  func.func @transform_2(%arg0: i32) -> (i32, i32) {
    %c0_i32 = arith.constant 0 : i32
    %c0_i32_0 = arith.constant 0 : i32
    %c0_i32_1 = arith.constant 0 : i32
    return %c0_i32, %c0_i32_0 : i32, i32
  }
  func.func @transform_3(%arg0: i32) -> (i32, i32) {
    %c0_i32 = arith.constant 0 : i32
    %c0_i32_0 = arith.constant 0 : i32
    return %arg0, %c0_i32 : i32, i32
  }
}

module attributes {stable_mosaic.version = 11 : i64} {
  func.func @_mm_kernel(%arg0: i32, %arg1: memref<512x144xbf16, #tpu.memory_space<vmem>>, %arg2: memref<144x128xbf16, #tpu.memory_space<vmem>>, %arg3: memref<1x128xf32, #tpu.memory_space<vmem>>, %arg4: memref<512x128xf32, #tpu.memory_space<vmem>>) attributes {dimension_semantics = [#tpu.dimension_semantics<parallel>], iteration_bounds = array<i64: 2>, scalar_prefetch = 0 : i64, scratch_operands = 0 : i64, tpu.core_type = #tpu.core_type<tc>, window_params = [{transform_indices = @transform_0, window_bounds = array<i64: 512, 144>}, {pipeline_mode = #tpu.pipeline_mode<synchronous>, transform_indices = @transform_1, window_bounds = array<i64: 144, 128>}, {pipeline_mode = #tpu.pipeline_mode<synchronous>, transform_indices = @transform_2, window_bounds = array<i64: 1, 128>}, {transform_indices = @transform_3, window_bounds = array<i64: 512, 128>}]} {
    %c0 = arith.constant 0 : index
    %c0_0 = arith.constant 0 : index
    %0 = vector.load %arg1[%c0, %c0_0] : memref<512x144xbf16, #tpu.memory_space<vmem>>, vector<512x144xbf16>
    %c0_1 = arith.constant 0 : index
    %c0_2 = arith.constant 0 : index
    %1 = vector.load %arg2[%c0_1, %c0_2] : memref<144x128xbf16, #tpu.memory_space<vmem>>, vector<144x128xbf16>
    %cst = arith.constant dense<0.000000e+00> : vector<512x128xf32>
    %2 = tpu.matmul %0, %1, %cst {dimension_numbers = #tpu.dot_dimension_numbers<[1], [0], [0], [1], [0, 0, 1, 1], [], []>} : vector<512x144xbf16>, vector<144x128xbf16>, vector<512x128xf32> -> vector<512x128xf32>
    %c0_3 = arith.constant 0 : index
    %c0_4 = arith.constant 0 : index
    %3 = vector.load %arg3[%c0_3, %c0_4] : memref<1x128xf32, #tpu.memory_space<vmem>>, vector<1x128xf32>
    %4 = vector.broadcast %3 : vector<1x128xf32> to vector<512x128xf32>
    %5 = arith.addf %2, %4 : vector<512x128xf32>
    %cst_5 = arith.constant 0.000000e+00 : f32
    %6 = vector.broadcast %cst_5 : f32 to vector<512x128xf32>
    %7 = arith.maximumf %5, %6 : vector<512x128xf32>
    %c0_6 = arith.constant 0 : index
    %c0_7 = arith.constant 0 : index
    %8 = vector.load %arg4[%c0_6, %c0_7] : memref<512x128xf32, #tpu.memory_space<vmem>>, vector<512x128xf32>
    tpu.vector_store %arg4[%c0_6, %c0_7], %7 {strides = array<i32>} : memref<512x128xf32, #tpu.memory_space<vmem>>, vector<512x128xf32>,
    return
  }
  func.func @transform_0(%arg0: i32) -> (i32, i32) {
    %c0_i32 = arith.constant 0 : i32
    %c0_i32_0 = arith.constant 0 : i32
    return %arg0, %c0_i32 : i32, i32
  }
  func.func @transform_1(%arg0: i32) -> (i32, i32) {
    %c0_i32 = arith.constant 0 : i32
    %c0_i32_0 = arith.constant 0 : i32
    %c0_i32_1 = arith.constant 0 : i32
    return %c0_i32, %c0_i32_0 : i32, i32
  }
  func.func @transform_2(%arg0: i32) -> (i32, i32) {
    %c0_i32 = arith.constant 0 : i32
    %c0_i32_0 = arith.constant 0 : i32
    %c0_i32_1 = arith.constant 0 : i32
    return %c0_i32, %c0_i32_0 : i32, i32
  }
  func.func @transform_3(%arg0: i32) -> (i32, i32) {
    %c0_i32 = arith.constant 0 : i32
    %c0_i32_0 = arith.constant 0 : i32
    return %arg0, %c0_i32 : i32, i32
  }
}

module attributes {stable_mosaic.version = 11 : i64} {
  func.func @_mm_kernel(%arg0: i32, %arg1: memref<128x288xbf16, #tpu.memory_space<vmem>>, %arg2: memref<288x128xbf16, #tpu.memory_space<vmem>>, %arg3: memref<1x128xf32, #tpu.memory_space<vmem>>, %arg4: memref<128x128xf32, #tpu.memory_space<vmem>>) attributes {dimension_semantics = [#tpu.dimension_semantics<parallel>], iteration_bounds = array<i64: 2>, scalar_prefetch = 0 : i64, scratch_operands = 0 : i64, tpu.core_type = #tpu.core_type<tc>, window_params = [{transform_indices = @transform_0, window_bounds = array<i64: 128, 288>}, {pipeline_mode = #tpu.pipeline_mode<synchronous>, transform_indices = @transform_1, window_bounds = array<i64: 288, 128>}, {pipeline_mode = #tpu.pipeline_mode<synchronous>, transform_indices = @transform_2, window_bounds = array<i64: 1, 128>}, {transform_indices = @transform_3, window_bounds = array<i64: 128, 128>}]} {
    %c0 = arith.constant 0 : index
    %c0_0 = arith.constant 0 : index
    %0 = vector.load %arg1[%c0, %c0_0] : memref<128x288xbf16, #tpu.memory_space<vmem>>, vector<128x288xbf16>
    %c0_1 = arith.constant 0 : index
    %c0_2 = arith.constant 0 : index
    %1 = vector.load %arg2[%c0_1, %c0_2] : memref<288x128xbf16, #tpu.memory_space<vmem>>, vector<288x128xbf16>
    %cst = arith.constant dense<0.000000e+00> : vector<128x128xf32>
    %2 = tpu.matmul %0, %1, %cst {dimension_numbers = #tpu.dot_dimension_numbers<[1], [0], [0], [1], [0, 0, 1, 1], [], []>} : vector<128x288xbf16>, vector<288x128xbf16>, vector<128x128xf32> -> vector<128x128xf32>
    %c0_3 = arith.constant 0 : index
    %c0_4 = arith.constant 0 : index
    %3 = vector.load %arg3[%c0_3, %c0_4] : memref<1x128xf32, #tpu.memory_space<vmem>>, vector<1x128xf32>
    %4 = vector.broadcast %3 : vector<1x128xf32> to vector<128x128xf32>
    %5 = arith.addf %2, %4 : vector<128x128xf32>
    %cst_5 = arith.constant 0.000000e+00 : f32
    %6 = vector.broadcast %cst_5 : f32 to vector<128x128xf32>
    %7 = arith.maximumf %5, %6 : vector<128x128xf32>
    %c0_6 = arith.constant 0 : index
    %c0_7 = arith.constant 0 : index
    %8 = vector.load %arg4[%c0_6, %c0_7] : memref<128x128xf32, #tpu.memory_space<vmem>>, vector<128x128xf32>
    tpu.vector_store %arg4[%c0_6, %c0_7], %7 {strides = array<i32>} : memref<128x128xf32, #tpu.memory_space<vmem>>, vector<128x128xf32>,
    return
  }
  func.func @transform_0(%arg0: i32) -> (i32, i32) {
    %c0_i32 = arith.constant 0 : i32
    %c0_i32_0 = arith.constant 0 : i32
    return %arg0, %c0_i32 : i32, i32
  }
  func.func @transform_1(%arg0: i32) -> (i32, i32) {
    %c0_i32 = arith.constant 0 : i32
    %c0_i32_0 = arith.constant 0 : i32
    %c0_i32_1 = arith.constant 0 : i32
    return %c0_i32, %c0_i32_0 : i32, i32
  }
  func.func @transform_2(%arg0: i32) -> (i32, i32) {
    %c0_i32 = arith.constant 0 : i32
    %c0_i32_0 = arith.constant 0 : i32
    %c0_i32_1 = arith.constant 0 : i32
    return %c0_i32, %c0_i32_0 : i32, i32
  }
  func.func @transform_3(%arg0: i32) -> (i32, i32) {
    %c0_i32 = arith.constant 0 : i32
    %c0_i32_0 = arith.constant 0 : i32
    return %arg0, %c0_i32 : i32, i32
  }
}

module attributes {stable_mosaic.version = 11 : i64} {
  func.func @_mm_kernel(%arg0: i32, %arg1: memref<64x576xbf16, #tpu.memory_space<vmem>>, %arg2: memref<576x128xbf16, #tpu.memory_space<vmem>>, %arg3: memref<1x128xf32, #tpu.memory_space<vmem>>, %arg4: memref<64x128xf32, #tpu.memory_space<vmem>>) attributes {dimension_semantics = [#tpu.dimension_semantics<parallel>], iteration_bounds = array<i64: 1>, scalar_prefetch = 0 : i64, scratch_operands = 0 : i64, tpu.core_type = #tpu.core_type<tc>, window_params = [{transform_indices = @transform_0, window_bounds = array<i64: 64, 576>}, {pipeline_mode = #tpu.pipeline_mode<synchronous>, transform_indices = @transform_1, window_bounds = array<i64: 576, 128>}, {pipeline_mode = #tpu.pipeline_mode<synchronous>, transform_indices = @transform_2, window_bounds = array<i64: 1, 128>}, {transform_indices = @transform_3, window_bounds = array<i64: 64, 128>}]} {
    %c0 = arith.constant 0 : index
    %c0_0 = arith.constant 0 : index
    %0 = vector.load %arg1[%c0, %c0_0] : memref<64x576xbf16, #tpu.memory_space<vmem>>, vector<64x576xbf16>
    %c0_1 = arith.constant 0 : index
    %c0_2 = arith.constant 0 : index
    %1 = vector.load %arg2[%c0_1, %c0_2] : memref<576x128xbf16, #tpu.memory_space<vmem>>, vector<576x128xbf16>
    %cst = arith.constant dense<0.000000e+00> : vector<64x128xf32>
    %2 = tpu.matmul %0, %1, %cst {dimension_numbers = #tpu.dot_dimension_numbers<[1], [0], [0], [1], [0, 0, 1, 1], [], []>} : vector<64x576xbf16>, vector<576x128xbf16>, vector<64x128xf32> -> vector<64x128xf32>
    %c0_3 = arith.constant 0 : index
    %c0_4 = arith.constant 0 : index
    %3 = vector.load %arg3[%c0_3, %c0_4] : memref<1x128xf32, #tpu.memory_space<vmem>>, vector<1x128xf32>
    %4 = vector.broadcast %3 : vector<1x128xf32> to vector<64x128xf32>
    %5 = arith.addf %2, %4 : vector<64x128xf32>
    %cst_5 = arith.constant 0.000000e+00 : f32
    %6 = vector.broadcast %cst_5 : f32 to vector<64x128xf32>
    %7 = arith.maximumf %5, %6 : vector<64x128xf32>
    %c0_6 = arith.constant 0 : index
    %c0_7 = arith.constant 0 : index
    %8 = vector.load %arg4[%c0_6, %c0_7] : memref<64x128xf32, #tpu.memory_space<vmem>>, vector<64x128xf32>
    tpu.vector_store %arg4[%c0_6, %c0_7], %7 {strides = array<i32>} : memref<64x128xf32, #tpu.memory_space<vmem>>, vector<64x128xf32>,
    return
  }
  func.func @transform_0(%arg0: i32) -> (i32, i32) {
    %c0_i32 = arith.constant 0 : i32
    %c0_i32_0 = arith.constant 0 : i32
    return %arg0, %c0_i32 : i32, i32
  }
  func.func @transform_1(%arg0: i32) -> (i32, i32) {
    %c0_i32 = arith.constant 0 : i32
    %c0_i32_0 = arith.constant 0 : i32
    %c0_i32_1 = arith.constant 0 : i32
    return %c0_i32, %c0_i32_0 : i32, i32
  }
  func.func @transform_2(%arg0: i32) -> (i32, i32) {
    %c0_i32 = arith.constant 0 : i32
    %c0_i32_0 = arith.constant 0 : i32
    %c0_i32_1 = arith.constant 0 : i32
    return %c0_i32, %c0_i32_0 : i32, i32
  }
  func.func @transform_3(%arg0: i32) -> (i32, i32) {
    %c0_i32 = arith.constant 0 : i32
    %c0_i32_0 = arith.constant 0 : i32
    return %arg0, %c0_i32 : i32, i32
  }
}

module attributes {stable_mosaic.version = 11 : i64} {
  func.func @_head_kernel(%arg0: i32, %arg1: memref<1x32x64xf32, #tpu.memory_space<vmem>>, %arg2: memref<32x64xf32, #tpu.memory_space<vmem>>, %arg3: memref<16x64xf32, #tpu.memory_space<vmem>>, %arg4: memref<64x192xf32, #tpu.memory_space<vmem>>, %arg5: memref<1x192xf32, #tpu.memory_space<vmem>>, %arg6: memref<64x64xf32, #tpu.memory_space<vmem>>, %arg7: memref<1x64xf32, #tpu.memory_space<vmem>>, %arg8: memref<64x64xf32, #tpu.memory_space<vmem>>, %arg9: memref<1x64xf32, #tpu.memory_space<vmem>>, %arg10: memref<64x128xf32, #tpu.memory_space<vmem>>, %arg11: memref<1x128xf32, #tpu.memory_space<vmem>>, %arg12: memref<64x64xf32, #tpu.memory_space<vmem>>, %arg13: memref<1x64xf32, #tpu.memory_space<vmem>>, %arg14: memref<1x64xf32, #tpu.memory_space<vmem>>, %arg15: memref<1x64xf32, #tpu.memory_space<vmem>>, %arg16: memref<1x64xf32, #tpu.memory_space<vmem>>, %arg17: memref<1x64xf32, #tpu.memory_space<vmem>>, %arg18: memref<1x64xf32, #tpu.memory_space<vmem>>, %arg19: memref<1x64xf32, #tpu.memory_space<vmem>>, %arg20: memref<64x256xf32, #tpu.memory_space<vmem>>, %arg21: memref<1x256xf32, #tpu.memory_space<vmem>>, %arg22: memref<256x64xf32, #tpu.memory_space<vmem>>, %arg23: memref<1x64xf32, #tpu.memory_space<vmem>>, %arg24: memref<64x128xf32, #tpu.memory_space<vmem>>, %arg25: memref<1x128xf32, #tpu.memory_space<vmem>>, %arg26: memref<1x16x128xf32, #tpu.memory_space<vmem>>) attributes {dimension_semantics = [#tpu.dimension_semantics<parallel>], iteration_bounds = array<i64: 2>, scalar_prefetch = 0 : i64, scratch_operands = 0 : i64, tpu.core_type = #tpu.core_type<tc>, window_params = [{transform_indices = @transform_0, window_bounds = array<i64: 1, 32, 64>}, {pipeline_mode = #tpu.pipeline_mode<synchronous>, transform_indices = @transform_1, window_bounds = array<i64: 32, 64>}, {pipeline_mode = #tpu.pipeline_mode<synchronous>, transform_indices = @transform_2, window_bounds = array<i64: 16, 64>}, {pipeline_mode = #tpu.pipeline_mode<synchronous>, transform_indices = @transform_3, window_bounds = array<i64: 64, 192>}, {pipeline_mode = #tpu.pipeline_mode<synchronous>, transform_indices = @transform_4, window_bounds = array<i64: 1, 192>}, {pipeline_mode = #tpu.pipeline_mode<synchronous>, transform_indices = @transform_5, window_bounds = array<i64: 64, 64>}, {pipeline_mode = #tpu.pipeline_mode<synchronous>, transform_indices = @transform_6, window_bounds = array<i64: 1, 64>}, {pipeline_mode = #tpu.pipeline_mode<synchronous>, transform_indices = @transform_7, window_bounds = array<i64: 64, 64>}, {pipeline_mode = #tpu.pipeline_mode<synchronous>, transform_indices = @transform_8, window_bounds = array<i64: 1, 64>}, {pipeline_mode = #tpu.pipeline_mode<synchronous>, transform_indices = @transform_9, window_bounds = array<i64: 64, 128>}, {pipeline_mode = #tpu.pipeline_mode<synchronous>, transform_indices = @transform_10, window_bounds = array<i64: 1, 128>}, {pipeline_mode = #tpu.pipeline_mode<synchronous>, transform_indices = @transform_11, window_bounds = array<i64: 64, 64>}, {pipeline_mode = #tpu.pipeline_mode<synchronous>, transform_indices = @transform_12, window_bounds = array<i64: 1, 64>}, {pipeline_mode = #tpu.pipeline_mode<synchronous>, transform_indices = @transform_13, window_bounds = array<i64: 1, 64>}, {pipeline_mode = #tpu.pipeline_mode<synchronous>, transform_indices = @transform_14, window_bounds = array<i64: 1, 64>}, {pipeline_mode = #tpu.pipeline_mode<synchronous>, transform_indices = @transform_15, window_bounds = array<i64: 1, 64>}, {pipeline_mode = #tpu.pipeline_mode<synchronous>, transform_indices = @transform_16, window_bounds = array<i64: 1, 64>}, {pipeline_mode = #tpu.pipeline_mode<synchronous>, transform_indices = @transform_17, window_bounds = array<i64: 1, 64>}, {pipeline_mode = #tpu.pipeline_mode<synchronous>, transform_indices = @transform_18, window_bounds = array<i64: 1, 64>}, {pipeline_mode = #tpu.pipeline_mode<synchronous>, transform_indices = @transform_19, window_bounds = array<i64: 64, 256>}, {pipeline_mode = #tpu.pipeline_mode<synchronous>, transform_indices = @transform_20, window_bounds = array<i64: 1, 256>}, {pipeline_mode = #tpu.pipeline_mode<synchronous>, transform_indices = @transform_21, window_bounds = array<i64: 256, 64>}, {pipeline_mode = #tpu.pipeline_mode<synchronous>, transform_indices = @transform_22, window_bounds = array<i64: 1, 64>}, {pipeline_mode = #tpu.pipeline_mode<synchronous>, transform_indices = @transform_23, window_bounds = array<i64: 64, 128>}, {pipeline_mode = #tpu.pipeline_mode<synchronous>, transform_indices = @transform_24, window_bounds = array<i64: 1, 128>}, {transform_indices = @transform_25, window_bounds = array<i64: 1, 16, 128>}]} {
    %c0 = arith.constant 0 : index
    %c0_0 = arith.constant 0 : index
    %c0_1 = arith.constant 0 : index
    %0 = vector.load %arg1[%c0, %c0_0, %c0_1] : memref<1x32x64xf32, #tpu.memory_space<vmem>>, vector<1x32x64xf32>
    %1 = vector.shape_cast %0 : vector<1x32x64xf32> to vector<32x64xf32>
    %c0_2 = arith.constant 0 : index
    %c0_3 = arith.constant 0 : index
    %2 = vector.load %arg2[%c0_2, %c0_3] : memref<32x64xf32, #tpu.memory_space<vmem>>, vector<32x64xf32>
    %3 = arith.addf %1, %2 : vector<32x64xf32>
    %c0_4 = arith.constant 0 : index
    %c0_5 = arith.constant 0 : index
    %4 = vector.load %arg3[%c0_4, %c0_5] : memref<16x64xf32, #tpu.memory_space<vmem>>, vector<16x64xf32>
    %c0_6 = arith.constant 0 : index
    %c0_7 = arith.constant 0 : index
    %5 = vector.load %arg4[%c0_6, %c0_7] : memref<64x192xf32, #tpu.memory_space<vmem>>, vector<64x192xf32>
    %cst = arith.constant dense<0.000000e+00> : vector<16x192xf32>
    %6 = tpu.matmul %4, %5, %cst {dimension_numbers = #tpu.dot_dimension_numbers<[1], [0], [0], [1], [0, 0, 1, 1], [], []>} : vector<16x64xf32>, vector<64x192xf32>, vector<16x192xf32> -> vector<16x192xf32>
    %c0_8 = arith.constant 0 : index
    %c0_9 = arith.constant 0 : index
    %7 = vector.load %arg5[%c0_8, %c0_9] : memref<1x192xf32, #tpu.memory_space<vmem>>, vector<1x192xf32>
    %8 = vector.broadcast %7 : vector<1x192xf32> to vector<16x192xf32>
    %9 = arith.addf %6, %8 : vector<16x192xf32>
    %10 = vector.extract_strided_slice %9 {offsets = [0, 0], sizes = [16, 64], strides = [1, 1]} : vector<16x192xf32> to vector<16x64xf32>
    %11 = vector.extract_strided_slice %9 {offsets = [0, 64], sizes = [16, 64], strides = [1, 1]} : vector<16x192xf32> to vector<16x64xf32>
    %12 = vector.extract_strided_slice %9 {offsets = [0, 128], sizes = [16, 64], strides = [1, 1]} : vector<16x192xf32> to vector<16x64xf32>
    %13 = vector.extract_strided_slice %10 {offsets = [0, 0], sizes = [16, 16], strides = [1, 1]} : vector<16x64xf32> to vector<16x16xf32>
    %14 = vector.extract_strided_slice %11 {offsets = [0, 0], sizes = [16, 16], strides = [1, 1]} : vector<16x64xf32> to vector<16x16xf32>
    %15 = vector.extract_strided_slice %12 {offsets = [0, 0], sizes = [16, 16], strides = [1, 1]} : vector<16x64xf32> to vector<16x16xf32>
    %cst_10 = arith.constant dense<0.000000e+00> : vector<16x16xf32>
    %16 = tpu.matmul %13, %14, %cst_10 {dimension_numbers = #tpu.dot_dimension_numbers<[1], [1], [0], [0], [0, 0, 1, 0], [], []>} : vector<16x16xf32>, vector<16x16xf32>, vector<16x16xf32> -> vector<16x16xf32>
    %cst_11 = arith.constant 2.500000e-01 : f32
    %17 = vector.broadcast %cst_11 : f32 to vector<16x16xf32>
    %18 = arith.mulf %16, %17 : vector<16x16xf32>
    %cst_12 = arith.constant dense<0xFF800000> : vector<16xf32>
    %19 = vector.multi_reduction <maximumf>, %18, %cst_12 [1] : vector<16x16xf32> to vector<16xf32>
    %20 = vector.shape_cast %19 : vector<16xf32> to vector<16x1xf32>
    %21 = vector.broadcast %20 : vector<16x1xf32> to vector<16x16xf32>
    %22 = arith.subf %18, %21 : vector<16x16xf32>
    %23 = math.exp %22 : vector<16x16xf32>
    %cst_13 = arith.constant dense<0.000000e+00> : vector<16xf32>
    %24 = vector.multi_reduction <add>, %23, %cst_13 [1] : vector<16x16xf32> to vector<16xf32>
    %25 = vector.shape_cast %24 : vector<16xf32> to vector<16x1xf32>
    %26 = tpu.reciprocal %25 {approx = true} : vector<16x1xf32> -> vector<16x1xf32>
    %27 = vector.broadcast %26 : vector<16x1xf32> to vector<16x16xf32>
    %28 = arith.mulf %23, %27 : vector<16x16xf32>
    %cst_14 = arith.constant dense<0.000000e+00> : vector<16x16xf32>
    %29 = tpu.matmul %28, %15, %cst_14 {dimension_numbers = #tpu.dot_dimension_numbers<[1], [0], [0], [1], [0, 0, 1, 1], [], []>} : vector<16x16xf32>, vector<16x16xf32>, vector<16x16xf32> -> vector<16x16xf32>
    %c0_15 = arith.constant 0 : index
    %c0_16 = arith.constant 0 : index
    %30 = vector.load %arg6[%c0_15, %c0_16] : memref<64x64xf32, #tpu.memory_space<vmem>>, vector<16x64xf32>
    %cst_17 = arith.constant dense<0.000000e+00> : vector<16x64xf32>
    %31 = tpu.matmul %29, %30, %cst_17 {dimension_numbers = #tpu.dot_dimension_numbers<[1], [0], [0], [1], [0, 0, 1, 1], [], []>} : vector<16x16xf32>, vector<16x64xf32>, vector<16x64xf32> -> vector<16x64xf32>
    %32 = vector.extract_strided_slice %10 {offsets = [0, 16], sizes = [16, 16], strides = [1, 1]} : vector<16x64xf32> to vector<16x16xf32>
    %33 = vector.extract_strided_slice %11 {offsets = [0, 16], sizes = [16, 16], strides = [1, 1]} : vector<16x64xf32> to vector<16x16xf32>
    %34 = vector.extract_strided_slice %12 {offsets = [0, 16], sizes = [16, 16], strides = [1, 1]} : vector<16x64xf32> to vector<16x16xf32>
    %cst_18 = arith.constant dense<0.000000e+00> : vector<16x16xf32>
    %35 = tpu.matmul %32, %33, %cst_18 {dimension_numbers = #tpu.dot_dimension_numbers<[1], [1], [0], [0], [0, 0, 1, 0], [], []>} : vector<16x16xf32>, vector<16x16xf32>, vector<16x16xf32> -> vector<16x16xf32>
    %cst_19 = arith.constant 2.500000e-01 : f32
    %36 = vector.broadcast %cst_19 : f32 to vector<16x16xf32>
    %37 = arith.mulf %35, %36 : vector<16x16xf32>
    %cst_20 = arith.constant dense<0xFF800000> : vector<16xf32>
    %38 = vector.multi_reduction <maximumf>, %37, %cst_20 [1] : vector<16x16xf32> to vector<16xf32>
    %39 = vector.shape_cast %38 : vector<16xf32> to vector<16x1xf32>
    %40 = vector.broadcast %39 : vector<16x1xf32> to vector<16x16xf32>
    %41 = arith.subf %37, %40 : vector<16x16xf32>
    %42 = math.exp %41 : vector<16x16xf32>
    %cst_21 = arith.constant dense<0.000000e+00> : vector<16xf32>
    %43 = vector.multi_reduction <add>, %42, %cst_21 [1] : vector<16x16xf32> to vector<16xf32>
    %44 = vector.shape_cast %43 : vector<16xf32> to vector<16x1xf32>
    %45 = tpu.reciprocal %44 {approx = true} : vector<16x1xf32> -> vector<16x1xf32>
    %46 = vector.broadcast %45 : vector<16x1xf32> to vector<16x16xf32>
    %47 = arith.mulf %42, %46 : vector<16x16xf32>
    %cst_22 = arith.constant dense<0.000000e+00> : vector<16x16xf32>
    %48 = tpu.matmul %47, %34, %cst_22 {dimension_numbers = #tpu.dot_dimension_numbers<[1], [0], [0], [1], [0, 0, 1, 1], [], []>} : vector<16x16xf32>, vector<16x16xf32>, vector<16x16xf32> -> vector<16x16xf32>
    %c16 = arith.constant 16 : index
    %c0_23 = arith.constant 0 : index
    %49 = vector.load %arg6[%c16, %c0_23] : memref<64x64xf32, #tpu.memory_space<vmem>>, vector<16x64xf32>
    %cst_24 = arith.constant dense<0.000000e+00> : vector<16x64xf32>
    %50 = tpu.matmul %48, %49, %cst_24 {dimension_numbers = #tpu.dot_dimension_numbers<[1], [0], [0], [1], [0, 0, 1, 1], [], []>} : vector<16x16xf32>, vector<16x64xf32>, vector<16x64xf32> -> vector<16x64xf32>
    %51 = arith.addf %31, %50 : vector<16x64xf32>
    %52 = vector.extract_strided_slice %10 {offsets = [0, 32], sizes = [16, 16], strides = [1, 1]} : vector<16x64xf32> to vector<16x16xf32>
    %53 = vector.extract_strided_slice %11 {offsets = [0, 32], sizes = [16, 16], strides = [1, 1]} : vector<16x64xf32> to vector<16x16xf32>
    %54 = vector.extract_strided_slice %12 {offsets = [0, 32], sizes = [16, 16], strides = [1, 1]} : vector<16x64xf32> to vector<16x16xf32>
    %cst_25 = arith.constant dense<0.000000e+00> : vector<16x16xf32>
    %55 = tpu.matmul %52, %53, %cst_25 {dimension_numbers = #tpu.dot_dimension_numbers<[1], [1], [0], [0], [0, 0, 1, 0], [], []>} : vector<16x16xf32>, vector<16x16xf32>, vector<16x16xf32> -> vector<16x16xf32>
    %cst_26 = arith.constant 2.500000e-01 : f32
    %56 = vector.broadcast %cst_26 : f32 to vector<16x16xf32>
    %57 = arith.mulf %55, %56 : vector<16x16xf32>
    %cst_27 = arith.constant dense<0xFF800000> : vector<16xf32>
    %58 = vector.multi_reduction <maximumf>, %57, %cst_27 [1] : vector<16x16xf32> to vector<16xf32>
    %59 = vector.shape_cast %58 : vector<16xf32> to vector<16x1xf32>
    %60 = vector.broadcast %59 : vector<16x1xf32> to vector<16x16xf32>
    %61 = arith.subf %57, %60 : vector<16x16xf32>
    %62 = math.exp %61 : vector<16x16xf32>
    %cst_28 = arith.constant dense<0.000000e+00> : vector<16xf32>
    %63 = vector.multi_reduction <add>, %62, %cst_28 [1] : vector<16x16xf32> to vector<16xf32>
    %64 = vector.shape_cast %63 : vector<16xf32> to vector<16x1xf32>
    %65 = tpu.reciprocal %64 {approx = true} : vector<16x1xf32> -> vector<16x1xf32>
    %66 = vector.broadcast %65 : vector<16x1xf32> to vector<16x16xf32>
    %67 = arith.mulf %62, %66 : vector<16x16xf32>
    %cst_29 = arith.constant dense<0.000000e+00> : vector<16x16xf32>
    %68 = tpu.matmul %67, %54, %cst_29 {dimension_numbers = #tpu.dot_dimension_numbers<[1], [0], [0], [1], [0, 0, 1, 1], [], []>} : vector<16x16xf32>, vector<16x16xf32>, vector<16x16xf32> -> vector<16x16xf32>
    %c32 = arith.constant 32 : index
    %c0_30 = arith.constant 0 : index
    %69 = vector.load %arg6[%c32, %c0_30] : memref<64x64xf32, #tpu.memory_space<vmem>>, vector<16x64xf32>
    %cst_31 = arith.constant dense<0.000000e+00> : vector<16x64xf32>
    %70 = tpu.matmul %68, %69, %cst_31 {dimension_numbers = #tpu.dot_dimension_numbers<[1], [0], [0], [1], [0, 0, 1, 1], [], []>} : vector<16x16xf32>, vector<16x64xf32>, vector<16x64xf32> -> vector<16x64xf32>
    %71 = arith.addf %51, %70 : vector<16x64xf32>
    %72 = vector.extract_strided_slice %10 {offsets = [0, 48], sizes = [16, 16], strides = [1, 1]} : vector<16x64xf32> to vector<16x16xf32>
    %73 = vector.extract_strided_slice %11 {offsets = [0, 48], sizes = [16, 16], strides = [1, 1]} : vector<16x64xf32> to vector<16x16xf32>
    %74 = vector.extract_strided_slice %12 {offsets = [0, 48], sizes = [16, 16], strides = [1, 1]} : vector<16x64xf32> to vector<16x16xf32>
    %cst_32 = arith.constant dense<0.000000e+00> : vector<16x16xf32>
    %75 = tpu.matmul %72, %73, %cst_32 {dimension_numbers = #tpu.dot_dimension_numbers<[1], [1], [0], [0], [0, 0, 1, 0], [], []>} : vector<16x16xf32>, vector<16x16xf32>, vector<16x16xf32> -> vector<16x16xf32>
    %cst_33 = arith.constant 2.500000e-01 : f32
    %76 = vector.broadcast %cst_33 : f32 to vector<16x16xf32>
    %77 = arith.mulf %75, %76 : vector<16x16xf32>
    %cst_34 = arith.constant dense<0xFF800000> : vector<16xf32>
    %78 = vector.multi_reduction <maximumf>, %77, %cst_34 [1] : vector<16x16xf32> to vector<16xf32>
    %79 = vector.shape_cast %78 : vector<16xf32> to vector<16x1xf32>
    %80 = vector.broadcast %79 : vector<16x1xf32> to vector<16x16xf32>
    %81 = arith.subf %77, %80 : vector<16x16xf32>
    %82 = math.exp %81 : vector<16x16xf32>
    %cst_35 = arith.constant dense<0.000000e+00> : vector<16xf32>
    %83 = vector.multi_reduction <add>, %82, %cst_35 [1] : vector<16x16xf32> to vector<16xf32>
    %84 = vector.shape_cast %83 : vector<16xf32> to vector<16x1xf32>
    %85 = tpu.reciprocal %84 {approx = true} : vector<16x1xf32> -> vector<16x1xf32>
    %86 = vector.broadcast %85 : vector<16x1xf32> to vector<16x16xf32>
    %87 = arith.mulf %82, %86 : vector<16x16xf32>
    %cst_36 = arith.constant dense<0.000000e+00> : vector<16x16xf32>
    %88 = tpu.matmul %87, %74, %cst_36 {dimension_numbers = #tpu.dot_dimension_numbers<[1], [0], [0], [1], [0, 0, 1, 1], [], []>} : vector<16x16xf32>, vector<16x16xf32>, vector<16x16xf32> -> vector<16x16xf32>
    %c48 = arith.constant 48 : index
    %c0_37 = arith.constant 0 : index
    %89 = vector.load %arg6[%c48, %c0_37] : memref<64x64xf32, #tpu.memory_space<vmem>>, vector<16x64xf32>
    %cst_38 = arith.constant dense<0.000000e+00> : vector<16x64xf32>
    %90 = tpu.matmul %88, %89, %cst_38 {dimension_numbers = #tpu.dot_dimension_numbers<[1], [0], [0], [1], [0, 0, 1, 1], [], []>} : vector<16x16xf32>, vector<16x64xf32>, vector<16x64xf32> -> vector<16x64xf32>
    %91 = arith.addf %71, %90 : vector<16x64xf32>
    %c0_39 = arith.constant 0 : index
    %c0_40 = arith.constant 0 : index
    %92 = vector.load %arg7[%c0_39, %c0_40] : memref<1x64xf32, #tpu.memory_space<vmem>>, vector<1x64xf32>
    %93 = vector.broadcast %92 : vector<1x64xf32> to vector<16x64xf32>
    %94 = arith.addf %91, %93 : vector<16x64xf32>
    %95 = arith.addf %4, %94 : vector<16x64xf32>
    %cst_41 = arith.constant dense<0.000000e+00> : vector<16xf32>
    %96 = vector.multi_reduction <add>, %95, %cst_41 [1] : vector<16x64xf32> to vector<16xf32>
    %97 = vector.shape_cast %96 : vector<16xf32> to vector<16x1xf32>
    %cst_42 = arith.constant 6.400000e+01 : f32
    %98 = vector.broadcast %cst_42 : f32 to vector<16x1xf32>
    %99 = arith.divf %97, %98 : vector<16x1xf32>
    %100 = vector.broadcast %99 : vector<16x1xf32> to vector<16x64xf32>
    %101 = arith.subf %95, %100 : vector<16x64xf32>
    %102 = arith.mulf %101, %101 : vector<16x64xf32>
    %cst_43 = arith.constant dense<0.000000e+00> : vector<16xf32>
    %103 = vector.multi_reduction <add>, %102, %cst_43 [1] : vector<16x64xf32> to vector<16xf32>
    %104 = vector.shape_cast %103 : vector<16xf32> to vector<16x1xf32>
    %cst_44 = arith.constant 6.400000e+01 : f32
    %105 = vector.broadcast %cst_44 : f32 to vector<16x1xf32>
    %106 = arith.divf %104, %105 : vector<16x1xf32>
    %107 = vector.broadcast %99 : vector<16x1xf32> to vector<16x64xf32>
    %108 = arith.subf %95, %107 : vector<16x64xf32>
    %cst_45 = arith.constant 9.99999974E-6 : f32
    %109 = vector.broadcast %cst_45 : f32 to vector<16x1xf32>
    %110 = arith.addf %106, %109 : vector<16x1xf32>
    %111 = math.rsqrt %110 : vector<16x1xf32>
    %112 = vector.broadcast %111 : vector<16x1xf32> to vector<16x64xf32>
    %113 = arith.mulf %108, %112 : vector<16x64xf32>
    %c0_46 = arith.constant 0 : index
    %c0_47 = arith.constant 0 : index
    %114 = vector.load %arg14[%c0_46, %c0_47] : memref<1x64xf32, #tpu.memory_space<vmem>>, vector<1x64xf32>
    %115 = vector.broadcast %114 : vector<1x64xf32> to vector<16x64xf32>
    %116 = arith.mulf %113, %115 : vector<16x64xf32>
    %c0_48 = arith.constant 0 : index
    %c0_49 = arith.constant 0 : index
    %117 = vector.load %arg15[%c0_48, %c0_49] : memref<1x64xf32, #tpu.memory_space<vmem>>, vector<1x64xf32>
    %118 = vector.broadcast %117 : vector<1x64xf32> to vector<16x64xf32>
    %119 = arith.addf %116, %118 : vector<16x64xf32>
    %c0_50 = arith.constant 0 : index
    %c0_51 = arith.constant 0 : index
    %120 = vector.load %arg8[%c0_50, %c0_51] : memref<64x64xf32, #tpu.memory_space<vmem>>, vector<64x64xf32>
    %cst_52 = arith.constant dense<0.000000e+00> : vector<16x64xf32>
    %121 = tpu.matmul %119, %120, %cst_52 {dimension_numbers = #tpu.dot_dimension_numbers<[1], [0], [0], [1], [0, 0, 1, 1], [], []>} : vector<16x64xf32>, vector<64x64xf32>, vector<16x64xf32> -> vector<16x64xf32>
    %c0_53 = arith.constant 0 : index
    %c0_54 = arith.constant 0 : index
    %122 = vector.load %arg9[%c0_53, %c0_54] : memref<1x64xf32, #tpu.memory_space<vmem>>, vector<1x64xf32>
    %123 = vector.broadcast %122 : vector<1x64xf32> to vector<16x64xf32>
    %124 = arith.addf %121, %123 : vector<16x64xf32>
    %c0_55 = arith.constant 0 : index
    %c0_56 = arith.constant 0 : index
    %125 = vector.load %arg10[%c0_55, %c0_56] : memref<64x128xf32, #tpu.memory_space<vmem>>, vector<64x128xf32>
    %cst_57 = arith.constant dense<0.000000e+00> : vector<32x128xf32>
    %126 = tpu.matmul %3, %125, %cst_57 {dimension_numbers = #tpu.dot_dimension_numbers<[1], [0], [0], [1], [0, 0, 1, 1], [], []>} : vector<32x64xf32>, vector<64x128xf32>, vector<32x128xf32> -> vector<32x128xf32>
    %c0_58 = arith.constant 0 : index
    %c0_59 = arith.constant 0 : index
    %127 = vector.load %arg11[%c0_58, %c0_59] : memref<1x128xf32, #tpu.memory_space<vmem>>, vector<1x128xf32>
    %128 = vector.broadcast %127 : vector<1x128xf32> to vector<32x128xf32>
    %129 = arith.addf %126, %128 : vector<32x128xf32>
    %130 = vector.extract_strided_slice %129 {offsets = [0, 0], sizes = [32, 64], strides = [1, 1]} : vector<32x128xf32> to vector<32x64xf32>
    %131 = vector.extract_strided_slice %129 {offsets = [0, 64], sizes = [32, 64], strides = [1, 1]} : vector<32x128xf32> to vector<32x64xf32>
    %132 = vector.extract_strided_slice %124 {offsets = [0, 0], sizes = [16, 16], strides = [1, 1]} : vector<16x64xf32> to vector<16x16xf32>
    %133 = vector.extract_strided_slice %130 {offsets = [0, 0], sizes = [32, 16], strides = [1, 1]} : vector<32x64xf32> to vector<32x16xf32>
    %134 = vector.extract_strided_slice %131 {offsets = [0, 0], sizes = [32, 16], strides = [1, 1]} : vector<32x64xf32> to vector<32x16xf32>
    %cst_60 = arith.constant dense<0.000000e+00> : vector<16x32xf32>
    %135 = tpu.matmul %132, %133, %cst_60 {dimension_numbers = #tpu.dot_dimension_numbers<[1], [1], [0], [0], [0, 0, 1, 0], [], []>} : vector<16x16xf32>, vector<32x16xf32>, vector<16x32xf32> -> vector<16x32xf32>
    %cst_61 = arith.constant 2.500000e-01 : f32
    %136 = vector.broadcast %cst_61 : f32 to vector<16x32xf32>
    %137 = arith.mulf %135, %136 : vector<16x32xf32>
    %cst_62 = arith.constant dense<0xFF800000> : vector<16xf32>
    %138 = vector.multi_reduction <maximumf>, %137, %cst_62 [1] : vector<16x32xf32> to vector<16xf32>
    %139 = vector.shape_cast %138 : vector<16xf32> to vector<16x1xf32>
    %140 = vector.broadcast %139 : vector<16x1xf32> to vector<16x32xf32>
    %141 = arith.subf %137, %140 : vector<16x32xf32>
    %142 = math.exp %141 : vector<16x32xf32>
    %cst_63 = arith.constant dense<0.000000e+00> : vector<16xf32>
    %143 = vector.multi_reduction <add>, %142, %cst_63 [1] : vector<16x32xf32> to vector<16xf32>
    %144 = vector.shape_cast %143 : vector<16xf32> to vector<16x1xf32>
    %145 = tpu.reciprocal %144 {approx = true} : vector<16x1xf32> -> vector<16x1xf32>
    %146 = vector.broadcast %145 : vector<16x1xf32> to vector<16x32xf32>
    %147 = arith.mulf %142, %146 : vector<16x32xf32>
    %cst_64 = arith.constant dense<0.000000e+00> : vector<16x16xf32>
    %148 = tpu.matmul %147, %134, %cst_64 {dimension_numbers = #tpu.dot_dimension_numbers<[1], [0], [0], [1], [0, 0, 1, 1], [], []>} : vector<16x32xf32>, vector<32x16xf32>, vector<16x16xf32> -> vector<16x16xf32>
    %c0_65 = arith.constant 0 : index
    %c0_66 = arith.constant 0 : index
    %149 = vector.load %arg12[%c0_65, %c0_66] : memref<64x64xf32, #tpu.memory_space<vmem>>, vector<16x64xf32>
    %cst_67 = arith.constant dense<0.000000e+00> : vector<16x64xf32>
    %150 = tpu.matmul %148, %149, %cst_67 {dimension_numbers = #tpu.dot_dimension_numbers<[1], [0], [0], [1], [0, 0, 1, 1], [], []>} : vector<16x16xf32>, vector<16x64xf32>, vector<16x64xf32> -> vector<16x64xf32>
    %151 = vector.extract_strided_slice %124 {offsets = [0, 16], sizes = [16, 16], strides = [1, 1]} : vector<16x64xf32> to vector<16x16xf32>
    %152 = vector.extract_strided_slice %130 {offsets = [0, 16], sizes = [32, 16], strides = [1, 1]} : vector<32x64xf32> to vector<32x16xf32>
    %153 = vector.extract_strided_slice %131 {offsets = [0, 16], sizes = [32, 16], strides = [1, 1]} : vector<32x64xf32> to vector<32x16xf32>
    %cst_68 = arith.constant dense<0.000000e+00> : vector<16x32xf32>
    %154 = tpu.matmul %151, %152, %cst_68 {dimension_numbers = #tpu.dot_dimension_numbers<[1], [1], [0], [0], [0, 0, 1, 0], [], []>} : vector<16x16xf32>, vector<32x16xf32>, vector<16x32xf32> -> vector<16x32xf32>
    %cst_69 = arith.constant 2.500000e-01 : f32
    %155 = vector.broadcast %cst_69 : f32 to vector<16x32xf32>
    %156 = arith.mulf %154, %155 : vector<16x32xf32>
    %cst_70 = arith.constant dense<0xFF800000> : vector<16xf32>
    %157 = vector.multi_reduction <maximumf>, %156, %cst_70 [1] : vector<16x32xf32> to vector<16xf32>
    %158 = vector.shape_cast %157 : vector<16xf32> to vector<16x1xf32>
    %159 = vector.broadcast %158 : vector<16x1xf32> to vector<16x32xf32>
    %160 = arith.subf %156, %159 : vector<16x32xf32>
    %161 = math.exp %160 : vector<16x32xf32>
    %cst_71 = arith.constant dense<0.000000e+00> : vector<16xf32>
    %162 = vector.multi_reduction <add>, %161, %cst_71 [1] : vector<16x32xf32> to vector<16xf32>
    %163 = vector.shape_cast %162 : vector<16xf32> to vector<16x1xf32>
    %164 = tpu.reciprocal %163 {approx = true} : vector<16x1xf32> -> vector<16x1xf32>
    %165 = vector.broadcast %164 : vector<16x1xf32> to vector<16x32xf32>
    %166 = arith.mulf %161, %165 : vector<16x32xf32>
    %cst_72 = arith.constant dense<0.000000e+00> : vector<16x16xf32>
    %167 = tpu.matmul %166, %153, %cst_72 {dimension_numbers = #tpu.dot_dimension_numbers<[1], [0], [0], [1], [0, 0, 1, 1], [], []>} : vector<16x32xf32>, vector<32x16xf32>, vector<16x16xf32> -> vector<16x16xf32>
    %c16_73 = arith.constant 16 : index
    %c0_74 = arith.constant 0 : index
    %168 = vector.load %arg12[%c16_73, %c0_74] : memref<64x64xf32, #tpu.memory_space<vmem>>, vector<16x64xf32>
    %cst_75 = arith.constant dense<0.000000e+00> : vector<16x64xf32>
    %169 = tpu.matmul %167, %168, %cst_75 {dimension_numbers = #tpu.dot_dimension_numbers<[1], [0], [0], [1], [0, 0, 1, 1], [], []>} : vector<16x16xf32>, vector<16x64xf32>, vector<16x64xf32> -> vector<16x64xf32>
    %170 = arith.addf %150, %169 : vector<16x64xf32>
    %171 = vector.extract_strided_slice %124 {offsets = [0, 32], sizes = [16, 16], strides = [1, 1]} : vector<16x64xf32> to vector<16x16xf32>
    %172 = vector.extract_strided_slice %130 {offsets = [0, 32], sizes = [32, 16], strides = [1, 1]} : vector<32x64xf32> to vector<32x16xf32>
    %173 = vector.extract_strided_slice %131 {offsets = [0, 32], sizes = [32, 16], strides = [1, 1]} : vector<32x64xf32> to vector<32x16xf32>
    %cst_76 = arith.constant dense<0.000000e+00> : vector<16x32xf32>
    %174 = tpu.matmul %171, %172, %cst_76 {dimension_numbers = #tpu.dot_dimension_numbers<[1], [1], [0], [0], [0, 0, 1, 0], [], []>} : vector<16x16xf32>, vector<32x16xf32>, vector<16x32xf32> -> vector<16x32xf32>
    %cst_77 = arith.constant 2.500000e-01 : f32
    %175 = vector.broadcast %cst_77 : f32 to vector<16x32xf32>
    %176 = arith.mulf %174, %175 : vector<16x32xf32>
    %cst_78 = arith.constant dense<0xFF800000> : vector<16xf32>
    %177 = vector.multi_reduction <maximumf>, %176, %cst_78 [1] : vector<16x32xf32> to vector<16xf32>
    %178 = vector.shape_cast %177 : vector<16xf32> to vector<16x1xf32>
    %179 = vector.broadcast %178 : vector<16x1xf32> to vector<16x32xf32>
    %180 = arith.subf %176, %179 : vector<16x32xf32>
    %181 = math.exp %180 : vector<16x32xf32>
    %cst_79 = arith.constant dense<0.000000e+00> : vector<16xf32>
    %182 = vector.multi_reduction <add>, %181, %cst_79 [1] : vector<16x32xf32> to vector<16xf32>
    %183 = vector.shape_cast %182 : vector<16xf32> to vector<16x1xf32>
    %184 = tpu.reciprocal %183 {approx = true} : vector<16x1xf32> -> vector<16x1xf32>
    %185 = vector.broadcast %184 : vector<16x1xf32> to vector<16x32xf32>
    %186 = arith.mulf %181, %185 : vector<16x32xf32>
    %cst_80 = arith.constant dense<0.000000e+00> : vector<16x16xf32>
    %187 = tpu.matmul %186, %173, %cst_80 {dimension_numbers = #tpu.dot_dimension_numbers<[1], [0], [0], [1], [0, 0, 1, 1], [], []>} : vector<16x32xf32>, vector<32x16xf32>, vector<16x16xf32> -> vector<16x16xf32>
    %c32_81 = arith.constant 32 : index
    %c0_82 = arith.constant 0 : index
    %188 = vector.load %arg12[%c32_81, %c0_82] : memref<64x64xf32, #tpu.memory_space<vmem>>, vector<16x64xf32>
    %cst_83 = arith.constant dense<0.000000e+00> : vector<16x64xf32>
    %189 = tpu.matmul %187, %188, %cst_83 {dimension_numbers = #tpu.dot_dimension_numbers<[1], [0], [0], [1], [0, 0, 1, 1], [], []>} : vector<16x16xf32>, vector<16x64xf32>, vector<16x64xf32> -> vector<16x64xf32>
    %190 = arith.addf %170, %189 : vector<16x64xf32>
    %191 = vector.extract_strided_slice %124 {offsets = [0, 48], sizes = [16, 16], strides = [1, 1]} : vector<16x64xf32> to vector<16x16xf32>
    %192 = vector.extract_strided_slice %130 {offsets = [0, 48], sizes = [32, 16], strides = [1, 1]} : vector<32x64xf32> to vector<32x16xf32>
    %193 = vector.extract_strided_slice %131 {offsets = [0, 48], sizes = [32, 16], strides = [1, 1]} : vector<32x64xf32> to vector<32x16xf32>
    %cst_84 = arith.constant dense<0.000000e+00> : vector<16x32xf32>
    %194 = tpu.matmul %191, %192, %cst_84 {dimension_numbers = #tpu.dot_dimension_numbers<[1], [1], [0], [0], [0, 0, 1, 0], [], []>} : vector<16x16xf32>, vector<32x16xf32>, vector<16x32xf32> -> vector<16x32xf32>
    %cst_85 = arith.constant 2.500000e-01 : f32
    %195 = vector.broadcast %cst_85 : f32 to vector<16x32xf32>
    %196 = arith.mulf %194, %195 : vector<16x32xf32>
    %cst_86 = arith.constant dense<0xFF800000> : vector<16xf32>
    %197 = vector.multi_reduction <maximumf>, %196, %cst_86 [1] : vector<16x32xf32> to vector<16xf32>
    %198 = vector.shape_cast %197 : vector<16xf32> to vector<16x1xf32>
    %199 = vector.broadcast %198 : vector<16x1xf32> to vector<16x32xf32>
    %200 = arith.subf %196, %199 : vector<16x32xf32>
    %201 = math.exp %200 : vector<16x32xf32>
    %cst_87 = arith.constant dense<0.000000e+00> : vector<16xf32>
    %202 = vector.multi_reduction <add>, %201, %cst_87 [1] : vector<16x32xf32> to vector<16xf32>
    %203 = vector.shape_cast %202 : vector<16xf32> to vector<16x1xf32>
    %204 = tpu.reciprocal %203 {approx = true} : vector<16x1xf32> -> vector<16x1xf32>
    %205 = vector.broadcast %204 : vector<16x1xf32> to vector<16x32xf32>
    %206 = arith.mulf %201, %205 : vector<16x32xf32>
    %cst_88 = arith.constant dense<0.000000e+00> : vector<16x16xf32>
    %207 = tpu.matmul %206, %193, %cst_88 {dimension_numbers = #tpu.dot_dimension_numbers<[1], [0], [0], [1], [0, 0, 1, 1], [], []>} : vector<16x32xf32>, vector<32x16xf32>, vector<16x16xf32> -> vector<16x16xf32>
    %c48_89 = arith.constant 48 : index
    %c0_90 = arith.constant 0 : index
    %208 = vector.load %arg12[%c48_89, %c0_90] : memref<64x64xf32, #tpu.memory_space<vmem>>, vector<16x64xf32>
    %cst_91 = arith.constant dense<0.000000e+00> : vector<16x64xf32>
    %209 = tpu.matmul %207, %208, %cst_91 {dimension_numbers = #tpu.dot_dimension_numbers<[1], [0], [0], [1], [0, 0, 1, 1], [], []>} : vector<16x16xf32>, vector<16x64xf32>, vector<16x64xf32> -> vector<16x64xf32>
    %210 = arith.addf %190, %209 : vector<16x64xf32>
    %c0_92 = arith.constant 0 : index
    %c0_93 = arith.constant 0 : index
    %211 = vector.load %arg13[%c0_92, %c0_93] : memref<1x64xf32, #tpu.memory_space<vmem>>, vector<1x64xf32>
    %212 = vector.broadcast %211 : vector<1x64xf32> to vector<16x64xf32>
    %213 = arith.addf %210, %212 : vector<16x64xf32>
    %214 = arith.addf %119, %213 : vector<16x64xf32>
    %cst_94 = arith.constant dense<0.000000e+00> : vector<16xf32>
    %215 = vector.multi_reduction <add>, %214, %cst_94 [1] : vector<16x64xf32> to vector<16xf32>
    %216 = vector.shape_cast %215 : vector<16xf32> to vector<16x1xf32>
    %cst_95 = arith.constant 6.400000e+01 : f32
    %217 = vector.broadcast %cst_95 : f32 to vector<16x1xf32>
    %218 = arith.divf %216, %217 : vector<16x1xf32>
    %219 = vector.broadcast %218 : vector<16x1xf32> to vector<16x64xf32>
    %220 = arith.subf %214, %219 : vector<16x64xf32>
    %221 = arith.mulf %220, %220 : vector<16x64xf32>
    %cst_96 = arith.constant dense<0.000000e+00> : vector<16xf32>
    %222 = vector.multi_reduction <add>, %221, %cst_96 [1] : vector<16x64xf32> to vector<16xf32>
    %223 = vector.shape_cast %222 : vector<16xf32> to vector<16x1xf32>
    %cst_97 = arith.constant 6.400000e+01 : f32
    %224 = vector.broadcast %cst_97 : f32 to vector<16x1xf32>
    %225 = arith.divf %223, %224 : vector<16x1xf32>
    %226 = vector.broadcast %218 : vector<16x1xf32> to vector<16x64xf32>
    %227 = arith.subf %214, %226 : vector<16x64xf32>
    %cst_98 = arith.constant 9.99999974E-6 : f32
    %228 = vector.broadcast %cst_98 : f32 to vector<16x1xf32>
    %229 = arith.addf %225, %228 : vector<16x1xf32>
    %230 = math.rsqrt %229 : vector<16x1xf32>
    %231 = vector.broadcast %230 : vector<16x1xf32> to vector<16x64xf32>
    %232 = arith.mulf %227, %231 : vector<16x64xf32>
    %c0_99 = arith.constant 0 : index
    %c0_100 = arith.constant 0 : index
    %233 = vector.load %arg16[%c0_99, %c0_100] : memref<1x64xf32, #tpu.memory_space<vmem>>, vector<1x64xf32>
    %234 = vector.broadcast %233 : vector<1x64xf32> to vector<16x64xf32>
    %235 = arith.mulf %232, %234 : vector<16x64xf32>
    %c0_101 = arith.constant 0 : index
    %c0_102 = arith.constant 0 : index
    %236 = vector.load %arg17[%c0_101, %c0_102] : memref<1x64xf32, #tpu.memory_space<vmem>>, vector<1x64xf32>
    %237 = vector.broadcast %236 : vector<1x64xf32> to vector<16x64xf32>
    %238 = arith.addf %235, %237 : vector<16x64xf32>
    %c0_103 = arith.constant 0 : index
    %c0_104 = arith.constant 0 : index
    %239 = vector.load %arg20[%c0_103, %c0_104] : memref<64x256xf32, #tpu.memory_space<vmem>>, vector<64x256xf32>
    %cst_105 = arith.constant dense<0.000000e+00> : vector<16x256xf32>
    %240 = tpu.matmul %238, %239, %cst_105 {dimension_numbers = #tpu.dot_dimension_numbers<[1], [0], [0], [1], [0, 0, 1, 1], [], []>} : vector<16x64xf32>, vector<64x256xf32>, vector<16x256xf32> -> vector<16x256xf32>
    %c0_106 = arith.constant 0 : index
    %c0_107 = arith.constant 0 : index
    %241 = vector.load %arg21[%c0_106, %c0_107] : memref<1x256xf32, #tpu.memory_space<vmem>>, vector<1x256xf32>
    %242 = vector.broadcast %241 : vector<1x256xf32> to vector<16x256xf32>
    %243 = arith.addf %240, %242 : vector<16x256xf32>
    %cst_108 = arith.constant 0.000000e+00 : f32
    %244 = vector.broadcast %cst_108 : f32 to vector<16x256xf32>
    %245 = arith.maximumf %243, %244 : vector<16x256xf32>
    %c0_109 = arith.constant 0 : index
    %c0_110 = arith.constant 0 : index
    %246 = vector.load %arg22[%c0_109, %c0_110] : memref<256x64xf32, #tpu.memory_space<vmem>>, vector<256x64xf32>
    %cst_111 = arith.constant dense<0.000000e+00> : vector<16x64xf32>
    %247 = tpu.matmul %245, %246, %cst_111 {dimension_numbers = #tpu.dot_dimension_numbers<[1], [0], [0], [1], [0, 0, 1, 1], [], []>} : vector<16x256xf32>, vector<256x64xf32>, vector<16x64xf32> -> vector<16x64xf32>
    %c0_112 = arith.constant 0 : index
    %c0_113 = arith.constant 0 : index
    %248 = vector.load %arg23[%c0_112, %c0_113] : memref<1x64xf32, #tpu.memory_space<vmem>>, vector<1x64xf32>
    %249 = vector.broadcast %248 : vector<1x64xf32> to vector<16x64xf32>
    %250 = arith.addf %247, %249 : vector<16x64xf32>
    %251 = arith.addf %238, %250 : vector<16x64xf32>
    %cst_114 = arith.constant dense<0.000000e+00> : vector<16xf32>
    %252 = vector.multi_reduction <add>, %251, %cst_114 [1] : vector<16x64xf32> to vector<16xf32>
    %253 = vector.shape_cast %252 : vector<16xf32> to vector<16x1xf32>
    %cst_115 = arith.constant 6.400000e+01 : f32
    %254 = vector.broadcast %cst_115 : f32 to vector<16x1xf32>
    %255 = arith.divf %253, %254 : vector<16x1xf32>
    %256 = vector.broadcast %255 : vector<16x1xf32> to vector<16x64xf32>
    %257 = arith.subf %251, %256 : vector<16x64xf32>
    %258 = arith.mulf %257, %257 : vector<16x64xf32>
    %cst_116 = arith.constant dense<0.000000e+00> : vector<16xf32>
    %259 = vector.multi_reduction <add>, %258, %cst_116 [1] : vector<16x64xf32> to vector<16xf32>
    %260 = vector.shape_cast %259 : vector<16xf32> to vector<16x1xf32>
    %cst_117 = arith.constant 6.400000e+01 : f32
    %261 = vector.broadcast %cst_117 : f32 to vector<16x1xf32>
    %262 = arith.divf %260, %261 : vector<16x1xf32>
    %263 = vector.broadcast %255 : vector<16x1xf32> to vector<16x64xf32>
    %264 = arith.subf %251, %263 : vector<16x64xf32>
    %cst_118 = arith.constant 9.99999974E-6 : f32
    %265 = vector.broadcast %cst_118 : f32 to vector<16x1xf32>
    %266 = arith.addf %262, %265 : vector<16x1xf32>
    %267 = math.rsqrt %266 : vector<16x1xf32>
    %268 = vector.broadcast %267 : vector<16x1xf32> to vector<16x64xf32>
    %269 = arith.mulf %264, %268 : vector<16x64xf32>
    %c0_119 = arith.constant 0 : index
    %c0_120 = arith.constant 0 : index
    %270 = vector.load %arg18[%c0_119, %c0_120] : memref<1x64xf32, #tpu.memory_space<vmem>>, vector<1x64xf32>
    %271 = vector.broadcast %270 : vector<1x64xf32> to vector<16x64xf32>
    %272 = arith.mulf %269, %271 : vector<16x64xf32>
    %c0_121 = arith.constant 0 : index
    %c0_122 = arith.constant 0 : index
    %273 = vector.load %arg19[%c0_121, %c0_122] : memref<1x64xf32, #tpu.memory_space<vmem>>, vector<1x64xf32>
    %274 = vector.broadcast %273 : vector<1x64xf32> to vector<16x64xf32>
    %275 = arith.addf %272, %274 : vector<16x64xf32>
    %c0_123 = arith.constant 0 : index
    %c0_124 = arith.constant 0 : index
    %276 = vector.load %arg24[%c0_123, %c0_124] : memref<64x128xf32, #tpu.memory_space<vmem>>, vector<64x128xf32>
    %cst_125 = arith.constant dense<0.000000e+00> : vector<16x128xf32>
    %277 = tpu.matmul %275, %276, %cst_125 {dimension_numbers = #tpu.dot_dimension_numbers<[1], [0], [0], [1], [0, 0, 1, 1], [], []>} : vector<16x64xf32>, vector<64x128xf32>, vector<16x128xf32> -> vector<16x128xf32>
    %c0_126 = arith.constant 0 : index
    %c0_127 = arith.constant 0 : index
    %278 = vector.load %arg25[%c0_126, %c0_127] : memref<1x128xf32, #tpu.memory_space<vmem>>, vector<1x128xf32>
    %279 = vector.broadcast %278 : vector<1x128xf32> to vector<16x128xf32>
    %280 = arith.addf %277, %279 : vector<16x128xf32>
    %c0_128 = arith.constant 0 : index
    %c0_129 = arith.constant 0 : index
    %c0_130 = arith.constant 0 : index
    %281 = vector.load %arg26[%c0_128, %c0_129, %c0_130] : memref<1x16x128xf32, #tpu.memory_space<vmem>>, vector<1x16x128xf32>
    %282 = vector.shape_cast %281 : vector<1x16x128xf32> to vector<16x128xf32>
    %283 = vector.shape_cast %280 : vector<16x128xf32> to vector<1x16x128xf32>
    tpu.vector_store %arg26[%c0_128, %c0_129, %c0_130], %283 {strides = array<i32>} : memref<1x16x128xf32, #tpu.memory_space<vmem>>, vector<1x16x128xf32>,
    return
  }
  func.func @transform_0(%arg0: i32) -> (i32, i32, i32) {
    %c0_i32 = arith.constant 0 : i32
    %c0_i32_0 = arith.constant 0 : i32
    %c0_i32_1 = arith.constant 0 : i32
    return %arg0, %c0_i32, %c0_i32_0 : i32, i32, i32
  }
  func.func @transform_1(%arg0: i32) -> (i32, i32) {
    %c0_i32 = arith.constant 0 : i32
    %c0_i32_0 = arith.constant 0 : i32
    %c0_i32_1 = arith.constant 0 : i32
    return %c0_i32, %c0_i32_0 : i32, i32
  }
  func.func @transform_2(%arg0: i32) -> (i32, i32) {
    %c0_i32 = arith.constant 0 : i32
    %c0_i32_0 = arith.constant 0 : i32
    %c0_i32_1 = arith.constant 0 : i32
    return %c0_i32, %c0_i32_0 : i32, i32
  }
  func.func @transform_3(%arg0: i32) -> (i32, i32) {
    %c0_i32 = arith.constant 0 : i32
    %c0_i32_0 = arith.constant 0 : i32
    %c0_i32_1 = arith.constant 0 : i32
    return %c0_i32, %c0_i32_0 : i32, i32
  }
  func.func @transform_4(%arg0: i32) -> (i32, i32) {
    %c0_i32 = arith.constant 0 : i32
    %c0_i32_0 = arith.constant 0 : i32
    %c0_i32_1 = arith.constant 0 : i32
    return %c0_i32, %c0_i32_0 : i32, i32
  }
  func.func @transform_5(%arg0: i32) -> (i32, i32) {
    %c0_i32 = arith.constant 0 : i32
    %c0_i32_0 = arith.constant 0 : i32
    %c0_i32_1 = arith.constant 0 : i32
    return %c0_i32, %c0_i32_0 : i32, i32
  }
  func.func @transform_6(%arg0: i32) -> (i32, i32) {
    %c0_i32 = arith.constant 0 : i32
    %c0_i32_0 = arith.constant 0 : i32
    %c0_i32_1 = arith.constant 0 : i32
    return %c0_i32, %c0_i32_0 : i32, i32
  }
  func.func @transform_7(%arg0: i32) -> (i32, i32) {
    %c0_i32 = arith.constant 0 : i32
    %c0_i32_0 = arith.constant 0 : i32
    %c0_i32_1 = arith.constant 0 : i32
    return %c0_i32, %c0_i32_0 : i32, i32
  }
  func.func @transform_8(%arg0: i32) -> (i32, i32) {
    %c0_i32 = arith.constant 0 : i32
    %c0_i32_0 = arith.constant 0 : i32
    %c0_i32_1 = arith.constant 0 : i32
    return %c0_i32, %c0_i32_0 : i32, i32
  }
  func.func @transform_9(%arg0: i32) -> (i32, i32) {
    %c0_i32 = arith.constant 0 : i32
    %c0_i32_0 = arith.constant 0 : i32
    %c0_i32_1 = arith.constant 0 : i32
    return %c0_i32, %c0_i32_0 : i32, i32
  }
  func.func @transform_10(%arg0: i32) -> (i32, i32) {
    %c0_i32 = arith.constant 0 : i32
    %c0_i32_0 = arith.constant 0 : i32
    %c0_i32_1 = arith.constant 0 : i32
    return %c0_i32, %c0_i32_0 : i32, i32
  }
  func.func @transform_11(%arg0: i32) -> (i32, i32) {
    %c0_i32 = arith.constant 0 : i32
    %c0_i32_0 = arith.constant 0 : i32
    %c0_i32_1 = arith.constant 0 : i32
    return %c0_i32, %c0_i32_0 : i32, i32
  }
  func.func @transform_12(%arg0: i32) -> (i32, i32) {
    %c0_i32 = arith.constant 0 : i32
    %c0_i32_0 = arith.constant 0 : i32
    %c0_i32_1 = arith.constant 0 : i32
    return %c0_i32, %c0_i32_0 : i32, i32
  }
  func.func @transform_13(%arg0: i32) -> (i32, i32) {
    %c0_i32 = arith.constant 0 : i32
    %c0_i32_0 = arith.constant 0 : i32
    %c0_i32_1 = arith.constant 0 : i32
    return %c0_i32, %c0_i32_0 : i32, i32
  }
  func.func @transform_14(%arg0: i32) -> (i32, i32) {
    %c0_i32 = arith.constant 0 : i32
    %c0_i32_0 = arith.constant 0 : i32
    %c0_i32_1 = arith.constant 0 : i32
    return %c0_i32, %c0_i32_0 : i32, i32
  }
  func.func @transform_15(%arg0: i32) -> (i32, i32) {
    %c0_i32 = arith.constant 0 : i32
    %c0_i32_0 = arith.constant 0 : i32
    %c0_i32_1 = arith.constant 0 : i32
    return %c0_i32, %c0_i32_0 : i32, i32
  }
  func.func @transform_16(%arg0: i32) -> (i32, i32) {
    %c0_i32 = arith.constant 0 : i32
    %c0_i32_0 = arith.constant 0 : i32
    %c0_i32_1 = arith.constant 0 : i32
    return %c0_i32, %c0_i32_0 : i32, i32
  }
  func.func @transform_17(%arg0: i32) -> (i32, i32) {
    %c0_i32 = arith.constant 0 : i32
    %c0_i32_0 = arith.constant 0 : i32
    %c0_i32_1 = arith.constant 0 : i32
    return %c0_i32, %c0_i32_0 : i32, i32
  }
  func.func @transform_18(%arg0: i32) -> (i32, i32) {
    %c0_i32 = arith.constant 0 : i32
    %c0_i32_0 = arith.constant 0 : i32
    %c0_i32_1 = arith.constant 0 : i32
    return %c0_i32, %c0_i32_0 : i32, i32
  }
  func.func @transform_19(%arg0: i32) -> (i32, i32) {
    %c0_i32 = arith.constant 0 : i32
    %c0_i32_0 = arith.constant 0 : i32
    %c0_i32_1 = arith.constant 0 : i32
    return %c0_i32, %c0_i32_0 : i32, i32
  }
  func.func @transform_20(%arg0: i32) -> (i32, i32) {
    %c0_i32 = arith.constant 0 : i32
    %c0_i32_0 = arith.constant 0 : i32
    %c0_i32_1 = arith.constant 0 : i32
    return %c0_i32, %c0_i32_0 : i32, i32
  }
  func.func @transform_21(%arg0: i32) -> (i32, i32) {
    %c0_i32 = arith.constant 0 : i32
    %c0_i32_0 = arith.constant 0 : i32
    %c0_i32_1 = arith.constant 0 : i32
    return %c0_i32, %c0_i32_0 : i32, i32
  }
  func.func @transform_22(%arg0: i32) -> (i32, i32) {
    %c0_i32 = arith.constant 0 : i32
    %c0_i32_0 = arith.constant 0 : i32
    %c0_i32_1 = arith.constant 0 : i32
    return %c0_i32, %c0_i32_0 : i32, i32
  }
  func.func @transform_23(%arg0: i32) -> (i32, i32) {
    %c0_i32 = arith.constant 0 : i32
    %c0_i32_0 = arith.constant 0 : i32
    %c0_i32_1 = arith.constant 0 : i32
    return %c0_i32, %c0_i32_0 : i32, i32
  }
  func.func @transform_24(%arg0: i32) -> (i32, i32) {
    %c0_i32 = arith.constant 0 : i32
    %c0_i32_0 = arith.constant 0 : i32
    %c0_i32_1 = arith.constant 0 : i32
    return %c0_i32, %c0_i32_0 : i32, i32
  }
  func.func @transform_25(%arg0: i32) -> (i32, i32, i32) {
    %c0_i32 = arith.constant 0 : i32
    %c0_i32_0 = arith.constant 0 : i32
    %c0_i32_1 = arith.constant 0 : i32
    return %arg0, %c0_i32, %c0_i32_0 : i32, i32, i32
  }
}

</mosaic_0001>

<bundles_post_ra>
// kernel: forward.6
= control target key start
LH: loop header
LB: loop body
LE: loop exit
PB: predicated region body
PF: predicated region fallthrough
CT: control target
= control target key end

     0   :  { %v460_v3 = vmov 0.0   ;;  %vm461_vm0 = vmmov 0   ;;  %s738_s1 = inlined_call_operand.vmem [shape: f32[384,128], index: 1, kind: input, shape index: {}]   ;;  %s739_s0 = inlined_call_operand.vmem [shape: f32[8,384], index: 0, kind: input, shape index: {}]   ;;  %s740_s3 = inlined_call_operand.vmem [shape: f32[128,128], index: 3, kind: input, shape index: {}]   ;;  %s741_s2 = inlined_call_operand.vmem [shape: f32[1,128], index: 2, kind: input, shape index: {}]   ;;  %s742_s4 = inlined_call_operand.vmem [shape: f32[1,128], index: 4, kind: input, shape index: {}]   ;;  %s743_s5 = inlined_call_operand.vmem [shape: f32[8,128], index: 5, kind: output, shape index: {}]  }
   0x1   :  { %v54_v0 = vld [vmem:[%s738_s1 + $0xf8] sm:$0xff]  ;;  %v53_v2 = vld [vmem:[%s738_s1 + $0xf0] sm:$0xff]  ;;  %388 = vmatprep.subr.mxu1 %v460_v3  ;;  %420 = vmatprep.mubr.msk.f32.mxu1 %vm461_vm0, %v460_v3  ;;  %v52_v5 = vld [vmem:[%s738_s1 + $0xe8] sm:$0xff] }
   0x2   :  { %v38_v1 = vld [vmem:[%s738_s1 + $0x78] sm:$0xff]  ;;  %319 = vmatprep.subr.mxu0 %v54_v0  ;;  %v37_v4 = vld [vmem:[%s738_s1 + $0x70] sm:$0xff]  ;;  %v36_v7 = vld [vmem:[%s738_s1 + $0x68] sm:$0xff] }
   0x3   :  { %320 = vmatpush3.msra.mxu0 %v38_v1  ;;  %v70_v6 = vld [vmem:[%s738_s1 + $0x178] sm:$0xff]  ;;  %v69_v8 = vld [vmem:[%s738_s1 + $0x170] sm:$0xff]  ;;  %v51_v9 = vld [vmem:[%s738_s1 + $0xe0] sm:$0xff] }
   0x4   :  { %321 = vmatprep.subr.mxu0 %v53_v2  ;;  %389 = vmatpush3.msra.mxu1 %v70_v6  ;;  %v68_v10 = vld [vmem:[%s738_s1 + $0x168] sm:$0xff]  ;;  %v35_v11 = vld [vmem:[%s738_s1 + $0x60] sm:$0xff]  ;;  %v50_v12 = vld [vmem:[%s738_s1 + $0xd8] sm:$0xff] }
   0x5   :  { %322 = vmatpush3.msra.mxu0 %v37_v4  ;;  %390 = vmatprep.subr.mxu1 %v460_v3  ;;  %v67_v13 = vld [vmem:[%s738_s1 + $0x160] sm:$0xff]  ;;  %v34_v14 = vld [vmem:[%s738_s1 + $0x58] sm:$0xff]  ;;  %v49_v15 = vld [vmem:[%s738_s1 + $0xd0] sm:$0xff] }
   0x6   :  { %323 = vmatprep.subr.mxu0 %v52_v5  ;;  %391 = vmatpush3.msra.mxu1 %v69_v8  ;;  %v66_v16 = vld [vmem:[%s738_s1 + $0x158] sm:$0xff]  ;;  %v33_v17 = vld [vmem:[%s738_s1 + $0x50] sm:$0xff]  ;;  %v48_v18 = vld [vmem:[%s738_s1 + $0xc8] sm:$0xff] }
   0x7   :  { %324 = vmatpush3.msra.mxu0 %v36_v7  ;;  %392 = vmatprep.subr.mxu1 %v460_v3  ;;  %v65_v19 = vld [vmem:[%s738_s1 + $0x150] sm:$0xff]  ;;  %v32_v20 = vld [vmem:[%s738_s1 + $0x48] sm:$0xff]  ;;  %v47_v21 = vld [vmem:[%s738_s1 + $0xc0] sm:$0xff] }
   0x8   :  { %325 = vmatprep.subr.mxu0 %v51_v9  ;;  %393 = vmatpush3.msra.mxu1 %v68_v10  ;;  %v64_v22 = vld [vmem:[%s738_s1 + $0x148] sm:$0xff]  ;;  %v31_v23 = vld [vmem:[%s738_s1 + $0x40] sm:$0xff]  ;;  %v46_v24 = vld [vmem:[%s738_s1 + $0xb8] sm:$0xff] }
   0x9   :  { %326 = vmatpush3.msra.mxu0 %v35_v11  ;;  %394 = vmatprep.subr.mxu1 %v460_v3  ;;  %v63_v25 = vld [vmem:[%s738_s1 + $0x140] sm:$0xff]  ;;  %v30_v26 = vld [vmem:[%s738_s1 + $0x38] sm:$0xff]  ;;  %v45_v27 = vld [vmem:[%s738_s1 + $0xb0] sm:$0xff] }
   0xa   :  { %327 = vmatprep.subr.mxu0 %v50_v12  ;;  %395 = vmatpush3.msra.mxu1 %v67_v13  ;;  %v62_v28 = vld [vmem:[%s738_s1 + $0x138] sm:$0xff]  ;;  %v29_v29 = vld [vmem:[%s738_s1 + $0x30] sm:$0xff]  ;;  %v44_v30 = vld [vmem:[%s738_s1 + $0xa8] sm:$0xff] }
   0xb   :  { %328 = vmatpush3.msra.mxu0 %v34_v14  ;;  %396 = vmatprep.subr.mxu1 %v460_v3  ;;  %v61_v31 = vld [vmem:[%s738_s1 + $0x130] sm:$0xff]  ;;  %v28_v32 = vld [vmem:[%s738_s1 + $0x28] sm:$0xff]  ;;  %v43_v33 = vld [vmem:[%s738_s1 + $0xa0] sm:$0xff] }
   0xc   :  { %329 = vmatprep.subr.mxu0 %v49_v15  ;;  %397 = vmatpush3.msra.mxu1 %v66_v16  ;;  %v60_v34 = vld [vmem:[%s738_s1 + $0x128] sm:$0xff]  ;;  %v27_v35 = vld [vmem:[%s738_s1 + $0x20] sm:$0xff]  ;;  %v42_v36 = vld [vmem:[%s738_s1 + $0x98] sm:$0xff] }
   0xd   :  { %330 = vmatpush3.msra.mxu0 %v33_v17  ;;  %398 = vmatprep.subr.mxu1 %v460_v3  ;;  %v59_v37 = vld [vmem:[%s738_s1 + $0x120] sm:$0xff]  ;;  %v26_v38 = vld [vmem:[%s738_s1 + $0x18] sm:$0xff]  ;;  %v41_v39 = vld [vmem:[%s738_s1 + $0x90] sm:$0xff] }
   0xe   :  { %331 = vmatprep.subr.mxu0 %v48_v18  ;;  %399 = vmatpush3.msra.mxu1 %v65_v19  ;;  %v58_v40 = vld [vmem:[%s738_s1 + $0x118] sm:$0xff]  ;;  %v25_v41 = vld [vmem:[%s738_s1 + $0x10] sm:$0xff]  ;;  %v40_v42 = vld [vmem:[%s738_s1 + $0x88] sm:$0xff] }
   0xf   :  { %332 = vmatpush3.msra.mxu0 %v32_v20  ;;  %400 = vmatprep.subr.mxu1 %v460_v3  ;;  %v21_v43 = vld [vmem:[%s739_s0 + $0x8] sm:$0xff]  ;;  %v57_v45 = vld [vmem:[%s738_s1 + $0x110] sm:$0xff]  ;;  %v39_v46 = vld [vmem:[%s738_s1 + $0x80] sm:$0xff] }
  0x10   :  { %333 = vmatprep.subr.mxu0 %v47_v21  ;;  %401 = vmatpush3.msra.mxu1 %v64_v22  ;;  %v24_v44 = vld [vmem:[%s738_s1 + $0x8] sm:$0xff]  ;;  %v23_v47 = vld [vmem:[%s738_s1] sm:$0xff]  ;;  %v22_v51 = vld [vmem:[%s739_s0 + $0x10] sm:$0xff] }
  0x11   :  { %334 = vmatpush3.msra.mxu0 %v31_v23  ;;  %402 = vmatprep.subr.mxu1 %v460_v3  ;;  %v56_v48 = vld [vmem:[%s738_s1 + $0x108] sm:$0xff]  ;;  %v20_v49 = vld [vmem:[%s739_s0] sm:$0xff]  ;;  %v234_v52 = vld [vmem:[%s740_s3 + $0x78] sm:$0xff] }
  0x12   :  { %335 = vmatprep.subr.mxu0 %v46_v24  ;;  %403 = vmatpush3.msra.mxu1 %v63_v25  ;;  %v55_v50 = vld [vmem:[%s738_s1 + $0x100] sm:$0xff]  ;;  %v233_v53 = vld [vmem:[%s740_s3 + $0x70] sm:$0xff]  ;;  %v232_v54 = vld [vmem:[%s740_s3 + $0x68] sm:$0xff] }
  0x13   :  { %336 = vmatpush3.msra.mxu0 %v30_v26  ;;  %404 = vmatprep.subr.mxu1 %v460_v3  ;;  %v231_v55 = vld [vmem:[%s740_s3 + $0x60] sm:$0xff]  ;;  %v230_v56 = vld [vmem:[%s740_s3 + $0x58] sm:$0xff]  ;;  %v229_v57 = vld [vmem:[%s740_s3 + $0x50] sm:$0xff] }
  0x14   :  { %337 = vmatprep.subr.mxu0 %v45_v27  ;;  %405 = vmatpush3.msra.mxu1 %v62_v28  ;;  %v228_v58 = vld [vmem:[%s740_s3 + $0x48] sm:$0xff]  ;;  %v227_v59 = vld [vmem:[%s740_s3 + $0x40] sm:$0xff]  ;;  %v226_v60 = vld [vmem:[%s740_s3 + $0x38] sm:$0xff] }
  0x15   :  { %338 = vmatpush3.msra.mxu0 %v29_v29  ;;  %406 = vmatprep.subr.mxu1 %v460_v3  ;;  %v225_v61 = vld [vmem:[%s740_s3 + $0x30] sm:$0xff]  ;;  %v224_v62 = vld [vmem:[%s740_s3 + $0x28] sm:$0xff]  ;;  %v223_v63 = vld [vmem:[%s740_s3 + $0x20] sm:$0xff] }
  0x16   :  { %339 = vmatprep.subr.mxu0 %v44_v30  ;;  %407 = vmatpush3.msra.mxu1 %v61_v31  ;;  %v222_v0 = vld [vmem:[%s740_s3 + $0x18] sm:$0xff]  ;;  %v221_v1 = vld [vmem:[%s740_s3 + $0x10] sm:$0xff]  ;;  %v220_v2 = vld [vmem:[%s740_s3 + $0x8] sm:$0xff] }
  0x17   :  { %340 = vmatpush3.msra.mxu0 %v28_v32  ;;  %408 = vmatprep.subr.mxu1 %v460_v3  ;;  %v219_v4 = vld [vmem:[%s740_s3] sm:$0xff] }
  0x18   :  { %341 = vmatprep.subr.mxu0 %v43_v33  ;;  %409 = vmatpush3.msra.mxu1 %v60_v34  ;;  %v317_v7 = vld [vmem:[%s741_s2] ss:$0 sm:$0xff] }
  0x19   :  { %342 = vmatpush3.msra.mxu0 %v27_v35  ;;  %410 = vmatprep.subr.mxu1 %v460_v3 }
  0x1a   :  { %343 = vmatprep.subr.mxu0 %v42_v36  ;;  %411 = vmatpush3.msra.mxu1 %v59_v37 }
  0x1b   :  { %344 = vmatpush3.msra.mxu0 %v26_v38  ;;  %412 = vmatprep.subr.mxu1 %v460_v3 }
  0x1c   :  { %345 = vmatprep.subr.mxu0 %v41_v39  ;;  %413 = vmatpush3.msra.mxu1 %v58_v40 }
  0x1d   :  { %346 = vmatpush3.msra.mxu0 %v25_v41  ;;  %414 = vmatprep.subr.mxu1 %v460_v3 }
  0x1e   :  { %347 = vmatprep.subr.mxu0 %v40_v42  ;;  %142 = vmatprep.mubr.f32.mxu0 %v21_v43 }
  0x1f   :  { %348 = vmatpush3.msra.mxu0 %v24_v44  ;;  %415 = vmatpush3.msra.mxu1 %v57_v45 }
  0x20   :  { %349 = vmatprep.subr.mxu0 %v39_v46  ;;  %416 = vmatprep.subr.mxu1 %v460_v3 }
  0x21   :  { %350 = vmatpush3.msra.mxu0 %v23_v47  ;;  %417 = vmatpush3.msra.mxu1 %v56_v48 }
  0x22   :  { %143 = vmatmul.mubr.f32.vlgmr.msra.gmra.mxu0 %v20_v49  ;;  %418 = vmatprep.subr.mxu1 %v460_v3 }
  0x23   :  { %419 = vmatpush3.msra.mxu1 %v55_v50  ;;  %423 = vmatprep.subr.mxu0 %v460_v3 }
  0x24   :  { %421 = vmatmul.mubr.f32.vlgmr.msra.gmra.mxu1 %v22_v51  ;;  %424 = vmatpush3.msra.mxu0 %v234_v52 }
  0x25   :  { %425 = vmatprep.subr.mxu0 %v460_v3  ;;  %455 = vmatprep.mubr.msk.f32.mxu0 %vm461_vm0, %v460_v3 }
  0x26   :  { %426 = vmatpush3.msra.mxu0 %v233_v53 }
  0x27   :  { %427 = vmatprep.subr.mxu0 %v460_v3 }
  0x28   :  { %428 = vmatpush3.msra.mxu0 %v232_v54 }
  0x29   :  { %429 = vmatprep.subr.mxu0 %v460_v3 }
  0x2a   :  { %430 = vmatpush3.msra.mxu0 %v231_v55 }
  0x2b   :  { %431 = vmatprep.subr.mxu0 %v460_v3 }
  0x2c   :  { %432 = vmatpush3.msra.mxu0 %v230_v56 }
  0x2d   :  { %433 = vmatprep.subr.mxu0 %v460_v3 }
  0x2e   :  { %434 = vmatpush3.msra.mxu0 %v229_v57 }
  0x2f   :  { %435 = vmatprep.subr.mxu0 %v460_v3 }
  0x30   :  { %436 = vmatpush3.msra.mxu0 %v228_v58 }
  0x31   :  { %437 = vmatprep.subr.mxu0 %v460_v3 }
  0x32   :  { %438 = vmatpush3.msra.mxu0 %v227_v59 }
  0x33   :  { %439 = vmatprep.subr.mxu0 %v460_v3 }
  0x34   :  { %440 = vmatpush3.msra.mxu0 %v226_v60 }
  0x35   :  { %441 = vmatprep.subr.mxu0 %v460_v3 }
  0x36   :  { %442 = vmatpush3.msra.mxu0 %v225_v61 }
  0x37   :  { %443 = vmatprep.subr.mxu0 %v460_v3 }
  0x38   :  { %444 = vmatpush3.msra.mxu0 %v224_v62 }
  0x39   :  { %445 = vmatprep.subr.mxu0 %v460_v3 }
  0x3a   :  { %446 = vmatpush3.msra.mxu0 %v223_v63 }
  0x3b   :  { %447 = vmatprep.subr.mxu0 %v460_v3 }
  0x3c   :  { %448 = vmatpush3.msra.mxu0 %v222_v0 }
  0x3d   :  { %449 = vmatprep.subr.mxu0 %v460_v3 }
  0x3e   :  { %450 = vmatpush3.msra.mxu0 %v221_v1 }
  0x3f   :  { %451 = vmatprep.subr.mxu0 %v460_v3 }
  0x40   :  { %452 = vmatpush3.msra.mxu0 %v220_v2 }
  0x41   :  { %453 = vmatprep.subr.mxu0 %v460_v3  ;;  %v318_v3 = vld [vmem:[%s742_s4] ss:$0 sm:$0xff] }
  0x42   :  { %454 = vmatpush3.msra.mxu0 %v219_v4 }
  0xe2   :  { %v351_v5 = vpop.f32.mrf.mxu0 }
  0xe4   :  { %v352_v6 = vpop.f32.mrf.mxu0  ;;  %v214_v8 = vpop.f32.mrf.mxu1 }
  0xe5   :  { %v353_v9 = vadd.f32 %v352_v6, %v351_v5 }
  0xe6   :  { %v422_v10 = vpop.f32.mrf.mxu1 }
  0xe7   :  { %v145_v11 = vadd.f32 %v353_v9, %v317_v7 }
  0xe9   :  { %v215_v12 = vadd.f32 %v214_v8, %v145_v11 }
  0xeb   :  { %v218_v13 = vmax.f32 %v215_v12, 0.0 }
  0xed   :  { %456 = vmatmul.mubr.f32.vlgmr.msra.gmra.mxu0 %v218_v13 }
 0x1ad   :  { %v308_v14 = vpop.f32.mrf.mxu0 }
 0x1ae   :  { %v309_v15 = vadd.f32 %v318_v3, %v308_v14 }
 0x1af   :  { %v457_v16 = vpop.f32.mrf.mxu0 }
 0x1b0   :  { %312 = vst [vmem:[%s743_s5] sm:$0xff] %v309_v15 }

// kernel: forward.7
= control target key start
LH: loop header
LB: loop body
LE: loop exit
PB: predicated region body
PF: predicated region fallthrough
CT: control target
= control target key end

     0   :  { %s2236_s12 = smov 0   ;;  %s2793_s0 = inlined_call_operand.vmem [shape: f32[4096,27], index: 0, kind: input, shape index: {}]   ;;  %s2794_s1 = inlined_call_operand.vmem [shape: f32[27,128], index: 1, kind: input, shape index: {}]   ;;  %s2795_s2 = inlined_call_operand.vmem [shape: f32[1,128], index: 2, kind: input, shape index: {}]   ;;  %s2796_s3 = inlined_call_operand.vmem [shape: f32[4096,128], index: 3, kind: output, shape index: {}]  }
   0x1 LB: > { %s1719_s13 = sadd.s32 4294967295, %s2214_s12   ;;  %p1723_p0 = scmp.ge.s32.totalorder %s2214_s12, 1  ;;  %s2214_s12 = sphi %s2236_s12, %s13_s12  }
   0x2   : > { %p138_p1 = scmp.lt.s32.totalorder %s2214_s12, 5 }
   0x4   : > { %p139_p2 = pnand %p1723_p0, %p138_p1 }
   0x5   : > { %s1724_s18 = sshll.u32 (!%p139_p2), %s1719_s13, 7 }
   0x6   : > { %142 = sbr.rel (%p139_p2) target bundleno = 345 (0x159), region = 32  ;;  %p163_p3 = scmp.lt.s32.totalorder (!%p139_p2), %s1724_s18, 511 }
   0xb   : > { %v305_v0 = vld [vmem:[%s2794_s1 + $0x18] sm:$0x7]  ;;  %vm698_vm0 = vcmask 1042432   ;;  %v304_v1 = vld [vmem:[%s2794_s1 + $0x10] sm:$0xff]  ;;  %v303_v2 = vld [vmem:[%s2794_s1 + $0x8] sm:$0xff]  ;;  %s2798_s18 = smov (!%p163_p3, %s1724_s18), 511 }
   0xc   : > { %1992 = vmatprep.subr.msk.mxu0 %vm698_vm0, %v305_v0  ;;  %2192 = vmatprep.subr.msk.mxu1 %vm698_vm0, %v305_v0  ;;  %v302_v3 = vld [vmem:[%s2794_s1] sm:$0xff]  ;;  %s1725_s23 = sshll.u32 %s2798_s18, 3  ;;  %vm313_vm1 = vcmask 220160  }
   0xd   : > { %1993 = vmatpush3.msk.msra.mxu0 %vm698_vm0, %v305_v0  ;;  %2196 = vmatpush3.msk.msra.mxu1 %vm698_vm0, %v305_v0  ;;  %s2264_s26 = scalar_lea.vmem %s2793_s0, %s1725_s23  ;;  %s2534_s4 = scalar_lea.vmem %s2796_s3, %s1725_s23 }
   0xe   : > { %1994 = vmatprep.subr.mxu0 %v304_v1  ;;  %2193 = vmatprep.subr.mxu1 %v304_v1  ;;  %v174_v4 = vld [vmem:[%s2264_s26] sm:$0xff]  ;;  %v175_v6 = vld [vmem:[%s2264_s26 + $0x8] sm:$0xff]  ;;  %v176_v8 = vld [vmem:[%s2264_s26 + $0x10] sm:$0xff] }
   0xf   : > { %1995 = vmatpush3.msra.mxu0 %v304_v1  ;;  %2197 = vmatpush3.msra.mxu1 %v304_v1  ;;  %v238_v5 = vld [vmem:[%s2264_s26 + $0x200] sm:$0xff]  ;;  %v239_v7 = vld [vmem:[%s2264_s26 + $0x208] sm:$0xff]  ;;  %v240_v9 = vld [vmem:[%s2264_s26 + $0x210] sm:$0xff] }
  0x10   : > { %1996 = vmatprep.subr.mxu0 %v303_v2  ;;  %2194 = vmatprep.subr.mxu1 %v303_v2  ;;  %v177_v10 = vld [vmem:[%s2264_s26 + $0x18] sm:$0xff]  ;;  %v178_v12 = vld [vmem:[%s2264_s26 + $0x20] sm:$0xff]  ;;  %v179_v14 = vld [vmem:[%s2264_s26 + $0x28] sm:$0xff] }
  0x11   : > { %1997 = vmatpush3.msra.mxu0 %v303_v2  ;;  %2198 = vmatpush3.msra.mxu1 %v303_v2  ;;  %v241_v11 = vld [vmem:[%s2264_s26 + $0x218] sm:$0xff]  ;;  %v242_v13 = vld [vmem:[%s2264_s26 + $0x220] sm:$0xff]  ;;  %v243_v15 = vld [vmem:[%s2264_s26 + $0x228] sm:$0xff] }
  0x12   : > { %1998 = vmatprep.subr.mxu0 %v302_v3  ;;  %2195 = vmatprep.subr.mxu1 %v302_v3  ;;  %v180_v16 = vld [vmem:[%s2264_s26 + $0x30] sm:$0xff]  ;;  %v181_v18 = vld [vmem:[%s2264_s26 + $0x38] sm:$0xff]  ;;  %v182_v20 = vld [vmem:[%s2264_s26 + $0x40] sm:$0xff] }
  0x13   : > { %1999 = vmatpush3.msra.mxu0 %v302_v3  ;;  %2199 = vmatpush3.msra.mxu1 %v302_v3  ;;  %v244_v17 = vld [vmem:[%s2264_s26 + $0x230] sm:$0xff]  ;;  %v245_v19 = vld [vmem:[%s2264_s26 + $0x238] sm:$0xff]  ;;  %v246_v21 = vld [vmem:[%s2264_s26 + $0x240] sm:$0xff] }
  0x14   : > { %2000 = vmatprep.mubr.msk.f32.mxu0 %vm313_vm1, %v174_v4  ;;  %2096 = vmatprep.mubr.msk.f32.mxu1 %vm313_vm1, %v238_v5  ;;  %v183_v22 = vld [vmem:[%s2264_s26 + $0x48] sm:$0xff]  ;;  %v184_v24 = vld [vmem:[%s2264_s26 + $0x50] sm:$0xff]  ;;  %v185_v26 = vld [vmem:[%s2264_s26 + $0x58] sm:$0xff] }
  0x15   : > { %2001 = vmatmul.mubr.msk.f32.vlgmr.msra.gmra.mxu0 %vm313_vm1, %v175_v6  ;;  %2097 = vmatmul.mubr.msk.f32.vlgmr.msra.gmra.mxu1 %vm313_vm1, %v239_v7  ;;  %v247_v23 = vld [vmem:[%s2264_s26 + $0x248] sm:$0xff]  ;;  %v248_v25 = vld [vmem:[%s2264_s26 + $0x250] sm:$0xff]  ;;  %v249_v27 = vld [vmem:[%s2264_s26 + $0x258] sm:$0xff] }
  0x16   : > { %2003 = vmatprep.mubr.msk.f32.mxu0 %vm313_vm1, %v176_v8  ;;  %2099 = vmatprep.mubr.msk.f32.mxu1 %vm313_vm1, %v240_v9  ;;  %v186_v28 = vld [vmem:[%s2264_s26 + $0x60] sm:$0xff]  ;;  %v187_v30 = vld [vmem:[%s2264_s26 + $0x68] sm:$0xff]  ;;  %v188_v32 = vld [vmem:[%s2264_s26 + $0x70] sm:$0xff] }
  0x17   : > { %v250_v29 = vld [vmem:[%s2264_s26 + $0x260] sm:$0xff]  ;;  %v251_v31 = vld [vmem:[%s2264_s26 + $0x268] sm:$0xff]  ;;  %v252_v33 = vld [vmem:[%s2264_s26 + $0x270] sm:$0xff] }
  0x18   : > { %v189_v34 = vld [vmem:[%s2264_s26 + $0x78] sm:$0xff]  ;;  %v190_v36 = vld [vmem:[%s2264_s26 + $0x80] sm:$0xff]  ;;  %v191_v38 = vld [vmem:[%s2264_s26 + $0x88] sm:$0xff] }
  0x19   : > { %2004 = vmatmul.mubr.msk.f32.gmra.mxu0 %vm313_vm1, %v177_v10  ;;  %2100 = vmatmul.mubr.msk.f32.gmra.mxu1 %vm313_vm1, %v241_v11  ;;  %v253_v35 = vld [vmem:[%s2264_s26 + $0x278] sm:$0xff]  ;;  %v254_v37 = vld [vmem:[%s2264_s26 + $0x280] sm:$0xff]  ;;  %v255_v39 = vld [vmem:[%s2264_s26 + $0x288] sm:$0xff] }
  0x1a   : > { %2006 = vmatprep.mubr.msk.f32.mxu0 %vm313_vm1, %v178_v12  ;;  %2102 = vmatprep.mubr.msk.f32.mxu1 %vm313_vm1, %v242_v13  ;;  %v192_v40 = vld [vmem:[%s2264_s26 + $0x90] sm:$0xff]  ;;  %v193_v42 = vld [vmem:[%s2264_s26 + $0x98] sm:$0xff]  ;;  %v194_v44 = vld [vmem:[%s2264_s26 + $0xa0] sm:$0xff] }
  0x1b   : > { %v256_v41 = vld [vmem:[%s2264_s26 + $0x290] sm:$0xff]  ;;  %v257_v43 = vld [vmem:[%s2264_s26 + $0x298] sm:$0xff]  ;;  %v258_v45 = vld [vmem:[%s2264_s26 + $0x2a0] sm:$0xff] }
  0x1c   : > { %v195_v46 = vld [vmem:[%s2264_s26 + $0xa8] sm:$0xff]  ;;  %v196_v48 = vld [vmem:[%s2264_s26 + $0xb0] sm:$0xff]  ;;  %v197_v50 = vld [vmem:[%s2264_s26 + $0xb8] sm:$0xff] }
  0x1d   : > { %2007 = vmatmul.mubr.msk.f32.gmra.mxu0 %vm313_vm1, %v179_v14  ;;  %2103 = vmatmul.mubr.msk.f32.gmra.mxu1 %vm313_vm1, %v243_v15  ;;  %v259_v47 = vld [vmem:[%s2264_s26 + $0x2a8] sm:$0xff]  ;;  %v260_v49 = vld [vmem:[%s2264_s26 + $0x2b0] sm:$0xff]  ;;  %v261_v51 = vld [vmem:[%s2264_s26 + $0x2b8] sm:$0xff] }
  0x1e   : > { %2009 = vmatprep.mubr.msk.f32.mxu0 %vm313_vm1, %v180_v16  ;;  %2105 = vmatprep.mubr.msk.f32.mxu1 %vm313_vm1, %v244_v17  ;;  %v198_v52 = vld [vmem:[%s2264_s26 + $0xc0] sm:$0xff]  ;;  %v199_v54 = vld [vmem:[%s2264_s26 + $0xc8] sm:$0xff]  ;;  %v200_v56 = vld [vmem:[%s2264_s26 + $0xd0] sm:$0xff] }
  0x1f   : > { %v262_v53 = vld [vmem:[%s2264_s26 + $0x2c0] sm:$0xff]  ;;  %v263_v55 = vld [vmem:[%s2264_s26 + $0x2c8] sm:$0xff]  ;;  %v264_v57 = vld [vmem:[%s2264_s26 + $0x2d0] sm:$0xff] }
  0x20   : > { %v201_v58 = vld [vmem:[%s2264_s26 + $0xd8] sm:$0xff]  ;;  %v202_v60 = vld [vmem:[%s2264_s26 + $0xe0] sm:$0xff]  ;;  %v203_v62 = vld [vmem:[%s2264_s26 + $0xe8] sm:$0xff] }
  0x21   : > { %2010 = vmatmul.mubr.msk.f32.gmra.mxu0 %vm313_vm1, %v181_v18  ;;  %2106 = vmatmul.mubr.msk.f32.gmra.mxu1 %vm313_vm1, %v245_v19  ;;  %v265_v59 = vld [vmem:[%s2264_s26 + $0x2d8] sm:$0xff]  ;;  %v266_v61 = vld [vmem:[%s2264_s26 + $0x2e0] sm:$0xff]  ;;  %v267_v63 = vld [vmem:[%s2264_s26 + $0x2e8] sm:$0xff] }
  0x22   : > { %2012 = vmatprep.mubr.msk.f32.mxu0 %vm313_vm1, %v182_v20  ;;  %2108 = vmatprep.mubr.msk.f32.mxu1 %vm313_vm1, %v246_v21  ;;  %v204_v0 = vld [vmem:[%s2264_s26 + $0xf0] sm:$0xff]  ;;  %v205_v2 = vld [vmem:[%s2264_s26 + $0xf8] sm:$0xff]  ;;  %v206_v4 = vld [vmem:[%s2264_s26 + $0x100] sm:$0xff] }
  0x23   : > { %v268_v1 = vld [vmem:[%s2264_s26 + $0x2f0] sm:$0xff]  ;;  %v269_v3 = vld [vmem:[%s2264_s26 + $0x2f8] sm:$0xff]  ;;  %v270_v5 = vld [vmem:[%s2264_s26 + $0x300] sm:$0xff] }
  0x24   : > { %v207_v6 = vld [vmem:[%s2264_s26 + $0x108] sm:$0xff]  ;;  %v208_v8 = vld [vmem:[%s2264_s26 + $0x110] sm:$0xff]  ;;  %v209_v10 = vld [vmem:[%s2264_s26 + $0x118] sm:$0xff] }
  0x25   : > { %2013 = vmatmul.mubr.msk.f32.gmra.mxu0 %vm313_vm1, %v183_v22  ;;  %2109 = vmatmul.mubr.msk.f32.gmra.mxu1 %vm313_vm1, %v247_v23  ;;  %v271_v7 = vld [vmem:[%s2264_s26 + $0x308] sm:$0xff]  ;;  %v272_v9 = vld [vmem:[%s2264_s26 + $0x310] sm:$0xff]  ;;  %v273_v11 = vld [vmem:[%s2264_s26 + $0x318] sm:$0xff] }
  0x26   : > { %2015 = vmatprep.mubr.msk.f32.mxu0 %vm313_vm1, %v184_v24  ;;  %2111 = vmatprep.mubr.msk.f32.mxu1 %vm313_vm1, %v248_v25  ;;  %v210_v12 = vld [vmem:[%s2264_s26 + $0x120] sm:$0xff]  ;;  %v211_v14 = vld [vmem:[%s2264_s26 + $0x128] sm:$0xff]  ;;  %v212_v16 = vld [vmem:[%s2264_s26 + $0x130] sm:$0xff] }
  0x27   : > { %v274_v13 = vld [vmem:[%s2264_s26 + $0x320] sm:$0xff]  ;;  %v275_v15 = vld [vmem:[%s2264_s26 + $0x328] sm:$0xff]  ;;  %v276_v17 = vld [vmem:[%s2264_s26 + $0x330] sm:$0xff] }
  0x28   : > { %v213_v18 = vld [vmem:[%s2264_s26 + $0x138] sm:$0xff]  ;;  %v214_v20 = vld [vmem:[%s2264_s26 + $0x140] sm:$0xff]  ;;  %v215_v22 = vld [vmem:[%s2264_s26 + $0x148] sm:$0xff] }
  0x29   : > { %2016 = vmatmul.mubr.msk.f32.gmra.mxu0 %vm313_vm1, %v185_v26  ;;  %2112 = vmatmul.mubr.msk.f32.gmra.mxu1 %vm313_vm1, %v249_v27  ;;  %v277_v19 = vld [vmem:[%s2264_s26 + $0x338] sm:$0xff]  ;;  %v278_v21 = vld [vmem:[%s2264_s26 + $0x340] sm:$0xff]  ;;  %v279_v23 = vld [vmem:[%s2264_s26 + $0x348] sm:$0xff] }
  0x2a   : > { %2018 = vmatprep.mubr.msk.f32.mxu0 %vm313_vm1, %v186_v28  ;;  %2114 = vmatprep.mubr.msk.f32.mxu1 %vm313_vm1, %v250_v29  ;;  %v216_v24 = vld [vmem:[%s2264_s26 + $0x150] sm:$0xff]  ;;  %v217_v26 = vld [vmem:[%s2264_s26 + $0x158] sm:$0xff]  ;;  %v218_v28 = vld [vmem:[%s2264_s26 + $0x160] sm:$0xff] }
  0x2b   : > { %v280_v25 = vld [vmem:[%s2264_s26 + $0x350] sm:$0xff]  ;;  %v281_v27 = vld [vmem:[%s2264_s26 + $0x358] sm:$0xff]  ;;  %v282_v29 = vld [vmem:[%s2264_s26 + $0x360] sm:$0xff] }
  0x2d   : > { %2019 = vmatmul.mubr.msk.f32.gmra.mxu0 %vm313_vm1, %v187_v30  ;;  %2115 = vmatmul.mubr.msk.f32.gmra.mxu1 %vm313_vm1, %v251_v31  ;;  %v219_v30 = vld [vmem:[%s2264_s26 + $0x168] sm:$0xff] }
  0x2e   : > { %2021 = vmatprep.mubr.msk.f32.mxu0 %vm313_vm1, %v188_v32  ;;  %2117 = vmatprep.mubr.msk.f32.mxu1 %vm313_vm1, %v252_v33  ;;  %v283_v31 = vld [vmem:[%s2264_s26 + $0x368] sm:$0xff]  ;;  %v220_v32 = vld [vmem:[%s2264_s26 + $0x170] sm:$0xff] }
  0x2f   : > { %v284_v33 = vld [vmem:[%s2264_s26 + $0x370] sm:$0xff] }
  0x31   : > { %2022 = vmatmul.mubr.msk.f32.gmra.mxu0 %vm313_vm1, %v189_v34  ;;  %2118 = vmatmul.mubr.msk.f32.gmra.mxu1 %vm313_vm1, %v253_v35  ;;  %v221_v34 = vld [vmem:[%s2264_s26 + $0x178] sm:$0xff] }
  0x32   : > { %2024 = vmatprep.mubr.msk.f32.mxu0 %vm313_vm1, %v190_v36  ;;  %2120 = vmatprep.mubr.msk.f32.mxu1 %vm313_vm1, %v254_v37  ;;  %v285_v35 = vld [vmem:[%s2264_s26 + $0x378] sm:$0xff]  ;;  %v222_v36 = vld [vmem:[%s2264_s26 + $0x180] sm:$0xff] }
  0x33   : > { %v286_v37 = vld [vmem:[%s2264_s26 + $0x380] sm:$0xff] }
  0x35   : > { %2025 = vmatmul.mubr.msk.f32.gmra.mxu0 %vm313_vm1, %v191_v38  ;;  %2121 = vmatmul.mubr.msk.f32.gmra.mxu1 %vm313_vm1, %v255_v39  ;;  %v223_v38 = vld [vmem:[%s2264_s26 + $0x188] sm:$0xff] }
  0x36   : > { %2027 = vmatprep.mubr.msk.f32.mxu0 %vm313_vm1, %v192_v40  ;;  %2123 = vmatprep.mubr.msk.f32.mxu1 %vm313_vm1, %v256_v41  ;;  %v287_v39 = vld [vmem:[%s2264_s26 + $0x388] sm:$0xff]  ;;  %v224_v40 = vld [vmem:[%s2264_s26 + $0x190] sm:$0xff] }
  0x37   : > { %v288_v41 = vld [vmem:[%s2264_s26 + $0x390] sm:$0xff] }
  0x39   : > { %2028 = vmatmul.mubr.msk.f32.gmra.mxu0 %vm313_vm1, %v193_v42  ;;  %2124 = vmatmul.mubr.msk.f32.gmra.mxu1 %vm313_vm1, %v257_v43  ;;  %v225_v42 = vld [vmem:[%s2264_s26 + $0x198] sm:$0xff] }
  0x3a   : > { %2030 = vmatprep.mubr.msk.f32.mxu0 %vm313_vm1, %v194_v44  ;;  %2126 = vmatprep.mubr.msk.f32.mxu1 %vm313_vm1, %v258_v45  ;;  %v289_v43 = vld [vmem:[%s2264_s26 + $0x398] sm:$0xff]  ;;  %v226_v44 = vld [vmem:[%s2264_s26 + $0x1a0] sm:$0xff] }
  0x3b   : > { %v290_v45 = vld [vmem:[%s2264_s26 + $0x3a0] sm:$0xff] }
  0x3d   : > { %2031 = vmatmul.mubr.msk.f32.gmra.mxu0 %vm313_vm1, %v195_v46  ;;  %2127 = vmatmul.mubr.msk.f32.gmra.mxu1 %vm313_vm1, %v259_v47  ;;  %v227_v46 = vld [vmem:[%s2264_s26 + $0x1a8] sm:$0xff] }
  0x3e   : > { %2033 = vmatprep.mubr.msk.f32.mxu0 %vm313_vm1, %v196_v48  ;;  %2129 = vmatprep.mubr.msk.f32.mxu1 %vm313_vm1, %v260_v49  ;;  %v291_v47 = vld [vmem:[%s2264_s26 + $0x3a8] sm:$0xff]  ;;  %v228_v48 = vld [vmem:[%s2264_s26 + $0x1b0] sm:$0xff] }
  0x3f   : > { %v292_v49 = vld [vmem:[%s2264_s26 + $0x3b0] sm:$0xff] }
  0x41   : > { %2034 = vmatmul.mubr.msk.f32.gmra.mxu0 %vm313_vm1, %v197_v50  ;;  %2130 = vmatmul.mubr.msk.f32.gmra.mxu1 %vm313_vm1, %v261_v51  ;;  %v229_v50 = vld [vmem:[%s2264_s26 + $0x1b8] sm:$0xff] }
  0x42   : > { %2036 = vmatprep.mubr.msk.f32.mxu0 %vm313_vm1, %v198_v52  ;;  %2132 = vmatprep.mubr.msk.f32.mxu1 %vm313_vm1, %v262_v53  ;;  %v293_v51 = vld [vmem:[%s2264_s26 + $0x3b8] sm:$0xff]  ;;  %v230_v52 = vld [vmem:[%s2264_s26 + $0x1c0] sm:$0xff] }
  0x43   : > { %v294_v53 = vld [vmem:[%s2264_s26 + $0x3c0] sm:$0xff] }
  0x45   : > { %2037 = vmatmul.mubr.msk.f32.gmra.mxu0 %vm313_vm1, %v199_v54  ;;  %2133 = vmatmul.mubr.msk.f32.gmra.mxu1 %vm313_vm1, %v263_v55  ;;  %v231_v54 = vld [vmem:[%s2264_s26 + $0x1c8] sm:$0xff] }
  0x46   : > { %2039 = vmatprep.mubr.msk.f32.mxu0 %vm313_vm1, %v200_v56  ;;  %2135 = vmatprep.mubr.msk.f32.mxu1 %vm313_vm1, %v264_v57  ;;  %v295_v55 = vld [vmem:[%s2264_s26 + $0x3c8] sm:$0xff]  ;;  %v232_v56 = vld [vmem:[%s2264_s26 + $0x1d0] sm:$0xff] }
  0x47   : > { %v296_v57 = vld [vmem:[%s2264_s26 + $0x3d0] sm:$0xff] }
  0x49   : > { %2040 = vmatmul.mubr.msk.f32.gmra.mxu0 %vm313_vm1, %v201_v58  ;;  %2136 = vmatmul.mubr.msk.f32.gmra.mxu1 %vm313_vm1, %v265_v59  ;;  %v233_v58 = vld [vmem:[%s2264_s26 + $0x1d8] sm:$0xff] }
  0x4a   : > { %2042 = vmatprep.mubr.msk.f32.mxu0 %vm313_vm1, %v202_v60  ;;  %2138 = vmatprep.mubr.msk.f32.mxu1 %vm313_vm1, %v266_v61  ;;  %v297_v59 = vld [vmem:[%s2264_s26 + $0x3d8] sm:$0xff]  ;;  %v234_v60 = vld [vmem:[%s2264_s26 + $0x1e0] sm:$0xff] }
  0x4b   : > { %v298_v61 = vld [vmem:[%s2264_s26 + $0x3e0] sm:$0xff] }
  0x4d   : > { %2043 = vmatmul.mubr.msk.f32.gmra.mxu0 %vm313_vm1, %v203_v62  ;;  %2139 = vmatmul.mubr.msk.f32.gmra.mxu1 %vm313_vm1, %v267_v63  ;;  %v235_v62 = vld [vmem:[%s2264_s26 + $0x1e8] sm:$0xff] }
  0x4e   : > { %2045 = vmatprep.mubr.msk.f32.mxu0 %vm313_vm1, %v204_v0  ;;  %2141 = vmatprep.mubr.msk.f32.mxu1 %vm313_vm1, %v268_v1  ;;  %v299_v63 = vld [vmem:[%s2264_s26 + $0x3e8] sm:$0xff]  ;;  %v236_v0 = vld [vmem:[%s2264_s26 + $0x1f0] sm:$0xff] }
  0x4f   : > { %v300_v1 = vld [vmem:[%s2264_s26 + $0x3f0] sm:$0xff] }
  0x51   : > { %2046 = vmatmul.mubr.msk.f32.gmra.mxu0 %vm313_vm1, %v205_v2  ;;  %2142 = vmatmul.mubr.msk.f32.gmra.mxu1 %vm313_vm1, %v269_v3  ;;  %v237_v2 = vld [vmem:[%s2264_s26 + $0x1f8] sm:$0xff] }
  0x52   : > { %2048 = vmatprep.mubr.msk.f32.mxu0 %vm313_vm1, %v206_v4  ;;  %2144 = vmatprep.mubr.msk.f32.mxu1 %vm313_vm1, %v270_v5  ;;  %v301_v3 = vld [vmem:[%s2264_s26 + $0x3f8] sm:$0xff]  ;;  %v2525_v4 = vld [vmem:[%s2795_s2] ss:$0 sm:$0xff] }
  0x55   : > { %2049 = vmatmul.mubr.msk.f32.gmra.mxu0 %vm313_vm1, %v207_v6  ;;  %2145 = vmatmul.mubr.msk.f32.gmra.mxu1 %vm313_vm1, %v271_v7 }
  0x56   : > { %2051 = vmatprep.mubr.msk.f32.mxu0 %vm313_vm1, %v208_v8  ;;  %2147 = vmatprep.mubr.msk.f32.mxu1 %vm313_vm1, %v272_v9 }
  0x59   : > { %2052 = vmatmul.mubr.msk.f32.gmra.mxu0 %vm313_vm1, %v209_v10  ;;  %2148 = vmatmul.mubr.msk.f32.gmra.mxu1 %vm313_vm1, %v273_v11 }
  0x5a   : > { %2054 = vmatprep.mubr.msk.f32.mxu0 %vm313_vm1, %v210_v12  ;;  %2150 = vmatprep.mubr.msk.f32.mxu1 %vm313_vm1, %v274_v13 }
  0x5d   : > { %2055 = vmatmul.mubr.msk.f32.gmra.mxu0 %vm313_vm1, %v211_v14  ;;  %2151 = vmatmul.mubr.msk.f32.gmra.mxu1 %vm313_vm1, %v275_v15 }
  0x5e   : > { %2057 = vmatprep.mubr.msk.f32.mxu0 %vm313_vm1, %v212_v16  ;;  %2153 = vmatprep.mubr.msk.f32.mxu1 %vm313_vm1, %v276_v17 }
  0x61   : > { %2058 = vmatmul.mubr.msk.f32.gmra.mxu0 %vm313_vm1, %v213_v18  ;;  %2154 = vmatmul.mubr.msk.f32.gmra.mxu1 %vm313_vm1, %v277_v19 }
  0x62   : > { %2060 = vmatprep.mubr.msk.f32.mxu0 %vm313_vm1, %v214_v20  ;;  %2156 = vmatprep.mubr.msk.f32.mxu1 %vm313_vm1, %v278_v21 }
  0x65   : > { %2061 = vmatmul.mubr.msk.f32.gmra.mxu0 %vm313_vm1, %v215_v22  ;;  %2157 = vmatmul.mubr.msk.f32.gmra.mxu1 %vm313_vm1, %v279_v23 }
  0x66   : > { %2063 = vmatprep.mubr.msk.f32.mxu0 %vm313_vm1, %v216_v24  ;;  %2159 = vmatprep.mubr.msk.f32.mxu1 %vm313_vm1, %v280_v25 }
  0x69   : > { %2064 = vmatmul.mubr.msk.f32.gmra.mxu0 %vm313_vm1, %v217_v26  ;;  %2160 = vmatmul.mubr.msk.f32.gmra.mxu1 %vm313_vm1, %v281_v27 }
  0x6a   : > { %2066 = vmatprep.mubr.msk.f32.mxu0 %vm313_vm1, %v218_v28  ;;  %2162 = vmatprep.mubr.msk.f32.mxu1 %vm313_vm1, %v282_v29 }
  0x6d   : > { %2067 = vmatmul.mubr.msk.f32.gmra.mxu0 %vm313_vm1, %v219_v30  ;;  %2163 = vmatmul.mubr.msk.f32.gmra.mxu1 %vm313_vm1, %v283_v31 }
  0x6e   : > { %2069 = vmatprep.mubr.msk.f32.mxu0 %vm313_vm1, %v220_v32  ;;  %2165 = vmatprep.mubr.msk.f32.mxu1 %vm313_vm1, %v284_v33 }
  0x71   : > { %2070 = vmatmul.mubr.msk.f32.gmra.mxu0 %vm313_vm1, %v221_v34  ;;  %2166 = vmatmul.mubr.msk.f32.gmra.mxu1 %vm313_vm1, %v285_v35 }
  0x72   : > { %2072 = vmatprep.mubr.msk.f32.mxu0 %vm313_vm1, %v222_v36  ;;  %2168 = vmatprep.mubr.msk.f32.mxu1 %vm313_vm1, %v286_v37 }
  0x75   : > { %2073 = vmatmul.mubr.msk.f32.gmra.mxu0 %vm313_vm1, %v223_v38  ;;  %2169 = vmatmul.mubr.msk.f32.gmra.mxu1 %vm313_vm1, %v287_v39 }
  0x76   : > { %2075 = vmatprep.mubr.msk.f32.mxu0 %vm313_vm1, %v224_v40  ;;  %2171 = vmatprep.mubr.msk.f32.mxu1 %vm313_vm1, %v288_v41 }
  0x79   : > { %2076 = vmatmul.mubr.msk.f32.gmra.mxu0 %vm313_vm1, %v225_v42  ;;  %2172 = vmatmul.mubr.msk.f32.gmra.mxu1 %vm313_vm1, %v289_v43 }
  0x7a   : > { %2078 = vmatprep.mubr.msk.f32.mxu0 %vm313_vm1, %v226_v44  ;;  %2174 = vmatprep.mubr.msk.f32.mxu1 %vm313_vm1, %v290_v45 }
  0x7d   : > { %2079 = vmatmul.mubr.msk.f32.gmra.mxu0 %vm313_vm1, %v227_v46  ;;  %2175 = vmatmul.mubr.msk.f32.gmra.mxu1 %vm313_vm1, %v291_v47 }
  0x7e   : > { %2081 = vmatprep.mubr.msk.f32.mxu0 %vm313_vm1, %v228_v48  ;;  %2177 = vmatprep.mubr.msk.f32.mxu1 %vm313_vm1, %v292_v49 }
  0x81   : > { %2082 = vmatmul.mubr.msk.f32.gmra.mxu0 %vm313_vm1, %v229_v50  ;;  %2178 = vmatmul.mubr.msk.f32.gmra.mxu1 %vm313_vm1, %v293_v51 }
  0x82   : > { %2084 = vmatprep.mubr.msk.f32.mxu0 %vm313_vm1, %v230_v52  ;;  %2180 = vmatprep.mubr.msk.f32.mxu1 %vm313_vm1, %v294_v53 }
  0x85   : > { %2085 = vmatmul.mubr.msk.f32.gmra.mxu0 %vm313_vm1, %v231_v54  ;;  %2181 = vmatmul.mubr.msk.f32.gmra.mxu1 %vm313_vm1, %v295_v55 }
  0x86   : > { %2087 = vmatprep.mubr.msk.f32.mxu0 %vm313_vm1, %v232_v56  ;;  %2183 = vmatprep.mubr.msk.f32.mxu1 %vm313_vm1, %v296_v57 }
  0x89   : > { %2088 = vmatmul.mubr.msk.f32.gmra.mxu0 %vm313_vm1, %v233_v58  ;;  %2184 = vmatmul.mubr.msk.f32.gmra.mxu1 %vm313_vm1, %v297_v59 }
  0x8a   : > { %2090 = vmatprep.mubr.msk.f32.mxu0 %vm313_vm1, %v234_v60  ;;  %2186 = vmatprep.mubr.msk.f32.mxu1 %vm313_vm1, %v298_v61 }
  0x8d   : > { %2091 = vmatmul.mubr.msk.f32.gmra.mxu0 %vm313_vm1, %v235_v62  ;;  %2187 = vmatmul.mubr.msk.f32.gmra.mxu1 %vm313_vm1, %v299_v63 }
  0x8e   : > { %2093 = vmatprep.mubr.msk.f32.mxu0 %vm313_vm1, %v236_v0  ;;  %2189 = vmatprep.mubr.msk.f32.mxu1 %vm313_vm1, %v300_v1 }
  0x91   : > { %2094 = vmatmul.mubr.msk.f32.gmra.mxu0 %vm313_vm1, %v237_v2  ;;  %2190 = vmatmul.mubr.msk.f32.gmra.mxu1 %vm313_vm1, %v301_v3 }
  0xd5   : > { %v2002_v5 = vpop.f32.mrf.mxu0  ;;  %v2098_v6 = vpop.f32.mrf.mxu1 }
  0xd6   : > { %v774_v7 = vadd.f32 %v2002_v5, %v2525_v4  ;;  %v1094_v8 = vadd.f32 %v2098_v6, %v2525_v4 }
  0xd7   : > { %v768_v9 = vpop.f32.mrf.mxu0  ;;  %v1088_v10 = vpop.f32.mrf.mxu1 }
  0xd8   : > { %v1408_v11 = vmax.f32 %v774_v7, 0.0  ;;  %v1472_v12 = vmax.f32 %v1094_v8, 0.0  ;;  %v769_v13 = vadd.f32 %v2525_v4, %v768_v9  ;;  %v1089_v14 = vadd.f32 %v2525_v4, %v1088_v10 }
  0xd9   : > { %v2005_v15 = vpop.f32.mrf.mxu0  ;;  %v2101_v16 = vpop.f32.mrf.mxu1 }
  0xda   : > { %1536 = vst [vmem:[%s2534_s4 + $0x8] sm:$0xff] %v1408_v11  ;;  %1600 = vst [vmem:[%s2534_s4 + $0x208] sm:$0xff] %v1472_v12  ;;  %v1407_v17 = vmax.f32 %v769_v13, 0.0  ;;  %v1471_v18 = vmax.f32 %v1089_v14, 0.0  ;;  %v784_v19 = vadd.f32 %v2005_v15, %v2525_v4  ;;  %v1104_v20 = vadd.f32 %v2101_v16, %v2525_v4 }
  0xdb   : > { %v778_v21 = vpop.f32.mrf.mxu0  ;;  %v1098_v22 = vpop.f32.mrf.mxu1 }
  0xdc   : > { %1535 = vst [vmem:[%s2534_s4] sm:$0xff] %v1407_v17  ;;  %1599 = vst [vmem:[%s2534_s4 + $0x200] sm:$0xff] %v1471_v18  ;;  %v1410_v23 = vmax.f32 %v784_v19, 0.0  ;;  %v1474_v24 = vmax.f32 %v1104_v20, 0.0  ;;  %v779_v25 = vadd.f32 %v2525_v4, %v778_v21  ;;  %v1099_v26 = vadd.f32 %v2525_v4, %v1098_v22 }
  0xdd   : > { %v2008_v27 = vpop.f32.mrf.mxu0  ;;  %v2104_v28 = vpop.f32.mrf.mxu1 }
  0xde   : > { %1538 = vst [vmem:[%s2534_s4 + $0x18] sm:$0xff] %v1410_v23  ;;  %1602 = vst [vmem:[%s2534_s4 + $0x218] sm:$0xff] %v1474_v24  ;;  %v1409_v29 = vmax.f32 %v779_v25, 0.0  ;;  %v1473_v30 = vmax.f32 %v1099_v26, 0.0  ;;  %v794_v31 = vadd.f32 %v2008_v27, %v2525_v4  ;;  %v1114_v32 = vadd.f32 %v2104_v28, %v2525_v4 }
  0xdf   : > { %v788_v33 = vpop.f32.mrf.mxu0  ;;  %v1108_v34 = vpop.f32.mrf.mxu1 }
  0xe0   : > { %1537 = vst [vmem:[%s2534_s4 + $0x10] sm:$0xff] %v1409_v29  ;;  %1601 = vst [vmem:[%s2534_s4 + $0x210] sm:$0xff] %v1473_v30  ;;  %v1412_v35 = vmax.f32 %v794_v31, 0.0  ;;  %v1476_v36 = vmax.f32 %v1114_v32, 0.0  ;;  %v789_v37 = vadd.f32 %v2525_v4, %v788_v33  ;;  %v1109_v38 = vadd.f32 %v2525_v4, %v1108_v34 }
  0xe1   : > { %v2011_v39 = vpop.f32.mrf.mxu0  ;;  %v2107_v40 = vpop.f32.mrf.mxu1 }
  0xe2   : > { %1540 = vst [vmem:[%s2534_s4 + $0x28] sm:$0xff] %v1412_v35  ;;  %1604 = vst [vmem:[%s2534_s4 + $0x228] sm:$0xff] %v1476_v36  ;;  %v1411_v41 = vmax.f32 %v789_v37, 0.0  ;;  %v1475_v42 = vmax.f32 %v1109_v38, 0.0  ;;  %v804_v43 = vadd.f32 %v2011_v39, %v2525_v4  ;;  %v1124_v44 = vadd.f32 %v2107_v40, %v2525_v4 }
  0xe3   : > { %v798_v45 = vpop.f32.mrf.mxu0  ;;  %v1118_v46 = vpop.f32.mrf.mxu1 }
  0xe4   : > { %1539 = vst [vmem:[%s2534_s4 + $0x20] sm:$0xff] %v1411_v41  ;;  %1603 = vst [vmem:[%s2534_s4 + $0x220] sm:$0xff] %v1475_v42  ;;  %v1414_v47 = vmax.f32 %v804_v43, 0.0  ;;  %v1478_v48 = vmax.f32 %v1124_v44, 0.0  ;;  %v799_v49 = vadd.f32 %v2525_v4, %v798_v45  ;;  %v1119_v50 = vadd.f32 %v2525_v4, %v1118_v46 }
  0xe5   : > { %v2014_v51 = vpop.f32.mrf.mxu0  ;;  %v2110_v52 = vpop.f32.mrf.mxu1 }
  0xe6   : > { %1542 = vst [vmem:[%s2534_s4 + $0x38] sm:$0xff] %v1414_v47  ;;  %1606 = vst [vmem:[%s2534_s4 + $0x238] sm:$0xff] %v1478_v48  ;;  %v1413_v53 = vmax.f32 %v799_v49, 0.0  ;;  %v1477_v54 = vmax.f32 %v1119_v50, 0.0  ;;  %v814_v55 = vadd.f32 %v2014_v51, %v2525_v4  ;;  %v1134_v56 = vadd.f32 %v2110_v52, %v2525_v4 }
  0xe7   : > { %v808_v57 = vpop.f32.mrf.mxu0  ;;  %v1128_v58 = vpop.f32.mrf.mxu1 }
  0xe8   : > { %1541 = vst [vmem:[%s2534_s4 + $0x30] sm:$0xff] %v1413_v53  ;;  %1605 = vst [vmem:[%s2534_s4 + $0x230] sm:$0xff] %v1477_v54  ;;  %v1416_v59 = vmax.f32 %v814_v55, 0.0  ;;  %v1480_v60 = vmax.f32 %v1134_v56, 0.0  ;;  %v809_v61 = vadd.f32 %v2525_v4, %v808_v57  ;;  %v1129_v62 = vadd.f32 %v2525_v4, %v1128_v58 }
  0xe9   : > { %v2017_v63 = vpop.f32.mrf.mxu0  ;;  %v2113_v0 = vpop.f32.mrf.mxu1 }
  0xea   : > { %1544 = vst [vmem:[%s2534_s4 + $0x48] sm:$0xff] %v1416_v59  ;;  %1608 = vst [vmem:[%s2534_s4 + $0x248] sm:$0xff] %v1480_v60  ;;  %v1415_v1 = vmax.f32 %v809_v61, 0.0  ;;  %v1479_v2 = vmax.f32 %v1129_v62, 0.0  ;;  %v824_v3 = vadd.f32 %v2017_v63, %v2525_v4  ;;  %v1144_v5 = vadd.f32 %v2113_v0, %v2525_v4 }
  0xeb   : > { %v818_v6 = vpop.f32.mrf.mxu0  ;;  %v1138_v7 = vpop.f32.mrf.mxu1 }
  0xec   : > { %1543 = vst [vmem:[%s2534_s4 + $0x40] sm:$0xff] %v1415_v1  ;;  %1607 = vst [vmem:[%s2534_s4 + $0x240] sm:$0xff] %v1479_v2  ;;  %v1418_v8 = vmax.f32 %v824_v3, 0.0  ;;  %v1482_v9 = vmax.f32 %v1144_v5, 0.0  ;;  %v819_v10 = vadd.f32 %v2525_v4, %v818_v6  ;;  %v1139_v11 = vadd.f32 %v2525_v4, %v1138_v7 }
  0xed   : > { %v2020_v12 = vpop.f32.mrf.mxu0  ;;  %v2116_v13 = vpop.f32.mrf.mxu1 }
  0xee   : > { %1546 = vst [vmem:[%s2534_s4 + $0x58] sm:$0xff] %v1418_v8  ;;  %1610 = vst [vmem:[%s2534_s4 + $0x258] sm:$0xff] %v1482_v9  ;;  %v1417_v14 = vmax.f32 %v819_v10, 0.0  ;;  %v1481_v15 = vmax.f32 %v1139_v11, 0.0  ;;  %v834_v16 = vadd.f32 %v2020_v12, %v2525_v4  ;;  %v1154_v17 = vadd.f32 %v2116_v13, %v2525_v4 }
  0xef   : > { %v828_v18 = vpop.f32.mrf.mxu0  ;;  %v1148_v19 = vpop.f32.mrf.mxu1 }
  0xf0   : > { %1545 = vst [vmem:[%s2534_s4 + $0x50] sm:$0xff] %v1417_v14  ;;  %1609 = vst [vmem:[%s2534_s4 + $0x250] sm:$0xff] %v1481_v15  ;;  %v1420_v20 = vmax.f32 %v834_v16, 0.0  ;;  %v1484_v21 = vmax.f32 %v1154_v17, 0.0  ;;  %v829_v22 = vadd.f32 %v2525_v4, %v828_v18  ;;  %v1149_v23 = vadd.f32 %v2525_v4, %v1148_v19 }
  0xf1   : > { %v2023_v24 = vpop.f32.mrf.mxu0  ;;  %v2119_v25 = vpop.f32.mrf.mxu1 }
  0xf2   : > { %1548 = vst [vmem:[%s2534_s4 + $0x68] sm:$0xff] %v1420_v20  ;;  %1612 = vst [vmem:[%s2534_s4 + $0x268] sm:$0xff] %v1484_v21  ;;  %v1419_v26 = vmax.f32 %v829_v22, 0.0  ;;  %v1483_v27 = vmax.f32 %v1149_v23, 0.0  ;;  %v844_v28 = vadd.f32 %v2023_v24, %v2525_v4  ;;  %v1164_v29 = vadd.f32 %v2119_v25, %v2525_v4 }
  0xf3   : > { %v838_v30 = vpop.f32.mrf.mxu0  ;;  %v1158_v31 = vpop.f32.mrf.mxu1 }
  0xf4   : > { %1547 = vst [vmem:[%s2534_s4 + $0x60] sm:$0xff] %v1419_v26  ;;  %1611 = vst [vmem:[%s2534_s4 + $0x260] sm:$0xff] %v1483_v27  ;;  %v1422_v32 = vmax.f32 %v844_v28, 0.0  ;;  %v1486_v33 = vmax.f32 %v1164_v29, 0.0  ;;  %v839_v34 = vadd.f32 %v2525_v4, %v838_v30  ;;  %v1159_v35 = vadd.f32 %v2525_v4, %v1158_v31 }
  0xf5   : > { %v2026_v36 = vpop.f32.mrf.mxu0  ;;  %v2122_v37 = vpop.f32.mrf.mxu1 }
  0xf6   : > { %1550 = vst [vmem:[%s2534_s4 + $0x78] sm:$0xff] %v1422_v32  ;;  %1614 = vst [vmem:[%s2534_s4 + $0x278] sm:$0xff] %v1486_v33  ;;  %v1421_v38 = vmax.f32 %v839_v34, 0.0  ;;  %v1485_v39 = vmax.f32 %v1159_v35, 0.0  ;;  %v854_v40 = vadd.f32 %v2026_v36, %v2525_v4  ;;  %v1174_v41 = vadd.f32 %v2122_v37, %v2525_v4 }
  0xf7   : > { %v848_v42 = vpop.f32.mrf.mxu0  ;;  %v1168_v43 = vpop.f32.mrf.mxu1 }
  0xf8   : > { %1549 = vst [vmem:[%s2534_s4 + $0x70] sm:$0xff] %v1421_v38  ;;  %1613 = vst [vmem:[%s2534_s4 + $0x270] sm:$0xff] %v1485_v39  ;;  %v1424_v44 = vmax.f32 %v854_v40, 0.0  ;;  %v1488_v45 = vmax.f32 %v1174_v41, 0.0  ;;  %v849_v46 = vadd.f32 %v2525_v4, %v848_v42  ;;  %v1169_v47 = vadd.f32 %v2525_v4, %v1168_v43 }
  0xf9   : > { %v2029_v48 = vpop.f32.mrf.mxu0  ;;  %v2125_v49 = vpop.f32.mrf.mxu1 }
  0xfa   : > { %1552 = vst [vmem:[%s2534_s4 + $0x88] sm:$0xff] %v1424_v44  ;;  %1616 = vst [vmem:[%s2534_s4 + $0x288] sm:$0xff] %v1488_v45  ;;  %v1423_v50 = vmax.f32 %v849_v46, 0.0  ;;  %v1487_v51 = vmax.f32 %v1169_v47, 0.0  ;;  %v864_v52 = vadd.f32 %v2029_v48, %v2525_v4  ;;  %v1184_v53 = vadd.f32 %v2125_v49, %v2525_v4 }
  0xfb   : > { %v858_v54 = vpop.f32.mrf.mxu0  ;;  %v1178_v55 = vpop.f32.mrf.mxu1 }
  0xfc   : > { %1551 = vst [vmem:[%s2534_s4 + $0x80] sm:$0xff] %v1423_v50  ;;  %1615 = vst [vmem:[%s2534_s4 + $0x280] sm:$0xff] %v1487_v51  ;;  %v1426_v56 = vmax.f32 %v864_v52, 0.0  ;;  %v1490_v57 = vmax.f32 %v1184_v53, 0.0  ;;  %v859_v58 = vadd.f32 %v2525_v4, %v858_v54  ;;  %v1179_v59 = vadd.f32 %v2525_v4, %v1178_v55 }
  0xfd   : > { %v2032_v60 = vpop.f32.mrf.mxu0  ;;  %v2128_v61 = vpop.f32.mrf.mxu1 }
  0xfe   : > { %1554 = vst [vmem:[%s2534_s4 + $0x98] sm:$0xff] %v1426_v56  ;;  %1618 = vst [vmem:[%s2534_s4 + $0x298] sm:$0xff] %v1490_v57  ;;  %v1425_v62 = vmax.f32 %v859_v58, 0.0  ;;  %v1489_v63 = vmax.f32 %v1179_v59, 0.0  ;;  %v874_v0 = vadd.f32 %v2032_v60, %v2525_v4  ;;  %v1194_v1 = vadd.f32 %v2128_v61, %v2525_v4 }
  0xff   : > { %v868_v2 = vpop.f32.mrf.mxu0  ;;  %v1188_v3 = vpop.f32.mrf.mxu1 }
 0x100   : > { %1553 = vst [vmem:[%s2534_s4 + $0x90] sm:$0xff] %v1425_v62  ;;  %1617 = vst [vmem:[%s2534_s4 + $0x290] sm:$0xff] %v1489_v63  ;;  %v1428_v5 = vmax.f32 %v874_v0, 0.0  ;;  %v1492_v6 = vmax.f32 %v1194_v1, 0.0  ;;  %v869_v7 = vadd.f32 %v2525_v4, %v868_v2  ;;  %v1189_v8 = vadd.f32 %v2525_v4, %v1188_v3 }
 0x101   : > { %v2035_v9 = vpop.f32.mrf.mxu0  ;;  %v2131_v10 = vpop.f32.mrf.mxu1 }
 0x102   : > { %1556 = vst [vmem:[%s2534_s4 + $0xa8] sm:$0xff] %v1428_v5  ;;  %1620 = vst [vmem:[%s2534_s4 + $0x2a8] sm:$0xff] %v1492_v6  ;;  %v1427_v11 = vmax.f32 %v869_v7, 0.0  ;;  %v1491_v12 = vmax.f32 %v1189_v8, 0.0  ;;  %v884_v13 = vadd.f32 %v2035_v9, %v2525_v4  ;;  %v1204_v14 = vadd.f32 %v2131_v10, %v2525_v4 }
 0x103   : > { %v878_v15 = vpop.f32.mrf.mxu0  ;;  %v1198_v16 = vpop.f32.mrf.mxu1 }
 0x104   : > { %1555 = vst [vmem:[%s2534_s4 + $0xa0] sm:$0xff] %v1427_v11  ;;  %1619 = vst [vmem:[%s2534_s4 + $0x2a0] sm:$0xff] %v1491_v12  ;;  %v1430_v17 = vmax.f32 %v884_v13, 0.0  ;;  %v1494_v18 = vmax.f32 %v1204_v14, 0.0  ;;  %v879_v19 = vadd.f32 %v2525_v4, %v878_v15  ;;  %v1199_v20 = vadd.f32 %v2525_v4, %v1198_v16 }
 0x105   : > { %v2038_v21 = vpop.f32.mrf.mxu0  ;;  %v2134_v22 = vpop.f32.mrf.mxu1 }
 0x106   : > { %1558 = vst [vmem:[%s2534_s4 + $0xb8] sm:$0xff] %v1430_v17  ;;  %1622 = vst [vmem:[%s2534_s4 + $0x2b8] sm:$0xff] %v1494_v18  ;;  %v1429_v23 = vmax.f32 %v879_v19, 0.0  ;;  %v1493_v24 = vmax.f32 %v1199_v20, 0.0  ;;  %v894_v25 = vadd.f32 %v2038_v21, %v2525_v4  ;;  %v1214_v26 = vadd.f32 %v2134_v22, %v2525_v4 }
 0x107   : > { %v888_v27 = vpop.f32.mrf.mxu0  ;;  %v1208_v28 = vpop.f32.mrf.mxu1 }
 0x108   : > { %1557 = vst [vmem:[%s2534_s4 + $0xb0] sm:$0xff] %v1429_v23  ;;  %1621 = vst [vmem:[%s2534_s4 + $0x2b0] sm:$0xff] %v1493_v24  ;;  %v1432_v29 = vmax.f32 %v894_v25, 0.0  ;;  %v1496_v30 = vmax.f32 %v1214_v26, 0.0  ;;  %v889_v31 = vadd.f32 %v2525_v4, %v888_v27  ;;  %v1209_v32 = vadd.f32 %v2525_v4, %v1208_v28 }
 0x109   : > { %v2041_v33 = vpop.f32.mrf.mxu0  ;;  %v2137_v34 = vpop.f32.mrf.mxu1 }
 0x10a   : > { %1560 = vst [vmem:[%s2534_s4 + $0xc8] sm:$0xff] %v1432_v29  ;;  %1624 = vst [vmem:[%s2534_s4 + $0x2c8] sm:$0xff] %v1496_v30  ;;  %v1431_v35 = vmax.f32 %v889_v31, 0.0  ;;  %v1495_v36 = vmax.f32 %v1209_v32, 0.0  ;;  %v904_v37 = vadd.f32 %v2041_v33, %v2525_v4  ;;  %v1224_v38 = vadd.f32 %v2137_v34, %v2525_v4 }
 0x10b   : > { %v898_v39 = vpop.f32.mrf.mxu0  ;;  %v1218_v40 = vpop.f32.mrf.mxu1 }
 0x10c   : > { %1559 = vst [vmem:[%s2534_s4 + $0xc0] sm:$0xff] %v1431_v35  ;;  %1623 = vst [vmem:[%s2534_s4 + $0x2c0] sm:$0xff] %v1495_v36  ;;  %v1434_v41 = vmax.f32 %v904_v37, 0.0  ;;  %v1498_v42 = vmax.f32 %v1224_v38, 0.0  ;;  %v899_v43 = vadd.f32 %v2525_v4, %v898_v39  ;;  %v1219_v44 = vadd.f32 %v2525_v4, %v1218_v40 }
 0x10d   : > { %v2044_v45 = vpop.f32.mrf.mxu0  ;;  %v2140_v46 = vpop.f32.mrf.mxu1 }
 0x10e   : > { %1562 = vst [vmem:[%s2534_s4 + $0xd8] sm:$0xff] %v1434_v41  ;;  %1626 = vst [vmem:[%s2534_s4 + $0x2d8] sm:$0xff] %v1498_v42  ;;  %v1433_v47 = vmax.f32 %v899_v43, 0.0  ;;  %v1497_v48 = vmax.f32 %v1219_v44, 0.0  ;;  %v914_v49 = vadd.f32 %v2044_v45, %v2525_v4  ;;  %v1234_v50 = vadd.f32 %v2140_v46, %v2525_v4 }
 0x10f   : > { %v908_v51 = vpop.f32.mrf.mxu0  ;;  %v1228_v52 = vpop.f32.mrf.mxu1 }
 0x110   : > { %1561 = vst [vmem:[%s2534_s4 + $0xd0] sm:$0xff] %v1433_v47  ;;  %1625 = vst [vmem:[%s2534_s4 + $0x2d0] sm:$0xff] %v1497_v48  ;;  %v1436_v53 = vmax.f32 %v914_v49, 0.0  ;;  %v1500_v54 = vmax.f32 %v1234_v50, 0.0  ;;  %v909_v55 = vadd.f32 %v2525_v4, %v908_v51  ;;  %v1229_v56 = vadd.f32 %v2525_v4, %v1228_v52 }
 0x111   : > { %v2047_v57 = vpop.f32.mrf.mxu0  ;;  %v2143_v58 = vpop.f32.mrf.mxu1 }
 0x112   : > { %1564 = vst [vmem:[%s2534_s4 + $0xe8] sm:$0xff] %v1436_v53  ;;  %1628 = vst [vmem:[%s2534_s4 + $0x2e8] sm:$0xff] %v1500_v54  ;;  %v1435_v59 = vmax.f32 %v909_v55, 0.0  ;;  %v1499_v60 = vmax.f32 %v1229_v56, 0.0  ;;  %v924_v61 = vadd.f32 %v2047_v57, %v2525_v4  ;;  %v1244_v62 = vadd.f32 %v2143_v58, %v2525_v4 }
 0x113   : > { %v918_v63 = vpop.f32.mrf.mxu0  ;;  %v1238_v0 = vpop.f32.mrf.mxu1 }
 0x114   : > { %1563 = vst [vmem:[%s2534_s4 + $0xe0] sm:$0xff] %v1435_v59  ;;  %1627 = vst [vmem:[%s2534_s4 + $0x2e0] sm:$0xff] %v1499_v60  ;;  %v1438_v1 = vmax.f32 %v924_v61, 0.0  ;;  %v1502_v2 = vmax.f32 %v1244_v62, 0.0  ;;  %v919_v3 = vadd.f32 %v2525_v4, %v918_v63  ;;  %v1239_v5 = vadd.f32 %v2525_v4, %v1238_v0 }
 0x115   : > { %v2050_v6 = vpop.f32.mrf.mxu0  ;;  %v2146_v7 = vpop.f32.mrf.mxu1 }
 0x116   : > { %1566 = vst [vmem:[%s2534_s4 + $0xf8] sm:$0xff] %v1438_v1  ;;  %1630 = vst [vmem:[%s2534_s4 + $0x2f8] sm:$0xff] %v1502_v2  ;;  %v1437_v8 = vmax.f32 %v919_v3, 0.0  ;;  %v1501_v9 = vmax.f32 %v1239_v5, 0.0  ;;  %v934_v10 = vadd.f32 %v2050_v6, %v2525_v4  ;;  %v1254_v11 = vadd.f32 %v2146_v7, %v2525_v4 }
 0x117   : > { %v928_v12 = vpop.f32.mrf.mxu0  ;;  %v1248_v13 = vpop.f32.mrf.mxu1 }
 0x118   : > { %1565 = vst [vmem:[%s2534_s4 + $0xf0] sm:$0xff] %v1437_v8  ;;  %1629 = vst [vmem:[%s2534_s4 + $0x2f0] sm:$0xff] %v1501_v9  ;;  %v1440_v14 = vmax.f32 %v934_v10, 0.0  ;;  %v1504_v15 = vmax.f32 %v1254_v11, 0.0  ;;  %v929_v16 = vadd.f32 %v2525_v4, %v928_v12  ;;  %v1249_v17 = vadd.f32 %v2525_v4, %v1248_v13 }
 0x119   : > { %v2053_v18 = vpop.f32.mrf.mxu0  ;;  %v2149_v19 = vpop.f32.mrf.mxu1 }
 0x11a   : > { %1568 = vst [vmem:[%s2534_s4 + $0x108] sm:$0xff] %v1440_v14  ;;  %1632 = vst [vmem:[%s2534_s4 + $0x308] sm:$0xff] %v1504_v15  ;;  %v1439_v20 = vmax.f32 %v929_v16, 0.0  ;;  %v1503_v21 = vmax.f32 %v1249_v17, 0.0  ;;  %v944_v22 = vadd.f32 %v2053_v18, %v2525_v4  ;;  %v1264_v23 = vadd.f32 %v2149_v19, %v2525_v4 }
 0x11b   : > { %v938_v24 = vpop.f32.mrf.mxu0  ;;  %v1258_v25 = vpop.f32.mrf.mxu1 }
 0x11c   : > { %1567 = vst [vmem:[%s2534_s4 + $0x100] sm:$0xff] %v1439_v20  ;;  %1631 = vst [vmem:[%s2534_s4 + $0x300] sm:$0xff] %v1503_v21  ;;  %v1442_v26 = vmax.f32 %v944_v22, 0.0  ;;  %v1506_v27 = vmax.f32 %v1264_v23, 0.0  ;;  %v939_v28 = vadd.f32 %v2525_v4, %v938_v24  ;;  %v1259_v29 = vadd.f32 %v2525_v4, %v1258_v25 }
 0x11d   : > { %v2056_v30 = vpop.f32.mrf.mxu0  ;;  %v2152_v31 = vpop.f32.mrf.mxu1 }
 0x11e   : > { %1570 = vst [vmem:[%s2534_s4 + $0x118] sm:$0xff] %v1442_v26  ;;  %1634 = vst [vmem:[%s2534_s4 + $0x318] sm:$0xff] %v1506_v27  ;;  %v1441_v32 = vmax.f32 %v939_v28, 0.0  ;;  %v1505_v33 = vmax.f32 %v1259_v29, 0.0  ;;  %v954_v34 = vadd.f32 %v2056_v30, %v2525_v4  ;;  %v1274_v35 = vadd.f32 %v2152_v31, %v2525_v4 }
 0x11f   : > { %v948_v36 = vpop.f32.mrf.mxu0  ;;  %v1268_v37 = vpop.f32.mrf.mxu1 }
 0x120   : > { %1569 = vst [vmem:[%s2534_s4 + $0x110] sm:$0xff] %v1441_v32  ;;  %1633 = vst [vmem:[%s2534_s4 + $0x310] sm:$0xff] %v1505_v33  ;;  %v1444_v38 = vmax.f32 %v954_v34, 0.0  ;;  %v1508_v39 = vmax.f32 %v1274_v35, 0.0  ;;  %v949_v40 = vadd.f32 %v2525_v4, %v948_v36  ;;  %v1269_v41 = vadd.f32 %v2525_v4, %v1268_v37 }
 0x121   : > { %v2059_v42 = vpop.f32.mrf.mxu0  ;;  %v2155_v43 = vpop.f32.mrf.mxu1 }
 0x122   : > { %1572 = vst [vmem:[%s2534_s4 + $0x128] sm:$0xff] %v1444_v38  ;;  %1636 = vst [vmem:[%s2534_s4 + $0x328] sm:$0xff] %v1508_v39  ;;  %v1443_v44 = vmax.f32 %v949_v40, 0.0  ;;  %v1507_v45 = vmax.f32 %v1269_v41, 0.0  ;;  %v964_v46 = vadd.f32 %v2059_v42, %v2525_v4  ;;  %v1284_v47 = vadd.f32 %v2155_v43, %v2525_v4 }
 0x123   : > { %v958_v48 = vpop.f32.mrf.mxu0  ;;  %v1278_v49 = vpop.f32.mrf.mxu1 }
 0x124   : > { %1571 = vst [vmem:[%s2534_s4 + $0x120] sm:$0xff] %v1443_v44  ;;  %1635 = vst [vmem:[%s2534_s4 + $0x320] sm:$0xff] %v1507_v45  ;;  %v1446_v50 = vmax.f32 %v964_v46, 0.0  ;;  %v1510_v51 = vmax.f32 %v1284_v47, 0.0  ;;  %v959_v52 = vadd.f32 %v2525_v4, %v958_v48  ;;  %v1279_v53 = vadd.f32 %v2525_v4, %v1278_v49 }
 0x125   : > { %v2062_v54 = vpop.f32.mrf.mxu0  ;;  %v2158_v55 = vpop.f32.mrf.mxu1 }
 0x126   : > { %1574 = vst [vmem:[%s2534_s4 + $0x138] sm:$0xff] %v1446_v50  ;;  %1638 = vst [vmem:[%s2534_s4 + $0x338] sm:$0xff] %v1510_v51  ;;  %v1445_v56 = vmax.f32 %v959_v52, 0.0  ;;  %v1509_v57 = vmax.f32 %v1279_v53, 0.0  ;;  %v974_v58 = vadd.f32 %v2062_v54, %v2525_v4  ;;  %v1294_v59 = vadd.f32 %v2158_v55, %v2525_v4 }
 0x127   : > { %v968_v60 = vpop.f32.mrf.mxu0  ;;  %v1288_v61 = vpop.f32.mrf.mxu1 }
 0x128   : > { %1573 = vst [vmem:[%s2534_s4 + $0x130] sm:$0xff] %v1445_v56  ;;  %1637 = vst [vmem:[%s2534_s4 + $0x330] sm:$0xff] %v1509_v57  ;;  %v1448_v62 = vmax.f32 %v974_v58, 0.0  ;;  %v1512_v63 = vmax.f32 %v1294_v59, 0.0  ;;  %v969_v0 = vadd.f32 %v2525_v4, %v968_v60  ;;  %v1289_v1 = vadd.f32 %v2525_v4, %v1288_v61 }
 0x129   : > { %v2065_v2 = vpop.f32.mrf.mxu0  ;;  %v2161_v3 = vpop.f32.mrf.mxu1 }
 0x12a   : > { %1576 = vst [vmem:[%s2534_s4 + $0x148] sm:$0xff] %v1448_v62  ;;  %1640 = vst [vmem:[%s2534_s4 + $0x348] sm:$0xff] %v1512_v63  ;;  %v1447_v5 = vmax.f32 %v969_v0, 0.0  ;;  %v1511_v6 = vmax.f32 %v1289_v1, 0.0  ;;  %v984_v7 = vadd.f32 %v2065_v2, %v2525_v4  ;;  %v1304_v8 = vadd.f32 %v2161_v3, %v2525_v4 }
 0x12b   : > { %v978_v9 = vpop.f32.mrf.mxu0  ;;  %v1298_v10 = vpop.f32.mrf.mxu1 }
 0x12c   : > { %1575 = vst [vmem:[%s2534_s4 + $0x140] sm:$0xff] %v1447_v5  ;;  %1639 = vst [vmem:[%s2534_s4 + $0x340] sm:$0xff] %v1511_v6  ;;  %v1450_v11 = vmax.f32 %v984_v7, 0.0  ;;  %v1514_v12 = vmax.f32 %v1304_v8, 0.0  ;;  %v979_v13 = vadd.f32 %v2525_v4, %v978_v9  ;;  %v1299_v14 = vadd.f32 %v2525_v4, %v1298_v10 }
 0x12d   : > { %v2068_v15 = vpop.f32.mrf.mxu0  ;;  %v2164_v16 = vpop.f32.mrf.mxu1 }
 0x12e   : > { %1578 = vst [vmem:[%s2534_s4 + $0x158] sm:$0xff] %v1450_v11  ;;  %1642 = vst [vmem:[%s2534_s4 + $0x358] sm:$0xff] %v1514_v12  ;;  %v1449_v17 = vmax.f32 %v979_v13, 0.0  ;;  %v1513_v18 = vmax.f32 %v1299_v14, 0.0  ;;  %v994_v19 = vadd.f32 %v2068_v15, %v2525_v4  ;;  %v1314_v20 = vadd.f32 %v2164_v16, %v2525_v4 }
 0x12f   : > { %v988_v21 = vpop.f32.mrf.mxu0  ;;  %v1308_v22 = vpop.f32.mrf.mxu1 }
 0x130   : > { %1577 = vst [vmem:[%s2534_s4 + $0x150] sm:$0xff] %v1449_v17  ;;  %1641 = vst [vmem:[%s2534_s4 + $0x350] sm:$0xff] %v1513_v18  ;;  %v1452_v23 = vmax.f32 %v994_v19, 0.0  ;;  %v1516_v24 = vmax.f32 %v1314_v20, 0.0  ;;  %v989_v25 = vadd.f32 %v2525_v4, %v988_v21  ;;  %v1309_v26 = vadd.f32 %v2525_v4, %v1308_v22 }
 0x131   : > { %v2071_v27 = vpop.f32.mrf.mxu0  ;;  %v2167_v28 = vpop.f32.mrf.mxu1 }
 0x132   : > { %1580 = vst [vmem:[%s2534_s4 + $0x168] sm:$0xff] %v1452_v23  ;;  %1644 = vst [vmem:[%s2534_s4 + $0x368] sm:$0xff] %v1516_v24  ;;  %v1451_v29 = vmax.f32 %v989_v25, 0.0  ;;  %v1515_v30 = vmax.f32 %v1309_v26, 0.0  ;;  %v1004_v31 = vadd.f32 %v2071_v27, %v2525_v4  ;;  %v1324_v32 = vadd.f32 %v2167_v28, %v2525_v4 }
 0x133   : > { %v998_v33 = vpop.f32.mrf.mxu0  ;;  %v1318_v34 = vpop.f32.mrf.mxu1 }
 0x134   : > { %1579 = vst [vmem:[%s2534_s4 + $0x160] sm:$0xff] %v1451_v29  ;;  %1643 = vst [vmem:[%s2534_s4 + $0x360] sm:$0xff] %v1515_v30  ;;  %v1454_v35 = vmax.f32 %v1004_v31, 0.0  ;;  %v1518_v36 = vmax.f32 %v1324_v32, 0.0  ;;  %v999_v37 = vadd.f32 %v2525_v4, %v998_v33  ;;  %v1319_v38 = vadd.f32 %v2525_v4, %v1318_v34 }
 0x135   : > { %v2074_v39 = vpop.f32.mrf.mxu0  ;;  %v2170_v40 = vpop.f32.mrf.mxu1 }
 0x136   : > { %1582 = vst [vmem:[%s2534_s4 + $0x178] sm:$0xff] %v1454_v35  ;;  %1646 = vst [vmem:[%s2534_s4 + $0x378] sm:$0xff] %v1518_v36  ;;  %v1453_v41 = vmax.f32 %v999_v37, 0.0  ;;  %v1517_v42 = vmax.f32 %v1319_v38, 0.0  ;;  %v1014_v43 = vadd.f32 %v2074_v39, %v2525_v4  ;;  %v1334_v44 = vadd.f32 %v2170_v40, %v2525_v4 }
 0x137   : > { %v1008_v45 = vpop.f32.mrf.mxu0  ;;  %v1328_v46 = vpop.f32.mrf.mxu1 }
 0x138   : > { %1581 = vst [vmem:[%s2534_s4 + $0x170] sm:$0xff] %v1453_v41  ;;  %1645 = vst [vmem:[%s2534_s4 + $0x370] sm:$0xff] %v1517_v42  ;;  %v1456_v47 = vmax.f32 %v1014_v43, 0.0  ;;  %v1520_v48 = vmax.f32 %v1334_v44, 0.0  ;;  %v1009_v49 = vadd.f32 %v2525_v4, %v1008_v45  ;;  %v1329_v50 = vadd.f32 %v2525_v4, %v1328_v46 }
 0x139   : > { %v2077_v51 = vpop.f32.mrf.mxu0  ;;  %v2173_v52 = vpop.f32.mrf.mxu1 }
 0x13a   : > { %1584 = vst [vmem:[%s2534_s4 + $0x188] sm:$0xff] %v1456_v47  ;;  %1648 = vst [vmem:[%s2534_s4 + $0x388] sm:$0xff] %v1520_v48  ;;  %v1455_v53 = vmax.f32 %v1009_v49, 0.0  ;;  %v1519_v54 = vmax.f32 %v1329_v50, 0.0  ;;  %v1024_v55 = vadd.f32 %v2077_v51, %v2525_v4  ;;  %v1344_v56 = vadd.f32 %v2173_v52, %v2525_v4 }
 0x13b   : > { %v1018_v57 = vpop.f32.mrf.mxu0  ;;  %v1338_v58 = vpop.f32.mrf.mxu1 }
 0x13c   : > { %1583 = vst [vmem:[%s2534_s4 + $0x180] sm:$0xff] %v1455_v53  ;;  %1647 = vst [vmem:[%s2534_s4 + $0x380] sm:$0xff] %v1519_v54  ;;  %v1458_v59 = vmax.f32 %v1024_v55, 0.0  ;;  %v1522_v60 = vmax.f32 %v1344_v56, 0.0  ;;  %v1019_v61 = vadd.f32 %v2525_v4, %v1018_v57  ;;  %v1339_v62 = vadd.f32 %v2525_v4, %v1338_v58 }
 0x13d   : > { %v2080_v63 = vpop.f32.mrf.mxu0  ;;  %v2176_v0 = vpop.f32.mrf.mxu1 }
 0x13e   : > { %1586 = vst [vmem:[%s2534_s4 + $0x198] sm:$0xff] %v1458_v59  ;;  %1650 = vst [vmem:[%s2534_s4 + $0x398] sm:$0xff] %v1522_v60  ;;  %v1457_v1 = vmax.f32 %v1019_v61, 0.0  ;;  %v1521_v2 = vmax.f32 %v1339_v62, 0.0  ;;  %v1034_v3 = vadd.f32 %v2080_v63, %v2525_v4  ;;  %v1354_v5 = vadd.f32 %v2176_v0, %v2525_v4 }
 0x13f   : > { %v1028_v6 = vpop.f32.mrf.mxu0  ;;  %v1348_v7 = vpop.f32.mrf.mxu1 }
 0x140   : > { %1585 = vst [vmem:[%s2534_s4 + $0x190] sm:$0xff] %v1457_v1  ;;  %1649 = vst [vmem:[%s2534_s4 + $0x390] sm:$0xff] %v1521_v2  ;;  %v1460_v8 = vmax.f32 %v1034_v3, 0.0  ;;  %v1524_v9 = vmax.f32 %v1354_v5, 0.0  ;;  %v1029_v10 = vadd.f32 %v2525_v4, %v1028_v6  ;;  %v1349_v11 = vadd.f32 %v2525_v4, %v1348_v7 }
 0x141   : > { %v2083_v12 = vpop.f32.mrf.mxu0  ;;  %v2179_v13 = vpop.f32.mrf.mxu1 }
 0x142   : > { %1588 = vst [vmem:[%s2534_s4 + $0x1a8] sm:$0xff] %v1460_v8  ;;  %1652 = vst [vmem:[%s2534_s4 + $0x3a8] sm:$0xff] %v1524_v9  ;;  %v1459_v14 = vmax.f32 %v1029_v10, 0.0  ;;  %v1523_v15 = vmax.f32 %v1349_v11, 0.0  ;;  %v1044_v16 = vadd.f32 %v2083_v12, %v2525_v4  ;;  %v1364_v17 = vadd.f32 %v2179_v13, %v2525_v4 }
 0x143   : > { %v1038_v18 = vpop.f32.mrf.mxu0  ;;  %v1358_v19 = vpop.f32.mrf.mxu1 }
 0x144   : > { %1587 = vst [vmem:[%s2534_s4 + $0x1a0] sm:$0xff] %v1459_v14  ;;  %1651 = vst [vmem:[%s2534_s4 + $0x3a0] sm:$0xff] %v1523_v15  ;;  %v1462_v20 = vmax.f32 %v1044_v16, 0.0  ;;  %v1526_v21 = vmax.f32 %v1364_v17, 0.0  ;;  %v1039_v22 = vadd.f32 %v2525_v4, %v1038_v18  ;;  %v1359_v23 = vadd.f32 %v2525_v4, %v1358_v19 }
 0x145   : > { %v2086_v24 = vpop.f32.mrf.mxu0  ;;  %v2182_v25 = vpop.f32.mrf.mxu1 }
 0x146   : > { %1590 = vst [vmem:[%s2534_s4 + $0x1b8] sm:$0xff] %v1462_v20  ;;  %1654 = vst [vmem:[%s2534_s4 + $0x3b8] sm:$0xff] %v1526_v21  ;;  %v1461_v26 = vmax.f32 %v1039_v22, 0.0  ;;  %v1525_v27 = vmax.f32 %v1359_v23, 0.0  ;;  %v1054_v28 = vadd.f32 %v2086_v24, %v2525_v4  ;;  %v1374_v29 = vadd.f32 %v2182_v25, %v2525_v4 }
 0x147   : > { %v1048_v30 = vpop.f32.mrf.mxu0  ;;  %v1368_v31 = vpop.f32.mrf.mxu1 }
 0x148   : > { %1589 = vst [vmem:[%s2534_s4 + $0x1b0] sm:$0xff] %v1461_v26  ;;  %1653 = vst [vmem:[%s2534_s4 + $0x3b0] sm:$0xff] %v1525_v27  ;;  %v1464_v32 = vmax.f32 %v1054_v28, 0.0  ;;  %v1528_v33 = vmax.f32 %v1374_v29, 0.0  ;;  %v1049_v34 = vadd.f32 %v2525_v4, %v1048_v30  ;;  %v1369_v35 = vadd.f32 %v2525_v4, %v1368_v31 }
 0x149   : > { %v2089_v36 = vpop.f32.mrf.mxu0  ;;  %v2185_v37 = vpop.f32.mrf.mxu1 }
 0x14a   : > { %1592 = vst [vmem:[%s2534_s4 + $0x1c8] sm:$0xff] %v1464_v32  ;;  %1656 = vst [vmem:[%s2534_s4 + $0x3c8] sm:$0xff] %v1528_v33  ;;  %v1463_v38 = vmax.f32 %v1049_v34, 0.0  ;;  %v1527_v39 = vmax.f32 %v1369_v35, 0.0  ;;  %v1064_v40 = vadd.f32 %v2089_v36, %v2525_v4  ;;  %v1384_v41 = vadd.f32 %v2185_v37, %v2525_v4 }
 0x14b   : > { %v1058_v42 = vpop.f32.mrf.mxu0  ;;  %v1378_v43 = vpop.f32.mrf.mxu1 }
 0x14c   : > { %1591 = vst [vmem:[%s2534_s4 + $0x1c0] sm:$0xff] %v1463_v38  ;;  %1655 = vst [vmem:[%s2534_s4 + $0x3c0] sm:$0xff] %v1527_v39  ;;  %v1466_v44 = vmax.f32 %v1064_v40, 0.0  ;;  %v1530_v45 = vmax.f32 %v1384_v41, 0.0  ;;  %v1059_v46 = vadd.f32 %v2525_v4, %v1058_v42  ;;  %v1379_v47 = vadd.f32 %v2525_v4, %v1378_v43 }
 0x14d   : > { %v2092_v48 = vpop.f32.mrf.mxu0  ;;  %v2188_v49 = vpop.f32.mrf.mxu1 }
 0x14e   : > { %1594 = vst [vmem:[%s2534_s4 + $0x1d8] sm:$0xff] %v1466_v44  ;;  %1658 = vst [vmem:[%s2534_s4 + $0x3d8] sm:$0xff] %v1530_v45  ;;  %v1465_v50 = vmax.f32 %v1059_v46, 0.0  ;;  %v1529_v51 = vmax.f32 %v1379_v47, 0.0  ;;  %v1074_v52 = vadd.f32 %v2092_v48, %v2525_v4  ;;  %v1394_v53 = vadd.f32 %v2188_v49, %v2525_v4 }
 0x14f   : > { %v1068_v54 = vpop.f32.mrf.mxu0  ;;  %v1388_v55 = vpop.f32.mrf.mxu1 }
 0x150   : > { %1593 = vst [vmem:[%s2534_s4 + $0x1d0] sm:$0xff] %v1465_v50  ;;  %1657 = vst [vmem:[%s2534_s4 + $0x3d0] sm:$0xff] %v1529_v51  ;;  %v1468_v56 = vmax.f32 %v1074_v52, 0.0  ;;  %v1532_v57 = vmax.f32 %v1394_v53, 0.0  ;;  %v1069_v58 = vadd.f32 %v2525_v4, %v1068_v54  ;;  %v1389_v59 = vadd.f32 %v2525_v4, %v1388_v55 }
 0x151   : > { %v2095_v60 = vpop.f32.mrf.mxu0  ;;  %v2191_v61 = vpop.f32.mrf.mxu1 }
 0x152   : > { %1596 = vst [vmem:[%s2534_s4 + $0x1e8] sm:$0xff] %v1468_v56  ;;  %1660 = vst [vmem:[%s2534_s4 + $0x3e8] sm:$0xff] %v1532_v57  ;;  %v1467_v62 = vmax.f32 %v1069_v58, 0.0  ;;  %v1531_v63 = vmax.f32 %v1389_v59, 0.0  ;;  %v1084_v0 = vadd.f32 %v2095_v60, %v2525_v4  ;;  %v1404_v1 = vadd.f32 %v2191_v61, %v2525_v4 }
 0x153   : > { %v1078_v2 = vpop.f32.mrf.mxu0  ;;  %v1398_v3 = vpop.f32.mrf.mxu1 }
 0x154   : > { %1595 = vst [vmem:[%s2534_s4 + $0x1e0] sm:$0xff] %v1467_v62  ;;  %1659 = vst [vmem:[%s2534_s4 + $0x3e0] sm:$0xff] %v1531_v63  ;;  %v1470_v5 = vmax.f32 %v1084_v0, 0.0  ;;  %v1534_v6 = vmax.f32 %v1404_v1, 0.0  ;;  %v1079_v7 = vadd.f32 %v2525_v4, %v1078_v2  ;;  %v1399_v8 = vadd.f32 %v2525_v4, %v1398_v3 }
 0x156   : > { %1598 = vst [vmem:[%s2534_s4 + $0x1f8] sm:$0xff] %v1470_v5  ;;  %1662 = vst [vmem:[%s2534_s4 + $0x3f8] sm:$0xff] %v1534_v6  ;;  %v1469_v9 = vmax.f32 %v1079_v7, 0.0  ;;  %v1533_v10 = vmax.f32 %v1399_v8, 0.0 }
 0x158   : > { %1597 = vst [vmem:[%s2534_s4 + $0x1f0] sm:$0xff] %v1469_v9  ;;  %1661 = vst [vmem:[%s2534_s4 + $0x3f0] sm:$0xff] %v1533_v10 }
 0x159 PF: > { %s13_s12 = sadd.s32 1, %s2214_s12  }
 0x15a   : > { %p10_p4 = scmp.ge.s32.totalorder %s13_s12, 6  }
 0x15c   :  { %12 = sbr.rel (!%p10_p4) target bundleno = 1 (0x1), region = 62 }

// kernel: forward.8
= control target key start
LH: loop header
LB: loop body
LE: loop exit
PB: predicated region body
PF: predicated region fallthrough
CT: control target
= control target key end

     0   :  { %s1459_s12 = smov 0   ;;  %s1743_s0 = inlined_call_operand.vmem [shape: bf16[1024,144], index: 0, kind: input, shape index: {}]   ;;  %s1744_s1 = inlined_call_operand.vmem [shape: bf16[144,128], index: 1, kind: input, shape index: {}]   ;;  %s1745_s2 = inlined_call_operand.vmem [shape: f32[1,128], index: 2, kind: input, shape index: {}]   ;;  %s1746_s3 = inlined_call_operand.vmem [shape: f32[1024,128], index: 3, kind: output, shape index: {}]  }
   0x1 LB: > { %s1179_s13 = sadd.s32 4294967295, %s1436_s12   ;;  %p1183_p0 = scmp.ge.s32.totalorder %s1436_s12, 1  ;;  %s1436_s12 = sphi %s1459_s12, %s13_s12  }
   0x2   : > { %p139_p1 = scmp.lt.s32.totalorder %s1436_s12, 3 }
   0x4   : > { %p140_p2 = pnand %p1183_p0, %p139_p1 }
   0x5   : > { %s1184_s16 = sshll.u32 (!%p140_p2), %s1179_s13, 6 }
   0x6   : > { %143 = sbr.rel (%p140_p2) target bundleno = 370 (0x172), region = 32  ;;  %p165_p3 = scmp.lt.s32.totalorder (!%p140_p2), %s1184_s16, 127 }
   0xb   : > { %v1325_v0 = vld [vmem:[%s1744_s1 + $0x38] sm:$0xff]   ;;  %v1438_v1 = vmov 0   ;;  %v1326_v2 = vld [vmem:[%s1744_s1 + $0x30] sm:$0xff]   ;;  %s1748_s16 = smov (!%p165_p3, %s1184_s16), 127  ;;  %v1327_v3 = vld [vmem:[%s1744_s1 + $0x28] sm:$0xff]   ;;  %vm609_vm0 = vcmask 130048  }
   0xc   : > { %706 = vmatprep.subr.bf16.mxu0 %v1438_v1  ;;  %1298 = vmatprep.subr.bf16.mxu1 %v1438_v1  ;;  %s1297_s21 = sshll.u32 %s1748_s16, 3  ;;  %v1328_v4 = vld [vmem:[%s1744_s1 + $0x20] sm:$0xff]   ;;  %v1329_v7 = vld [vmem:[%s1744_s1 + $0x18] sm:$0xff]   ;;  %v1330_v8 = vld [vmem:[%s1744_s1 + $0x10] sm:$0xff]  }
   0xd   : > { %707 = vmatpush1.bf16.msra.mxu0 %v1325_v0  ;;  %1307 = vmatpush1.bf16.msra.mxu1 %v1325_v0  ;;  %s1484_s24 = scalar_lea.vmem %s1743_s0, %s1297_s21  ;;  %v1331_v9 = vld [vmem:[%s1744_s1 + $0x8] sm:$0xff]   ;;  %v1332_v10 = vld [vmem:[%s1744_s1] sm:$0xff]   ;;  %s1612_s15 = scalar_lea.vmem %s1746_s3, %s1297_s21 }
   0xe   : > { %708 = vmatprep.subr.bf16.mxu0 %v1438_v1  ;;  %1299 = vmatprep.subr.bf16.mxu1 %v1438_v1  ;;  %v1336_v5 = vld [vmem:[%s1484_s24 + $0x4] ss:$8 sps:$4 sm:$0xff]   ;;  %v1334_v12 = vld [vmem:[%s1484_s24] ss:$8 sps:$4 sm:$0xff]   ;;  %v1340_v14 = vld [vmem:[%s1484_s24 + $0x14] ss:$8 sps:$4 sm:$0xff]  }
   0xf   : > { %v1339_v6 = vld [vmem:[%s1484_s24 + $0x104] ss:$8 sps:$4 sm:$0xff]   ;;  %1263 = vmatprep.mubr.msk.bf16.mxu0 %vm609_vm0, %v1336_v5  ;;  %v1337_v13 = vld [vmem:[%s1484_s24 + $0x100] ss:$8 sps:$4 sm:$0xff]   ;;  %v1342_v15 = vld [vmem:[%s1484_s24 + $0x114] ss:$8 sps:$4 sm:$0xff]  }
  0x10   : > { %1279 = vmatprep.mubr.msk.bf16.mxu1 %vm609_vm0, %v1339_v6  ;;  %v1333_v11 = vld [vmem:[%s1744_s1 + $0x40] sm:$0xff]   ;;  %v1344_v16 = vld [vmem:[%s1484_s24 + $0x10] ss:$8 sps:$4 sm:$0xff]   ;;  %v1352_v22 = vld [vmem:[%s1484_s24 + $0x34] ss:$8 sps:$4 sm:$0xff]  }
  0x11   : > { %709 = vmatpush1.bf16.msra.mxu0 %v1326_v2  ;;  %1308 = vmatpush1.bf16.msra.mxu1 %v1326_v2  ;;  %v1345_v17 = vld [vmem:[%s1484_s24 + $0x110] ss:$8 sps:$4 sm:$0xff]   ;;  %v1346_v18 = vld [vmem:[%s1484_s24 + $0x24] ss:$8 sps:$4 sm:$0xff]   ;;  %v1350_v20 = vld [vmem:[%s1484_s24 + $0x20] ss:$8 sps:$4 sm:$0xff]  }
  0x12   : > { %710 = vmatprep.subr.bf16.mxu0 %v1438_v1  ;;  %1300 = vmatprep.subr.bf16.mxu1 %v1438_v1  ;;  %v1348_v19 = vld [vmem:[%s1484_s24 + $0x124] ss:$8 sps:$4 sm:$0xff]   ;;  %v1351_v21 = vld [vmem:[%s1484_s24 + $0x120] ss:$8 sps:$4 sm:$0xff]   ;;  %v1354_v23 = vld [vmem:[%s1484_s24 + $0x134] ss:$8 sps:$4 sm:$0xff]  }
  0x13   : > { %v1356_v24 = vld [vmem:[%s1484_s24 + $0x30] ss:$8 sps:$4 sm:$0xff]   ;;  %v1358_v26 = vld [vmem:[%s1484_s24 + $0x44] ss:$8 sps:$4 sm:$0xff]   ;;  %v1362_v28 = vld [vmem:[%s1484_s24 + $0x40] ss:$8 sps:$4 sm:$0xff]  }
  0x14   : > { %v1357_v25 = vld [vmem:[%s1484_s24 + $0x130] ss:$8 sps:$4 sm:$0xff]   ;;  %v1360_v27 = vld [vmem:[%s1484_s24 + $0x144] ss:$8 sps:$4 sm:$0xff]   ;;  %v1363_v29 = vld [vmem:[%s1484_s24 + $0x140] ss:$8 sps:$4 sm:$0xff]  }
  0x15   : > { %711 = vmatpush1.bf16.msra.mxu0 %v1327_v3  ;;  %1309 = vmatpush1.bf16.msra.mxu1 %v1327_v3  ;;  %v1364_v30 = vld [vmem:[%s1484_s24 + $0x54] ss:$8 sps:$4 sm:$0xff]   ;;  %v1368_v32 = vld [vmem:[%s1484_s24 + $0x50] ss:$8 sps:$4 sm:$0xff]   ;;  %v1370_v34 = vld [vmem:[%s1484_s24 + $0x64] ss:$8 sps:$4 sm:$0xff]  }
  0x16   : > { %712 = vmatprep.subr.bf16.mxu0 %v1438_v1  ;;  %1301 = vmatprep.subr.bf16.mxu1 %v1438_v1  ;;  %v1366_v31 = vld [vmem:[%s1484_s24 + $0x154] ss:$8 sps:$4 sm:$0xff]   ;;  %v1369_v33 = vld [vmem:[%s1484_s24 + $0x150] ss:$8 sps:$4 sm:$0xff]   ;;  %v1372_v35 = vld [vmem:[%s1484_s24 + $0x164] ss:$8 sps:$4 sm:$0xff]  }
  0x17   : > { %v1374_v36 = vld [vmem:[%s1484_s24 + $0x60] ss:$8 sps:$4 sm:$0xff]   ;;  %v1376_v38 = vld [vmem:[%s1484_s24 + $0x74] ss:$8 sps:$4 sm:$0xff]   ;;  %v1380_v40 = vld [vmem:[%s1484_s24 + $0x70] ss:$8 sps:$4 sm:$0xff]  }
  0x18   : > { %v1375_v37 = vld [vmem:[%s1484_s24 + $0x160] ss:$8 sps:$4 sm:$0xff]   ;;  %v1378_v39 = vld [vmem:[%s1484_s24 + $0x174] ss:$8 sps:$4 sm:$0xff]   ;;  %v1381_v41 = vld [vmem:[%s1484_s24 + $0x170] ss:$8 sps:$4 sm:$0xff]  }
  0x19   : > { %713 = vmatpush1.bf16.msra.mxu0 %v1328_v4  ;;  %1310 = vmatpush1.bf16.msra.mxu1 %v1328_v4  ;;  %v1382_v42 = vld [vmem:[%s1484_s24 + $0x84] ss:$8 sps:$4 sm:$0xff]   ;;  %v1386_v44 = vld [vmem:[%s1484_s24 + $0x80] ss:$8 sps:$4 sm:$0xff]   ;;  %v1388_v46 = vld [vmem:[%s1484_s24 + $0x94] ss:$8 sps:$4 sm:$0xff]  }
  0x1a   : > { %714 = vmatprep.subr.bf16.mxu0 %v1438_v1  ;;  %1302 = vmatprep.subr.bf16.mxu1 %v1438_v1  ;;  %v1384_v43 = vld [vmem:[%s1484_s24 + $0x184] ss:$8 sps:$4 sm:$0xff]   ;;  %v1387_v45 = vld [vmem:[%s1484_s24 + $0x180] ss:$8 sps:$4 sm:$0xff]   ;;  %v1390_v47 = vld [vmem:[%s1484_s24 + $0x194] ss:$8 sps:$4 sm:$0xff]  }
  0x1b   : > { %v1392_v48 = vld [vmem:[%s1484_s24 + $0x90] ss:$8 sps:$4 sm:$0xff]   ;;  %v1394_v50 = vld [vmem:[%s1484_s24 + $0xa4] ss:$8 sps:$4 sm:$0xff]   ;;  %v1398_v52 = vld [vmem:[%s1484_s24 + $0xa0] ss:$8 sps:$4 sm:$0xff]  }
  0x1c   : > { %v1393_v49 = vld [vmem:[%s1484_s24 + $0x190] ss:$8 sps:$4 sm:$0xff]   ;;  %v1396_v51 = vld [vmem:[%s1484_s24 + $0x1a4] ss:$8 sps:$4 sm:$0xff]   ;;  %v1399_v53 = vld [vmem:[%s1484_s24 + $0x1a0] ss:$8 sps:$4 sm:$0xff]  }
  0x1d   : > { %715 = vmatpush1.bf16.msra.mxu0 %v1329_v7  ;;  %1311 = vmatpush1.bf16.msra.mxu1 %v1329_v7  ;;  %v1400_v54 = vld [vmem:[%s1484_s24 + $0xb4] ss:$8 sps:$4 sm:$0xff]   ;;  %v1404_v56 = vld [vmem:[%s1484_s24 + $0xb0] ss:$8 sps:$4 sm:$0xff]   ;;  %v1406_v58 = vld [vmem:[%s1484_s24 + $0xc4] ss:$8 sps:$4 sm:$0xff]  }
  0x1e   : > { %716 = vmatprep.subr.bf16.mxu0 %v1438_v1  ;;  %1303 = vmatprep.subr.bf16.mxu1 %v1438_v1  ;;  %v1402_v55 = vld [vmem:[%s1484_s24 + $0x1b4] ss:$8 sps:$4 sm:$0xff]   ;;  %v1405_v57 = vld [vmem:[%s1484_s24 + $0x1b0] ss:$8 sps:$4 sm:$0xff]   ;;  %v1408_v59 = vld [vmem:[%s1484_s24 + $0x1c4] ss:$8 sps:$4 sm:$0xff]  }
  0x1f   : > { %v1410_v60 = vld [vmem:[%s1484_s24 + $0xc0] ss:$8 sps:$4 sm:$0xff]   ;;  %v1412_v62 = vld [vmem:[%s1484_s24 + $0xd4] ss:$8 sps:$4 sm:$0xff]   ;;  %v1416_v0 = vld [vmem:[%s1484_s24 + $0xd0] ss:$8 sps:$4 sm:$0xff]  }
  0x20   : > { %v1411_v61 = vld [vmem:[%s1484_s24 + $0x1c0] ss:$8 sps:$4 sm:$0xff]   ;;  %v1414_v63 = vld [vmem:[%s1484_s24 + $0x1d4] ss:$8 sps:$4 sm:$0xff]   ;;  %v1418_v2 = vld [vmem:[%s1484_s24 + $0xe4] ss:$8 sps:$4 sm:$0xff]  }
  0x21   : > { %717 = vmatpush1.bf16.msra.mxu0 %v1330_v8  ;;  %1312 = vmatpush1.bf16.msra.mxu1 %v1330_v8  ;;  %v1420_v3 = vld [vmem:[%s1484_s24 + $0x1e4] ss:$8 sps:$4 sm:$0xff]   ;;  %v1422_v4 = vld [vmem:[%s1484_s24 + $0xe0] ss:$8 sps:$4 sm:$0xff]   ;;  %v1424_v6 = vld [vmem:[%s1484_s24 + $0xf4] ss:$8 sps:$4 sm:$0xff]  }
  0x22   : > { %718 = vmatprep.subr.bf16.mxu0 %v1438_v1  ;;  %1304 = vmatprep.subr.bf16.mxu1 %v1438_v1  ;;  %v1423_v5 = vld [vmem:[%s1484_s24 + $0x1e0] ss:$8 sps:$4 sm:$0xff]   ;;  %v1426_v7 = vld [vmem:[%s1484_s24 + $0x1f4] ss:$8 sps:$4 sm:$0xff]   ;;  %v1428_v8 = vld [vmem:[%s1484_s24 + $0xf0] ss:$8 sps:$4 sm:$0xff]  }
  0x25   : > { %719 = vmatpush1.bf16.msra.mxu0 %v1331_v9  ;;  %1313 = vmatpush1.bf16.msra.mxu1 %v1331_v9  ;;  %v1429_v9 = vld [vmem:[%s1484_s24 + $0x1f0] ss:$8 sps:$4 sm:$0xff]  }
  0x26   : > { %720 = vmatprep.subr.bf16.mxu0 %v1438_v1  ;;  %1305 = vmatprep.subr.bf16.mxu1 %v1438_v1 }
  0x29   : > { %721 = vmatpush1.bf16.msra.mxu0 %v1332_v10  ;;  %1314 = vmatpush1.bf16.msra.mxu1 %v1332_v10  ;;  %v1603_v10 = vld [vmem:[%s1745_s2] ss:$0 sm:$0xff] }
  0x2a   : > { %736 = vmatprep.subr.bf16.mxu0 %v1438_v1  ;;  %1306 = vmatprep.subr.bf16.mxu1 %v1438_v1  ;;  %v1417_v1 = vld [vmem:[%s1484_s24 + $0x1d0] ss:$8 sps:$4 sm:$0xff]  }
  0x2d   : > { %737 = vmatpush2.bf16.msra.mxu0 %v1333_v11  ;;  %1315 = vmatpush2.bf16.msra.mxu1 %v1333_v11 }
  0x30   : > { %739 = vmatmul.mubr.bf16.vlgmr.msra.gmra.mxu0 %v1334_v12  ;;  %867 = vmatmul.mubr.bf16.vlgmr.msra.gmra.mxu1 %v1337_v13 }
  0x31   : > { %1264 = vmatprep.mubr.msk.bf16.mxu0 %vm609_vm0, %v1340_v14  ;;  %1280 = vmatprep.mubr.msk.bf16.mxu1 %vm609_vm0, %v1342_v15 }
  0x38   : > { %747 = vmatmul.mubr.bf16.gmra.mxu0 %v1344_v16  ;;  %875 = vmatmul.mubr.bf16.gmra.mxu1 %v1345_v17 }
  0x39   : > { %1265 = vmatprep.mubr.msk.bf16.mxu0 %vm609_vm0, %v1346_v18  ;;  %1281 = vmatprep.mubr.msk.bf16.mxu1 %vm609_vm0, %v1348_v19 }
  0x40   : > { %755 = vmatmul.mubr.bf16.gmra.mxu0 %v1350_v20  ;;  %883 = vmatmul.mubr.bf16.gmra.mxu1 %v1351_v21 }
  0x41   : > { %1266 = vmatprep.mubr.msk.bf16.mxu0 %vm609_vm0, %v1352_v22  ;;  %1282 = vmatprep.mubr.msk.bf16.mxu1 %vm609_vm0, %v1354_v23 }
  0x48   : > { %763 = vmatmul.mubr.bf16.gmra.mxu0 %v1356_v24  ;;  %891 = vmatmul.mubr.bf16.gmra.mxu1 %v1357_v25 }
  0x49   : > { %1267 = vmatprep.mubr.msk.bf16.mxu0 %vm609_vm0, %v1358_v26  ;;  %1283 = vmatprep.mubr.msk.bf16.mxu1 %vm609_vm0, %v1360_v27 }
  0x50   : > { %771 = vmatmul.mubr.bf16.gmra.mxu0 %v1362_v28  ;;  %899 = vmatmul.mubr.bf16.gmra.mxu1 %v1363_v29 }
  0x51   : > { %1268 = vmatprep.mubr.msk.bf16.mxu0 %vm609_vm0, %v1364_v30  ;;  %1284 = vmatprep.mubr.msk.bf16.mxu1 %vm609_vm0, %v1366_v31 }
  0x58   : > { %779 = vmatmul.mubr.bf16.gmra.mxu0 %v1368_v32  ;;  %907 = vmatmul.mubr.bf16.gmra.mxu1 %v1369_v33 }
  0x59   : > { %1269 = vmatprep.mubr.msk.bf16.mxu0 %vm609_vm0, %v1370_v34  ;;  %1285 = vmatprep.mubr.msk.bf16.mxu1 %vm609_vm0, %v1372_v35 }
  0x60   : > { %787 = vmatmul.mubr.bf16.gmra.mxu0 %v1374_v36  ;;  %915 = vmatmul.mubr.bf16.gmra.mxu1 %v1375_v37 }
  0x61   : > { %1270 = vmatprep.mubr.msk.bf16.mxu0 %vm609_vm0, %v1376_v38  ;;  %1286 = vmatprep.mubr.msk.bf16.mxu1 %vm609_vm0, %v1378_v39 }
  0x68   : > { %795 = vmatmul.mubr.bf16.gmra.mxu0 %v1380_v40  ;;  %923 = vmatmul.mubr.bf16.gmra.mxu1 %v1381_v41 }
  0x69   : > { %1271 = vmatprep.mubr.msk.bf16.mxu0 %vm609_vm0, %v1382_v42  ;;  %1287 = vmatprep.mubr.msk.bf16.mxu1 %vm609_vm0, %v1384_v43 }
  0x70   : > { %803 = vmatmul.mubr.bf16.gmra.mxu0 %v1386_v44  ;;  %931 = vmatmul.mubr.bf16.gmra.mxu1 %v1387_v45 }
  0x71   : > { %1272 = vmatprep.mubr.msk.bf16.mxu0 %vm609_vm0, %v1388_v46  ;;  %1288 = vmatprep.mubr.msk.bf16.mxu1 %vm609_vm0, %v1390_v47 }
  0x78   : > { %811 = vmatmul.mubr.bf16.gmra.mxu0 %v1392_v48  ;;  %939 = vmatmul.mubr.bf16.gmra.mxu1 %v1393_v49 }
  0x79   : > { %1273 = vmatprep.mubr.msk.bf16.mxu0 %vm609_vm0, %v1394_v50  ;;  %1289 = vmatprep.mubr.msk.bf16.mxu1 %vm609_vm0, %v1396_v51 }
  0x80   : > { %819 = vmatmul.mubr.bf16.gmra.mxu0 %v1398_v52  ;;  %947 = vmatmul.mubr.bf16.gmra.mxu1 %v1399_v53 }
  0x81   : > { %1274 = vmatprep.mubr.msk.bf16.mxu0 %vm609_vm0, %v1400_v54  ;;  %1290 = vmatprep.mubr.msk.bf16.mxu1 %vm609_vm0, %v1402_v55 }
  0x88   : > { %827 = vmatmul.mubr.bf16.gmra.mxu0 %v1404_v56  ;;  %955 = vmatmul.mubr.bf16.gmra.mxu1 %v1405_v57 }
  0x89   : > { %1275 = vmatprep.mubr.msk.bf16.mxu0 %vm609_vm0, %v1406_v58  ;;  %1291 = vmatprep.mubr.msk.bf16.mxu1 %vm609_vm0, %v1408_v59 }
  0x90   : > { %835 = vmatmul.mubr.bf16.gmra.mxu0 %v1410_v60  ;;  %963 = vmatmul.mubr.bf16.gmra.mxu1 %v1411_v61 }
  0x91   : > { %1276 = vmatprep.mubr.msk.bf16.mxu0 %vm609_vm0, %v1412_v62  ;;  %1292 = vmatprep.mubr.msk.bf16.mxu1 %vm609_vm0, %v1414_v63 }
  0x98   : > { %843 = vmatmul.mubr.bf16.gmra.mxu0 %v1416_v0  ;;  %971 = vmatmul.mubr.bf16.gmra.mxu1 %v1417_v1 }
  0x99   : > { %1277 = vmatprep.mubr.msk.bf16.mxu0 %vm609_vm0, %v1418_v2  ;;  %1293 = vmatprep.mubr.msk.bf16.mxu1 %vm609_vm0, %v1420_v3 }
  0xa0   : > { %851 = vmatmul.mubr.bf16.gmra.mxu0 %v1422_v4  ;;  %979 = vmatmul.mubr.bf16.gmra.mxu1 %v1423_v5 }
  0xa1   : > { %1278 = vmatprep.mubr.msk.bf16.mxu0 %vm609_vm0, %v1424_v6  ;;  %1294 = vmatprep.mubr.msk.bf16.mxu1 %vm609_vm0, %v1426_v7 }
  0xa8   : > { %859 = vmatmul.mubr.bf16.gmra.mxu0 %v1428_v8  ;;  %987 = vmatmul.mubr.bf16.gmra.mxu1 %v1429_v9 }
  0xf0   : > { %v740_v11 = vpop.f32.mrf.mxu0  ;;  %v868_v12 = vpop.f32.mrf.mxu1 }
  0xf1   : > { %v741_v13 = vadd.f32 %v1603_v10, %v740_v11  ;;  %v869_v14 = vadd.f32 %v1603_v10, %v868_v12 }
  0xf2   : > { %v742_v15 = vpop.f32.mrf.mxu0  ;;  %v870_v16 = vpop.f32.mrf.mxu1 }
  0xf3   : > { %v995_v17 = vmax.f32 %v741_v13, 0.0  ;;  %v1027_v18 = vmax.f32 %v869_v14, 0.0 }
  0xf4   : > { %v743_v19 = vpop.f32.mrf.mxu0  ;;  %v871_v20 = vpop.f32.mrf.mxu1 }
  0xf5   : > { %1059 = vst [vmem:[%s1612_s15] sm:$0xff] %v995_v17  ;;  %1091 = vst [vmem:[%s1612_s15 + $0x100] sm:$0xff] %v1027_v18  ;;  %v744_v21 = vadd.f32 %v1603_v10, %v743_v19  ;;  %v872_v22 = vadd.f32 %v1603_v10, %v871_v20 }
  0xf6   : > { %v745_v23 = vpop.f32.mrf.mxu0  ;;  %v873_v24 = vpop.f32.mrf.mxu1 }
  0xf7   : > { %v996_v25 = vmax.f32 %v744_v21, 0.0  ;;  %v1028_v26 = vmax.f32 %v872_v22, 0.0 }
  0xf8   : > { %v748_v27 = vpop.f32.mrf.mxu0  ;;  %v876_v28 = vpop.f32.mrf.mxu1 }
  0xf9   : > { %1060 = vst [vmem:[%s1612_s15 + $0x8] sm:$0xff] %v996_v25  ;;  %1092 = vst [vmem:[%s1612_s15 + $0x108] sm:$0xff] %v1028_v26  ;;  %v749_v29 = vadd.f32 %v1603_v10, %v748_v27  ;;  %v877_v30 = vadd.f32 %v1603_v10, %v876_v28 }
  0xfa   : > { %v750_v31 = vpop.f32.mrf.mxu0  ;;  %v878_v32 = vpop.f32.mrf.mxu1 }
  0xfb   : > { %v997_v33 = vmax.f32 %v749_v29, 0.0  ;;  %v1029_v34 = vmax.f32 %v877_v30, 0.0 }
  0xfc   : > { %v751_v35 = vpop.f32.mrf.mxu0  ;;  %v879_v36 = vpop.f32.mrf.mxu1 }
  0xfd   : > { %1061 = vst [vmem:[%s1612_s15 + $0x10] sm:$0xff] %v997_v33  ;;  %1093 = vst [vmem:[%s1612_s15 + $0x110] sm:$0xff] %v1029_v34  ;;  %v752_v37 = vadd.f32 %v1603_v10, %v751_v35  ;;  %v880_v38 = vadd.f32 %v1603_v10, %v879_v36 }
  0xfe   : > { %v753_v39 = vpop.f32.mrf.mxu0  ;;  %v881_v40 = vpop.f32.mrf.mxu1 }
  0xff   : > { %v998_v41 = vmax.f32 %v752_v37, 0.0  ;;  %v1030_v42 = vmax.f32 %v880_v38, 0.0 }
 0x100   : > { %v756_v43 = vpop.f32.mrf.mxu0  ;;  %v884_v44 = vpop.f32.mrf.mxu1 }
 0x101   : > { %1062 = vst [vmem:[%s1612_s15 + $0x18] sm:$0xff] %v998_v41  ;;  %1094 = vst [vmem:[%s1612_s15 + $0x118] sm:$0xff] %v1030_v42  ;;  %v757_v45 = vadd.f32 %v1603_v10, %v756_v43  ;;  %v885_v46 = vadd.f32 %v1603_v10, %v884_v44 }
 0x102   : > { %v758_v47 = vpop.f32.mrf.mxu0  ;;  %v886_v48 = vpop.f32.mrf.mxu1 }
 0x103   : > { %v999_v49 = vmax.f32 %v757_v45, 0.0  ;;  %v1031_v50 = vmax.f32 %v885_v46, 0.0 }
 0x104   : > { %v759_v51 = vpop.f32.mrf.mxu0  ;;  %v887_v52 = vpop.f32.mrf.mxu1 }
 0x105   : > { %1063 = vst [vmem:[%s1612_s15 + $0x20] sm:$0xff] %v999_v49  ;;  %1095 = vst [vmem:[%s1612_s15 + $0x120] sm:$0xff] %v1031_v50  ;;  %v760_v53 = vadd.f32 %v1603_v10, %v759_v51  ;;  %v888_v54 = vadd.f32 %v1603_v10, %v887_v52 }
 0x106   : > { %v761_v55 = vpop.f32.mrf.mxu0  ;;  %v889_v56 = vpop.f32.mrf.mxu1 }
 0x107   : > { %v1000_v57 = vmax.f32 %v760_v53, 0.0  ;;  %v1032_v58 = vmax.f32 %v888_v54, 0.0 }
 0x108   : > { %v764_v59 = vpop.f32.mrf.mxu0  ;;  %v892_v60 = vpop.f32.mrf.mxu1 }
 0x109   : > { %1064 = vst [vmem:[%s1612_s15 + $0x28] sm:$0xff] %v1000_v57  ;;  %1096 = vst [vmem:[%s1612_s15 + $0x128] sm:$0xff] %v1032_v58  ;;  %v765_v61 = vadd.f32 %v1603_v10, %v764_v59  ;;  %v893_v62 = vadd.f32 %v1603_v10, %v892_v60 }
 0x10a   : > { %v766_v63 = vpop.f32.mrf.mxu0  ;;  %v894_v0 = vpop.f32.mrf.mxu1 }
 0x10b   : > { %v1001_v1 = vmax.f32 %v765_v61, 0.0  ;;  %v1033_v2 = vmax.f32 %v893_v62, 0.0 }
 0x10c   : > { %v767_v3 = vpop.f32.mrf.mxu0  ;;  %v895_v4 = vpop.f32.mrf.mxu1 }
 0x10d   : > { %1065 = vst [vmem:[%s1612_s15 + $0x30] sm:$0xff] %v1001_v1  ;;  %1097 = vst [vmem:[%s1612_s15 + $0x130] sm:$0xff] %v1033_v2  ;;  %v768_v5 = vadd.f32 %v1603_v10, %v767_v3  ;;  %v896_v6 = vadd.f32 %v1603_v10, %v895_v4 }
 0x10e   : > { %v769_v7 = vpop.f32.mrf.mxu0  ;;  %v897_v8 = vpop.f32.mrf.mxu1 }
 0x10f   : > { %v1002_v9 = vmax.f32 %v768_v5, 0.0  ;;  %v1034_v11 = vmax.f32 %v896_v6, 0.0 }
 0x110   : > { %v772_v12 = vpop.f32.mrf.mxu0  ;;  %v900_v13 = vpop.f32.mrf.mxu1 }
 0x111   : > { %1066 = vst [vmem:[%s1612_s15 + $0x38] sm:$0xff] %v1002_v9  ;;  %1098 = vst [vmem:[%s1612_s15 + $0x138] sm:$0xff] %v1034_v11  ;;  %v773_v14 = vadd.f32 %v1603_v10, %v772_v12  ;;  %v901_v15 = vadd.f32 %v1603_v10, %v900_v13 }
 0x112   : > { %v774_v16 = vpop.f32.mrf.mxu0  ;;  %v902_v17 = vpop.f32.mrf.mxu1 }
 0x113   : > { %v1003_v18 = vmax.f32 %v773_v14, 0.0  ;;  %v1035_v19 = vmax.f32 %v901_v15, 0.0 }
 0x114   : > { %v775_v20 = vpop.f32.mrf.mxu0  ;;  %v903_v21 = vpop.f32.mrf.mxu1 }
 0x115   : > { %1067 = vst [vmem:[%s1612_s15 + $0x40] sm:$0xff] %v1003_v18  ;;  %1099 = vst [vmem:[%s1612_s15 + $0x140] sm:$0xff] %v1035_v19  ;;  %v776_v22 = vadd.f32 %v1603_v10, %v775_v20  ;;  %v904_v23 = vadd.f32 %v1603_v10, %v903_v21 }
 0x116   : > { %v777_v24 = vpop.f32.mrf.mxu0  ;;  %v905_v25 = vpop.f32.mrf.mxu1 }
 0x117   : > { %v1004_v26 = vmax.f32 %v776_v22, 0.0  ;;  %v1036_v27 = vmax.f32 %v904_v23, 0.0 }
 0x118   : > { %v780_v28 = vpop.f32.mrf.mxu0  ;;  %v908_v29 = vpop.f32.mrf.mxu1 }
 0x119   : > { %1068 = vst [vmem:[%s1612_s15 + $0x48] sm:$0xff] %v1004_v26  ;;  %1100 = vst [vmem:[%s1612_s15 + $0x148] sm:$0xff] %v1036_v27  ;;  %v781_v30 = vadd.f32 %v1603_v10, %v780_v28  ;;  %v909_v31 = vadd.f32 %v1603_v10, %v908_v29 }
 0x11a   : > { %v782_v32 = vpop.f32.mrf.mxu0  ;;  %v910_v33 = vpop.f32.mrf.mxu1 }
 0x11b   : > { %v1005_v34 = vmax.f32 %v781_v30, 0.0  ;;  %v1037_v35 = vmax.f32 %v909_v31, 0.0 }
 0x11c   : > { %v783_v36 = vpop.f32.mrf.mxu0  ;;  %v911_v37 = vpop.f32.mrf.mxu1 }
 0x11d   : > { %1069 = vst [vmem:[%s1612_s15 + $0x50] sm:$0xff] %v1005_v34  ;;  %1101 = vst [vmem:[%s1612_s15 + $0x150] sm:$0xff] %v1037_v35  ;;  %v784_v38 = vadd.f32 %v1603_v10, %v783_v36  ;;  %v912_v39 = vadd.f32 %v1603_v10, %v911_v37 }
 0x11e   : > { %v785_v40 = vpop.f32.mrf.mxu0  ;;  %v913_v41 = vpop.f32.mrf.mxu1 }
 0x11f   : > { %v1006_v42 = vmax.f32 %v784_v38, 0.0  ;;  %v1038_v43 = vmax.f32 %v912_v39, 0.0 }
 0x120   : > { %v788_v44 = vpop.f32.mrf.mxu0  ;;  %v916_v45 = vpop.f32.mrf.mxu1 }
 0x121   : > { %1070 = vst [vmem:[%s1612_s15 + $0x58] sm:$0xff] %v1006_v42  ;;  %1102 = vst [vmem:[%s1612_s15 + $0x158] sm:$0xff] %v1038_v43  ;;  %v789_v46 = vadd.f32 %v1603_v10, %v788_v44  ;;  %v917_v47 = vadd.f32 %v1603_v10, %v916_v45 }
 0x122   : > { %v790_v48 = vpop.f32.mrf.mxu0  ;;  %v918_v49 = vpop.f32.mrf.mxu1 }
 0x123   : > { %v1007_v50 = vmax.f32 %v789_v46, 0.0  ;;  %v1039_v51 = vmax.f32 %v917_v47, 0.0 }
 0x124   : > { %v791_v52 = vpop.f32.mrf.mxu0  ;;  %v919_v53 = vpop.f32.mrf.mxu1 }
 0x125   : > { %1071 = vst [vmem:[%s1612_s15 + $0x60] sm:$0xff] %v1007_v50  ;;  %1103 = vst [vmem:[%s1612_s15 + $0x160] sm:$0xff] %v1039_v51  ;;  %v792_v54 = vadd.f32 %v1603_v10, %v791_v52  ;;  %v920_v55 = vadd.f32 %v1603_v10, %v919_v53 }
 0x126   : > { %v793_v56 = vpop.f32.mrf.mxu0  ;;  %v921_v57 = vpop.f32.mrf.mxu1 }
 0x127   : > { %v1008_v58 = vmax.f32 %v792_v54, 0.0  ;;  %v1040_v59 = vmax.f32 %v920_v55, 0.0 }
 0x128   : > { %v796_v60 = vpop.f32.mrf.mxu0  ;;  %v924_v61 = vpop.f32.mrf.mxu1 }
 0x129   : > { %1072 = vst [vmem:[%s1612_s15 + $0x68] sm:$0xff] %v1008_v58  ;;  %1104 = vst [vmem:[%s1612_s15 + $0x168] sm:$0xff] %v1040_v59  ;;  %v797_v62 = vadd.f32 %v1603_v10, %v796_v60  ;;  %v925_v63 = vadd.f32 %v1603_v10, %v924_v61 }
 0x12a   : > { %v798_v0 = vpop.f32.mrf.mxu0  ;;  %v926_v1 = vpop.f32.mrf.mxu1 }
 0x12b   : > { %v1009_v2 = vmax.f32 %v797_v62, 0.0  ;;  %v1041_v3 = vmax.f32 %v925_v63, 0.0 }
 0x12c   : > { %v799_v4 = vpop.f32.mrf.mxu0  ;;  %v927_v5 = vpop.f32.mrf.mxu1 }
 0x12d   : > { %1073 = vst [vmem:[%s1612_s15 + $0x70] sm:$0xff] %v1009_v2  ;;  %1105 = vst [vmem:[%s1612_s15 + $0x170] sm:$0xff] %v1041_v3  ;;  %v800_v6 = vadd.f32 %v1603_v10, %v799_v4  ;;  %v928_v7 = vadd.f32 %v1603_v10, %v927_v5 }
 0x12e   : > { %v801_v8 = vpop.f32.mrf.mxu0  ;;  %v929_v9 = vpop.f32.mrf.mxu1 }
 0x12f   : > { %v1010_v11 = vmax.f32 %v800_v6, 0.0  ;;  %v1042_v12 = vmax.f32 %v928_v7, 0.0 }
 0x130   : > { %v804_v13 = vpop.f32.mrf.mxu0  ;;  %v932_v14 = vpop.f32.mrf.mxu1 }
 0x131   : > { %1074 = vst [vmem:[%s1612_s15 + $0x78] sm:$0xff] %v1010_v11  ;;  %1106 = vst [vmem:[%s1612_s15 + $0x178] sm:$0xff] %v1042_v12  ;;  %v805_v15 = vadd.f32 %v1603_v10, %v804_v13  ;;  %v933_v16 = vadd.f32 %v1603_v10, %v932_v14 }
 0x132   : > { %v806_v17 = vpop.f32.mrf.mxu0  ;;  %v934_v18 = vpop.f32.mrf.mxu1 }
 0x133   : > { %v1011_v19 = vmax.f32 %v805_v15, 0.0  ;;  %v1043_v20 = vmax.f32 %v933_v16, 0.0 }
 0x134   : > { %v807_v21 = vpop.f32.mrf.mxu0  ;;  %v935_v22 = vpop.f32.mrf.mxu1 }
 0x135   : > { %1075 = vst [vmem:[%s1612_s15 + $0x80] sm:$0xff] %v1011_v19  ;;  %1107 = vst [vmem:[%s1612_s15 + $0x180] sm:$0xff] %v1043_v20  ;;  %v808_v23 = vadd.f32 %v1603_v10, %v807_v21  ;;  %v936_v24 = vadd.f32 %v1603_v10, %v935_v22 }
 0x136   : > { %v809_v25 = vpop.f32.mrf.mxu0  ;;  %v937_v26 = vpop.f32.mrf.mxu1 }
 0x137   : > { %v1012_v27 = vmax.f32 %v808_v23, 0.0  ;;  %v1044_v28 = vmax.f32 %v936_v24, 0.0 }
 0x138   : > { %v812_v29 = vpop.f32.mrf.mxu0  ;;  %v940_v30 = vpop.f32.mrf.mxu1 }
 0x139   : > { %1076 = vst [vmem:[%s1612_s15 + $0x88] sm:$0xff] %v1012_v27  ;;  %1108 = vst [vmem:[%s1612_s15 + $0x188] sm:$0xff] %v1044_v28  ;;  %v813_v31 = vadd.f32 %v1603_v10, %v812_v29  ;;  %v941_v32 = vadd.f32 %v1603_v10, %v940_v30 }
 0x13a   : > { %v814_v33 = vpop.f32.mrf.mxu0  ;;  %v942_v34 = vpop.f32.mrf.mxu1 }
 0x13b   : > { %v1013_v35 = vmax.f32 %v813_v31, 0.0  ;;  %v1045_v36 = vmax.f32 %v941_v32, 0.0 }
 0x13c   : > { %v815_v37 = vpop.f32.mrf.mxu0  ;;  %v943_v38 = vpop.f32.mrf.mxu1 }
 0x13d   : > { %1077 = vst [vmem:[%s1612_s15 + $0x90] sm:$0xff] %v1013_v35  ;;  %1109 = vst [vmem:[%s1612_s15 + $0x190] sm:$0xff] %v1045_v36  ;;  %v816_v39 = vadd.f32 %v1603_v10, %v815_v37  ;;  %v944_v40 = vadd.f32 %v1603_v10, %v943_v38 }
 0x13e   : > { %v817_v41 = vpop.f32.mrf.mxu0  ;;  %v945_v42 = vpop.f32.mrf.mxu1 }
 0x13f   : > { %v1014_v43 = vmax.f32 %v816_v39, 0.0  ;;  %v1046_v44 = vmax.f32 %v944_v40, 0.0 }
 0x140   : > { %v820_v45 = vpop.f32.mrf.mxu0  ;;  %v948_v46 = vpop.f32.mrf.mxu1 }
 0x141   : > { %1078 = vst [vmem:[%s1612_s15 + $0x98] sm:$0xff] %v1014_v43  ;;  %1110 = vst [vmem:[%s1612_s15 + $0x198] sm:$0xff] %v1046_v44  ;;  %v821_v47 = vadd.f32 %v1603_v10, %v820_v45  ;;  %v949_v48 = vadd.f32 %v1603_v10, %v948_v46 }
 0x142   : > { %v822_v49 = vpop.f32.mrf.mxu0  ;;  %v950_v50 = vpop.f32.mrf.mxu1 }
 0x143   : > { %v1015_v51 = vmax.f32 %v821_v47, 0.0  ;;  %v1047_v52 = vmax.f32 %v949_v48, 0.0 }
 0x144   : > { %v823_v53 = vpop.f32.mrf.mxu0  ;;  %v951_v54 = vpop.f32.mrf.mxu1 }
 0x145   : > { %1079 = vst [vmem:[%s1612_s15 + $0xa0] sm:$0xff] %v1015_v51  ;;  %1111 = vst [vmem:[%s1612_s15 + $0x1a0] sm:$0xff] %v1047_v52  ;;  %v824_v55 = vadd.f32 %v1603_v10, %v823_v53  ;;  %v952_v56 = vadd.f32 %v1603_v10, %v951_v54 }
 0x146   : > { %v825_v57 = vpop.f32.mrf.mxu0  ;;  %v953_v58 = vpop.f32.mrf.mxu1 }
 0x147   : > { %v1016_v59 = vmax.f32 %v824_v55, 0.0  ;;  %v1048_v60 = vmax.f32 %v952_v56, 0.0 }
 0x148   : > { %v828_v61 = vpop.f32.mrf.mxu0  ;;  %v956_v62 = vpop.f32.mrf.mxu1 }
 0x149   : > { %1080 = vst [vmem:[%s1612_s15 + $0xa8] sm:$0xff] %v1016_v59  ;;  %1112 = vst [vmem:[%s1612_s15 + $0x1a8] sm:$0xff] %v1048_v60  ;;  %v829_v63 = vadd.f32 %v1603_v10, %v828_v61  ;;  %v957_v0 = vadd.f32 %v1603_v10, %v956_v62 }
 0x14a   : > { %v830_v1 = vpop.f32.mrf.mxu0  ;;  %v958_v2 = vpop.f32.mrf.mxu1 }
 0x14b   : > { %v1017_v3 = vmax.f32 %v829_v63, 0.0  ;;  %v1049_v4 = vmax.f32 %v957_v0, 0.0 }
 0x14c   : > { %v831_v5 = vpop.f32.mrf.mxu0  ;;  %v959_v6 = vpop.f32.mrf.mxu1 }
 0x14d   : > { %1081 = vst [vmem:[%s1612_s15 + $0xb0] sm:$0xff] %v1017_v3  ;;  %1113 = vst [vmem:[%s1612_s15 + $0x1b0] sm:$0xff] %v1049_v4  ;;  %v832_v7 = vadd.f32 %v1603_v10, %v831_v5  ;;  %v960_v8 = vadd.f32 %v1603_v10, %v959_v6 }
 0x14e   : > { %v833_v9 = vpop.f32.mrf.mxu0  ;;  %v961_v11 = vpop.f32.mrf.mxu1 }
 0x14f   : > { %v1018_v12 = vmax.f32 %v832_v7, 0.0  ;;  %v1050_v13 = vmax.f32 %v960_v8, 0.0 }
 0x150   : > { %v836_v14 = vpop.f32.mrf.mxu0  ;;  %v964_v15 = vpop.f32.mrf.mxu1 }
 0x151   : > { %1082 = vst [vmem:[%s1612_s15 + $0xb8] sm:$0xff] %v1018_v12  ;;  %1114 = vst [vmem:[%s1612_s15 + $0x1b8] sm:$0xff] %v1050_v13  ;;  %v837_v16 = vadd.f32 %v1603_v10, %v836_v14  ;;  %v965_v17 = vadd.f32 %v1603_v10, %v964_v15 }
 0x152   : > { %v838_v18 = vpop.f32.mrf.mxu0  ;;  %v966_v19 = vpop.f32.mrf.mxu1 }
 0x153   : > { %v1019_v20 = vmax.f32 %v837_v16, 0.0  ;;  %v1051_v21 = vmax.f32 %v965_v17, 0.0 }
 0x154   : > { %v839_v22 = vpop.f32.mrf.mxu0  ;;  %v967_v23 = vpop.f32.mrf.mxu1 }
 0x155   : > { %1083 = vst [vmem:[%s1612_s15 + $0xc0] sm:$0xff] %v1019_v20  ;;  %1115 = vst [vmem:[%s1612_s15 + $0x1c0] sm:$0xff] %v1051_v21  ;;  %v840_v24 = vadd.f32 %v1603_v10, %v839_v22  ;;  %v968_v25 = vadd.f32 %v1603_v10, %v967_v23 }
 0x156   : > { %v841_v26 = vpop.f32.mrf.mxu0  ;;  %v969_v27 = vpop.f32.mrf.mxu1 }
 0x157   : > { %v1020_v28 = vmax.f32 %v840_v24, 0.0  ;;  %v1052_v29 = vmax.f32 %v968_v25, 0.0 }
 0x158   : > { %v844_v30 = vpop.f32.mrf.mxu0  ;;  %v972_v31 = vpop.f32.mrf.mxu1 }
 0x159   : > { %1084 = vst [vmem:[%s1612_s15 + $0xc8] sm:$0xff] %v1020_v28  ;;  %1116 = vst [vmem:[%s1612_s15 + $0x1c8] sm:$0xff] %v1052_v29  ;;  %v845_v32 = vadd.f32 %v1603_v10, %v844_v30  ;;  %v973_v33 = vadd.f32 %v1603_v10, %v972_v31 }
 0x15a   : > { %v846_v34 = vpop.f32.mrf.mxu0  ;;  %v974_v35 = vpop.f32.mrf.mxu1 }
 0x15b   : > { %v1021_v36 = vmax.f32 %v845_v32, 0.0  ;;  %v1053_v37 = vmax.f32 %v973_v33, 0.0 }
 0x15c   : > { %v847_v38 = vpop.f32.mrf.mxu0  ;;  %v975_v39 = vpop.f32.mrf.mxu1 }
 0x15d   : > { %1085 = vst [vmem:[%s1612_s15 + $0xd0] sm:$0xff] %v1021_v36  ;;  %1117 = vst [vmem:[%s1612_s15 + $0x1d0] sm:$0xff] %v1053_v37  ;;  %v848_v40 = vadd.f32 %v1603_v10, %v847_v38  ;;  %v976_v41 = vadd.f32 %v1603_v10, %v975_v39 }
 0x15e   : > { %v849_v42 = vpop.f32.mrf.mxu0  ;;  %v977_v43 = vpop.f32.mrf.mxu1 }
 0x15f   : > { %v1022_v44 = vmax.f32 %v848_v40, 0.0  ;;  %v1054_v45 = vmax.f32 %v976_v41, 0.0 }
 0x160   : > { %v852_v46 = vpop.f32.mrf.mxu0  ;;  %v980_v47 = vpop.f32.mrf.mxu1 }
 0x161   : > { %1086 = vst [vmem:[%s1612_s15 + $0xd8] sm:$0xff] %v1022_v44  ;;  %1118 = vst [vmem:[%s1612_s15 + $0x1d8] sm:$0xff] %v1054_v45  ;;  %v853_v48 = vadd.f32 %v1603_v10, %v852_v46  ;;  %v981_v49 = vadd.f32 %v1603_v10, %v980_v47 }
 0x162   : > { %v854_v50 = vpop.f32.mrf.mxu0  ;;  %v982_v51 = vpop.f32.mrf.mxu1 }
 0x163   : > { %v1023_v52 = vmax.f32 %v853_v48, 0.0  ;;  %v1055_v53 = vmax.f32 %v981_v49, 0.0 }
 0x164   : > { %v855_v54 = vpop.f32.mrf.mxu0  ;;  %v983_v55 = vpop.f32.mrf.mxu1 }
 0x165   : > { %1087 = vst [vmem:[%s1612_s15 + $0xe0] sm:$0xff] %v1023_v52  ;;  %1119 = vst [vmem:[%s1612_s15 + $0x1e0] sm:$0xff] %v1055_v53  ;;  %v856_v56 = vadd.f32 %v1603_v10, %v855_v54  ;;  %v984_v57 = vadd.f32 %v1603_v10, %v983_v55 }
 0x166   : > { %v857_v58 = vpop.f32.mrf.mxu0  ;;  %v985_v59 = vpop.f32.mrf.mxu1 }
 0x167   : > { %v1024_v60 = vmax.f32 %v856_v56, 0.0  ;;  %v1056_v61 = vmax.f32 %v984_v57, 0.0 }
 0x168   : > { %v860_v62 = vpop.f32.mrf.mxu0  ;;  %v988_v63 = vpop.f32.mrf.mxu1 }
 0x169   : > { %1088 = vst [vmem:[%s1612_s15 + $0xe8] sm:$0xff] %v1024_v60  ;;  %1120 = vst [vmem:[%s1612_s15 + $0x1e8] sm:$0xff] %v1056_v61  ;;  %v861_v0 = vadd.f32 %v1603_v10, %v860_v62  ;;  %v989_v1 = vadd.f32 %v1603_v10, %v988_v63 }
 0x16a   : > { %v862_v2 = vpop.f32.mrf.mxu0  ;;  %v990_v3 = vpop.f32.mrf.mxu1 }
 0x16b   : > { %v1025_v4 = vmax.f32 %v861_v0, 0.0  ;;  %v1057_v5 = vmax.f32 %v989_v1, 0.0 }
 0x16c   : > { %v863_v6 = vpop.f32.mrf.mxu0  ;;  %v991_v7 = vpop.f32.mrf.mxu1 }
 0x16d   : > { %1089 = vst [vmem:[%s1612_s15 + $0xf0] sm:$0xff] %v1025_v4  ;;  %1121 = vst [vmem:[%s1612_s15 + $0x1f0] sm:$0xff] %v1057_v5  ;;  %v864_v8 = vadd.f32 %v1603_v10, %v863_v6  ;;  %v992_v9 = vadd.f32 %v1603_v10, %v991_v7 }
 0x16e   : > { %v865_v11 = vpop.f32.mrf.mxu0  ;;  %v993_v12 = vpop.f32.mrf.mxu1 }
 0x16f   : > { %v1026_v13 = vmax.f32 %v864_v8, 0.0  ;;  %v1058_v14 = vmax.f32 %v992_v9, 0.0 }
 0x171   : > { %1090 = vst [vmem:[%s1612_s15 + $0xf8] sm:$0xff] %v1026_v13  ;;  %1122 = vst [vmem:[%s1612_s15 + $0x1f8] sm:$0xff] %v1058_v14 }
 0x172 PF: > { %s13_s12 = sadd.s32 1, %s1436_s12  }
 0x173   : > { %p10_p4 = scmp.ge.s32.totalorder %s13_s12, 4  }
 0x175   :  { %12 = sbr.rel (!%p10_p4) target bundleno = 1 (0x1), region = 62 }

// kernel: forward.9
= control target key start
LH: loop header
LB: loop body
LE: loop exit
PB: predicated region body
PF: predicated region fallthrough
CT: control target
= control target key end

     0   :  { %s1047_s12 = smov 0   ;;  %s1219_s0 = inlined_call_operand.vmem [shape: bf16[256,288], index: 0, kind: input, shape index: {}]   ;;  %s1220_s1 = inlined_call_operand.vmem [shape: bf16[288,128], index: 1, kind: input, shape index: {}]   ;;  %s1221_s2 = inlined_call_operand.vmem [shape: f32[1,128], index: 2, kind: input, shape index: {}]   ;;  %s1222_s3 = inlined_call_operand.vmem [shape: f32[256,128], index: 3, kind: output, shape index: {}]  }
   0x1 LB: > { %s788_s13 = sadd.s32 4294967295, %s1025_s12   ;;  %p792_p0 = scmp.ge.s32.totalorder %s1025_s12, 1  ;;  %s1025_s12 = sphi %s1047_s12, %s13_s12  }
   0x2   : > { %p139_p1 = scmp.lt.s32.totalorder %s1025_s12, 3 }
   0x4   : > { %p140_p2 = pnand %p792_p0, %p139_p1 }
   0x5   : > { %s793_s16 = sshll.u32 (!%p140_p2), %s788_s13, 4 }
   0x6   : > { %143 = sbr.rel (%p140_p2) target bundleno = 292 (0x124), region = 32  ;;  %p165_p3 = scmp.lt.s32.totalorder (!%p140_p2), %s793_s16, 31 }
   0xb   : > { %v969_v0 = vld [vmem:[%s1220_s1 + $0x78] sm:$0xff]   ;;  %v971_v2 = vld [vmem:[%s1220_s1 + $0x70] sm:$0xff]   ;;  %v973_v4 = vld [vmem:[%s1220_s1 + $0x68] sm:$0xff]   ;;  %s1224_s16 = smov (!%p165_p3, %s793_s16), 31  ;;  %vm481_vm0 = vcmask 261120  }
   0xc   : > { %v970_v1 = vld [vmem:[%s1220_s1 + $0x38] sm:$0xff]   ;;  %850 = vmatprep.subr.bf16.mxu0 %v969_v0  ;;  %944 = vmatprep.subr.bf16.mxu1 %v969_v0  ;;  %v972_v3 = vld [vmem:[%s1220_s1 + $0x30] sm:$0xff]   ;;  %v974_v5 = vld [vmem:[%s1220_s1 + $0x28] sm:$0xff]   ;;  %s960_s29 = smul.u32 12, %s1224_s16  ;;  %s796_s5 = sshll.u32 %s1224_s16, 3 }
   0xd   : > { %851 = vmatpush3.bf16.msra.mxu0 %v970_v1  ;;  %952 = vmatpush3.bf16.msra.mxu1 %v970_v1  ;;  %v975_v6 = vld [vmem:[%s1220_s1 + $0x60] sm:$0xff]   ;;  %v977_v8 = vld [vmem:[%s1220_s1 + $0x58] sm:$0xff]   ;;  %v979_v10 = vld [vmem:[%s1220_s1 + $0x50] sm:$0xff]   ;;  %s1176_s8 = scalar_lea.vmem %s1222_s3, %s796_s5 }
   0xe   : > { %852 = vmatprep.subr.bf16.mxu0 %v971_v2  ;;  %945 = vmatprep.subr.bf16.mxu1 %v971_v2  ;;  %v976_v7 = vld [vmem:[%s1220_s1 + $0x20] sm:$0xff]   ;;  %s1088_s9 = scalar_lea.vmem %s1219_s0, %s960_s29  ;;  %v978_v9 = vld [vmem:[%s1220_s1 + $0x18] sm:$0xff]   ;;  %v980_v13 = vld [vmem:[%s1220_s1 + $0x10] sm:$0xff]  }
   0xf   : > { %v987_v11 = vld [vmem:[%s1088_s9 + $0x4] ss:$12 sps:$4 sm:$0xff]   ;;  %v990_v12 = vld [vmem:[%s1088_s9 + $0x94] ss:$12 sps:$4 sm:$0xff]   ;;  %v981_v14 = vld [vmem:[%s1220_s1 + $0x48] sm:$0xff]  }
  0x10   : > { %538 = vmatprep.mubr.bf16.mxu0 %v987_v11  ;;  %586 = vmatprep.mubr.bf16.mxu1 %v990_v12  ;;  %v982_v15 = vld [vmem:[%s1220_s1 + $0x8] sm:$0xff]   ;;  %v983_v16 = vld [vmem:[%s1220_s1 + $0x40] sm:$0xff]   ;;  %v988_v20 = vld [vmem:[%s1088_s9 + $0x90] ss:$12 sps:$4 sm:$0xff]  }
  0x11   : > { %853 = vmatpush3.bf16.msra.mxu0 %v972_v3  ;;  %953 = vmatpush3.bf16.msra.mxu1 %v972_v3  ;;  %v984_v17 = vld [vmem:[%s1220_s1] sm:$0xff]   ;;  %v991_v19 = vld [vmem:[%s1220_s1 + $0x88] sm:$0xff]   ;;  %v1002_v28 = vld [vmem:[%s1088_s9 + $0x30] ss:$12 sps:$4 sm:$0xff]  }
  0x12   : > { %854 = vmatprep.subr.bf16.mxu0 %v973_v4  ;;  %946 = vmatprep.subr.bf16.mxu1 %v973_v4  ;;  %v985_v18 = vld [vmem:[%s1088_s9] ss:$12 sps:$4 sm:$0xff]   ;;  %v992_v21 = vld [vmem:[%s1088_s9 + $0x1c] ss:$12 sps:$4 sm:$0xff]   ;;  %v996_v24 = vld [vmem:[%s1088_s9 + $0x18] ss:$12 sps:$4 sm:$0xff]  }
  0x13   : > { %v994_v22 = vld [vmem:[%s1088_s9 + $0xac] ss:$12 sps:$4 sm:$0xff]   ;;  %v998_v23 = vld [vmem:[%s1220_s1 + $0x80] sm:$0xff]   ;;  %v997_v25 = vld [vmem:[%s1088_s9 + $0xa8] ss:$12 sps:$4 sm:$0xff]  }
  0x14   : > { %v999_v26 = vld [vmem:[%s1088_s9 + $0x34] ss:$12 sps:$4 sm:$0xff]   ;;  %v1004_v30 = vld [vmem:[%s1088_s9 + $0x4c] ss:$12 sps:$4 sm:$0xff]   ;;  %v1008_v33 = vld [vmem:[%s1088_s9 + $0x50] ss:$12 sps:$4 sm:$0xff]  }
  0x15   : > { %855 = vmatpush3.bf16.msra.mxu0 %v974_v5  ;;  %954 = vmatpush3.bf16.msra.mxu1 %v974_v5  ;;  %v1001_v27 = vld [vmem:[%s1088_s9 + $0x8] ss:$12 sps:$4 sm:$0xff]   ;;  %v1003_v29 = vld [vmem:[%s1088_s9 + $0x20] ss:$12 sps:$4 sm:$0xff]   ;;  %v1006_v31 = vld [vmem:[%s1088_s9 + $0x38] ss:$12 sps:$4 sm:$0xff]  }
  0x16   : > { %856 = vmatprep.subr.bf16.mxu0 %v975_v6  ;;  %947 = vmatprep.subr.bf16.mxu1 %v975_v6  ;;  %v1007_v32 = vld [vmem:[%s1088_s9 + $0x48] ss:$12 sps:$4 sm:$0xff]   ;;  %v1009_v34 = vld [vmem:[%s1088_s9 + $0x64] ss:$12 sps:$4 sm:$0xff]   ;;  %v1012_v36 = vld [vmem:[%s1088_s9 + $0x60] ss:$12 sps:$4 sm:$0xff]  }
  0x17   : > { %v1011_v35 = vld [vmem:[%s1088_s9 + $0x68] ss:$12 sps:$4 sm:$0xff]   ;;  %v1013_v37 = vld [vmem:[%s1088_s9 + $0x80] ss:$12 sps:$4 sm:$0xff]   ;;  %v1016_v39 = vld [vmem:[%s1088_s9 + $0x98] ss:$12 sps:$4 sm:$0xff]  }
  0x18   : > { %v1014_v38 = vld [vmem:[%s1088_s9 + $0x7c] ss:$12 sps:$4 sm:$0xff]   ;;  %v1017_v40 = vld [vmem:[%s1088_s9 + $0x78] ss:$12 sps:$4 sm:$0xff]   ;;  %v1168_v60 = vld [vmem:[%s1221_s2] ss:$0 sm:$0xff] }
  0x19   : > { %857 = vmatpush3.bf16.msra.mxu0 %v976_v7  ;;  %955 = vmatpush3.bf16.msra.mxu1 %v976_v7  ;;  %v1018_v41 = vld [vmem:[%s1088_s9 + $0xb0] ss:$12 sps:$4 sm:$0xff]  }
  0x1a   : > { %858 = vmatprep.subr.bf16.mxu0 %v977_v8  ;;  %948 = vmatprep.subr.bf16.mxu1 %v977_v8 }
  0x1d   : > { %859 = vmatpush3.bf16.msra.mxu0 %v978_v9  ;;  %956 = vmatpush3.bf16.msra.mxu1 %v978_v9 }
  0x1e   : > { %860 = vmatprep.subr.bf16.mxu0 %v979_v10  ;;  %949 = vmatprep.subr.bf16.mxu1 %v979_v10 }
  0x21   : > { %861 = vmatpush3.bf16.msra.mxu0 %v980_v13  ;;  %957 = vmatpush3.bf16.msra.mxu1 %v980_v13 }
  0x22   : > { %862 = vmatprep.subr.bf16.mxu0 %v981_v14  ;;  %950 = vmatprep.subr.bf16.mxu1 %v981_v14 }
  0x25   : > { %863 = vmatpush3.bf16.msra.mxu0 %v982_v15  ;;  %958 = vmatpush3.bf16.msra.mxu1 %v982_v15 }
  0x26   : > { %864 = vmatprep.subr.bf16.mxu0 %v983_v16  ;;  %951 = vmatprep.subr.bf16.mxu1 %v983_v16 }
  0x29   : > { %865 = vmatpush3.bf16.msra.mxu0 %v984_v17  ;;  %959 = vmatpush3.bf16.msra.mxu1 %v984_v17 }
  0x2a   : > { %924 = vmatprep.subr.bf16.mxu1 %v991_v19 }
  0x2c   : > { %539 = vmatmul.mubr.bf16.vlgmr.msra.gmra.mxu0 %v985_v18  ;;  %587 = vmatmul.mubr.bf16.vlgmr.msra.gmra.mxu1 %v988_v20 }
  0x2d   : > { %925 = vmatpush3.bf16.msra.mxu1 %v991_v19  ;;  %546 = vmatprep.mubr.bf16.mxu0 %v992_v21 }
  0x2e   : > { %594 = vmatprep.mubr.bf16.mxu1 %v994_v22  ;;  %926 = vmatprep.subr.bf16.mxu1 %v998_v23 }
  0x31   : > { %927 = vmatpush3.bf16.msra.mxu1 %v998_v23 }
  0x34   : > { %547 = vmatmul.mubr.bf16.gmra.mxu0 %v996_v24  ;;  %595 = vmatmul.mubr.bf16.gmra.mxu1 %v997_v25 }
  0x35   : > { %554 = vmatprep.mubr.bf16.mxu0 %v999_v26  ;;  %928 = vmatprep.mubr.msk.bf16.mxu1 %vm481_vm0, %v1001_v27 }
  0x3c   : > { %555 = vmatmul.mubr.bf16.gmra.mxu0 %v1002_v28  ;;  %929 = vmatmul.mubr.msk.bf16.vlgmr.msra.gmra.mxu1 %vm481_vm0, %v1003_v29 }
  0x3d   : > { %562 = vmatprep.mubr.bf16.mxu0 %v1004_v30  ;;  %932 = vmatprep.mubr.msk.bf16.mxu1 %vm481_vm0, %v1006_v31 }
  0x44   : > { %563 = vmatmul.mubr.bf16.gmra.mxu0 %v1007_v32  ;;  %933 = vmatmul.mubr.msk.bf16.gmra.mxu1 %vm481_vm0, %v1008_v33 }
  0x45   : > { %570 = vmatprep.mubr.bf16.mxu0 %v1009_v34  ;;  %936 = vmatprep.mubr.msk.bf16.mxu1 %vm481_vm0, %v1011_v35 }
  0x4c   : > { %571 = vmatmul.mubr.bf16.gmra.mxu0 %v1012_v36  ;;  %937 = vmatmul.mubr.msk.bf16.gmra.mxu1 %vm481_vm0, %v1013_v37 }
  0x4d   : > { %578 = vmatprep.mubr.bf16.mxu0 %v1014_v38  ;;  %940 = vmatprep.mubr.msk.bf16.mxu1 %vm481_vm0, %v1016_v39 }
  0x54   : > { %579 = vmatmul.mubr.bf16.gmra.mxu0 %v1017_v40  ;;  %941 = vmatmul.mubr.msk.bf16.gmra.mxu1 %vm481_vm0, %v1018_v41 }
  0xec   : > { %v866_v42 = vpop.f32.mrf.mxu0  ;;  %v1149_v43 = vpop.f32.mrf.mxu1 }
  0xee   : > { %v867_v44 = vpop.f32.mrf.mxu0  ;;  %v1151_v45 = vpop.f32.mrf.mxu1 }
  0xef   : > { %v868_v57 = vadd.f32 %v867_v44, %v866_v42 }
  0xf0   : > { %v869_v46 = vpop.f32.mrf.mxu0  ;;  %v1153_v47 = vpop.f32.mrf.mxu1 }
  0xf1   : > { %v541_v3 = vadd.f32 %v868_v57, %v1168_v60  ;;  %v904_v57 = vadd.f32 %v1151_v45, %v1149_v43 }
  0xf2   : > { %v870_v48 = vpop.f32.mrf.mxu0  ;;  %v1155_v49 = vpop.f32.mrf.mxu1 }
  0xf3   : > { %v871_v1 = vadd.f32 %v870_v48, %v869_v46 }
  0xf4   : > { %v872_v50 = vpop.f32.mrf.mxu0  ;;  %v1157_v51 = vpop.f32.mrf.mxu1 }
  0xf5   : > { %v544_v14 = vadd.f32 %v871_v1, %v1168_v60 }
  0xf6   : > { %v873_v52 = vpop.f32.mrf.mxu0  ;;  %v1159_v53 = vpop.f32.mrf.mxu1 }
  0xf7   : > { %v874_v54 = vadd.f32 %v873_v52, %v872_v50  ;;  %v910_v48 = vadd.f32 %v1159_v53, %v1157_v51 }
  0xf8   : > { %v875_v55 = vpop.f32.mrf.mxu0  ;;  %v1161_v56 = vpop.f32.mrf.mxu1 }
  0xf9   : > { %v549_v62 = vadd.f32 %v874_v54, %v1168_v60  ;;  %v597_v1 = vadd.f32 %v910_v48, %v1168_v60 }
  0xfa   : > { %v876_v58 = vpop.f32.mrf.mxu0  ;;  %v1163_v59 = vpop.f32.mrf.mxu1 }
  0xfb   : > { %v877_v61 = vadd.f32 %v876_v58, %v875_v55 }
  0xfc   : > { %v878_v63 = vpop.f32.mrf.mxu0  ;;  %v930_v0 = vpop.f32.mrf.mxu1 }
  0xfd   : > { %v646_v2 = vadd.f32 %v930_v0, %v549_v62  ;;  %v552_v8 = vadd.f32 %v877_v61, %v1168_v60  ;;  %v913_v62 = vadd.f32 %v1163_v59, %v1161_v56  ;;  %v589_v56 = vadd.f32 %v904_v57, %v1168_v60 }
  0xfe   : > { %v879_v4 = vpop.f32.mrf.mxu0  ;;  %v637_v5 = vpop.f32.mrf.mxu1 }
  0xff   : > { %v702_v6 = vmax.f32 %v646_v2, 0.0  ;;  %v638_v7 = vadd.f32 %v637_v5, %v541_v3  ;;  %v880_v11 = vadd.f32 %v879_v4, %v878_v63  ;;  %v907_v2 = vadd.f32 %v1155_v49, %v1153_v47 }
 0x100   : > { %v881_v9 = vpop.f32.mrf.mxu0  ;;  %v931_v10 = vpop.f32.mrf.mxu1 }
 0x101   : > { %718 = vst [vmem:[%s1176_s8 + $0x10] sm:$0xff] %v702_v6  ;;  %v700_v12 = vmax.f32 %v638_v7, 0.0  ;;  %v649_v13 = vadd.f32 %v931_v10, %v552_v8  ;;  %v557_v23 = vadd.f32 %v880_v11, %v1168_v60  ;;  %v600_v7 = vadd.f32 %v913_v62, %v1168_v60 }
 0x102   : > { %v882_v15 = vpop.f32.mrf.mxu0  ;;  %v640_v16 = vpop.f32.mrf.mxu1 }
 0x103   : > { %716 = vst [vmem:[%s1176_s8] sm:$0xff] %v700_v12  ;;  %v703_v17 = vmax.f32 %v649_v13, 0.0  ;;  %v641_v18 = vadd.f32 %v640_v16, %v544_v14  ;;  %v883_v21 = vadd.f32 %v882_v15, %v881_v9  ;;  %v592_v12 = vadd.f32 %v907_v2, %v1168_v60 }
 0x104   : > { %v884_v19 = vpop.f32.mrf.mxu0  ;;  %v934_v20 = vpop.f32.mrf.mxu1 }
 0x105   : > { %719 = vst [vmem:[%s1176_s8 + $0x18] sm:$0xff] %v703_v17  ;;  %v701_v22 = vmax.f32 %v641_v18, 0.0  ;;  %v560_v32 = vadd.f32 %v883_v21, %v1168_v60 }
 0x106   : > { %v885_v24 = vpop.f32.mrf.mxu0  ;;  %v653_v25 = vpop.f32.mrf.mxu1 }
 0x107   : > { %717 = vst [vmem:[%s1176_s8 + $0x8] sm:$0xff] %v701_v22  ;;  %v886_v26 = vadd.f32 %v885_v24, %v884_v19  ;;  %v654_v27 = vadd.f32 %v653_v25, %v557_v23 }
 0x108   : > { %v887_v28 = vpop.f32.mrf.mxu0  ;;  %v935_v29 = vpop.f32.mrf.mxu1 }
 0x109   : > { %v565_v30 = vadd.f32 %v886_v26, %v1168_v60  ;;  %v704_v31 = vmax.f32 %v654_v27, 0.0 }
 0x10a   : > { %v888_v33 = vpop.f32.mrf.mxu0  ;;  %v656_v34 = vpop.f32.mrf.mxu1 }
 0x10b   : > { %v662_v35 = vadd.f32 %v934_v20, %v565_v30  ;;  %720 = vst [vmem:[%s1176_s8 + $0x20] sm:$0xff] %v704_v31  ;;  %v889_v36 = vadd.f32 %v888_v33, %v887_v28  ;;  %v657_v37 = vadd.f32 %v656_v34, %v560_v32 }
 0x10c   : > { %v890_v38 = vpop.f32.mrf.mxu0  ;;  %v938_v39 = vpop.f32.mrf.mxu1 }
 0x10d   : > { %v706_v40 = vmax.f32 %v662_v35, 0.0  ;;  %v568_v41 = vadd.f32 %v889_v36, %v1168_v60  ;;  %v705_v42 = vmax.f32 %v657_v37, 0.0 }
 0x10e   : > { %v891_v44 = vpop.f32.mrf.mxu0  ;;  %v669_v46 = vpop.f32.mrf.mxu1 }
 0x10f   : > { %722 = vst [vmem:[%s1176_s8 + $0x30] sm:$0xff] %v706_v40  ;;  %v665_v50 = vadd.f32 %v935_v29, %v568_v41  ;;  %721 = vst [vmem:[%s1176_s8 + $0x28] sm:$0xff] %v705_v42  ;;  %v892_v52 = vadd.f32 %v891_v44, %v890_v38 }
 0x110   : > { %v893_v54 = vpop.f32.mrf.mxu0  ;;  %v939_v55 = vpop.f32.mrf.mxu1 }
 0x111   : > { %v707_v58 = vmax.f32 %v665_v50, 0.0  ;;  %v573_v61 = vadd.f32 %v892_v52, %v1168_v60 }
 0x112   : > { %v894_v63 = vpop.f32.mrf.mxu0  ;;  %v672_v0 = vpop.f32.mrf.mxu1 }
 0x113   : > { %723 = vst [vmem:[%s1176_s8 + $0x38] sm:$0xff] %v707_v58  ;;  %v670_v51 = vadd.f32 %v669_v46, %v573_v61  ;;  %v895_v53 = vadd.f32 %v894_v63, %v893_v54 }
 0x114   : > { %v896_v3 = vpop.f32.mrf.mxu0  ;;  %v942_v4 = vpop.f32.mrf.mxu1 }
 0x115   : > { %v708_v43 = vmax.f32 %v670_v51, 0.0  ;;  %v576_v45 = vadd.f32 %v895_v53, %v1168_v60  ;;  %v694_v5 = vadd.f32 %v942_v4, %v597_v1 }
 0x116   : > { %v897_v59 = vpop.f32.mrf.mxu0  ;;  %v685_v6 = vpop.f32.mrf.mxu1 }
 0x117   : > { %724 = vst [vmem:[%s1176_s8 + $0x40] sm:$0xff] %v708_v43  ;;  %v673_v8 = vadd.f32 %v672_v0, %v576_v45  ;;  %v714_v9 = vmax.f32 %v694_v5, 0.0  ;;  %v898_v10 = vadd.f32 %v897_v59, %v896_v3  ;;  %v686_v47 = vadd.f32 %v685_v6, %v589_v56 }
 0x118   : > { %v899_v49 = vpop.f32.mrf.mxu0  ;;  %v943_v11 = vpop.f32.mrf.mxu1 }
 0x119   : > { %v709_v13 = vmax.f32 %v673_v8, 0.0  ;;  %730 = vst [vmem:[%s1176_s8 + $0x70] sm:$0xff] %v714_v9  ;;  %v581_v14 = vadd.f32 %v898_v10, %v1168_v60  ;;  %v712_v15 = vmax.f32 %v686_v47, 0.0  ;;  %v697_v16 = vadd.f32 %v943_v11, %v600_v7 }
 0x11a   : > { %v900_v17 = vpop.f32.mrf.mxu0  ;;  %v688_v18 = vpop.f32.mrf.mxu1 }
 0x11b   : > { %725 = vst [vmem:[%s1176_s8 + $0x48] sm:$0xff] %v709_v13  ;;  %v678_v19 = vadd.f32 %v938_v39, %v581_v14  ;;  %728 = vst [vmem:[%s1176_s8 + $0x60] sm:$0xff] %v712_v15  ;;  %v715_v20 = vmax.f32 %v697_v16, 0.0  ;;  %v901_v21 = vadd.f32 %v900_v17, %v899_v49  ;;  %v689_v22 = vadd.f32 %v688_v18, %v592_v12 }
 0x11d   : > { %v710_v23 = vmax.f32 %v678_v19, 0.0  ;;  %731 = vst [vmem:[%s1176_s8 + $0x78] sm:$0xff] %v715_v20  ;;  %v584_v24 = vadd.f32 %v901_v21, %v1168_v60  ;;  %v713_v25 = vmax.f32 %v689_v22, 0.0 }
 0x11f   : > { %726 = vst [vmem:[%s1176_s8 + $0x50] sm:$0xff] %v710_v23  ;;  %v681_v26 = vadd.f32 %v939_v55, %v584_v24  ;;  %729 = vst [vmem:[%s1176_s8 + $0x68] sm:$0xff] %v713_v25 }
 0x121   : > { %v711_v27 = vmax.f32 %v681_v26, 0.0 }
 0x123   : > { %727 = vst [vmem:[%s1176_s8 + $0x58] sm:$0xff] %v711_v27 }
 0x124 PF: > { %s13_s12 = sadd.s32 1, %s1025_s12  }
 0x125   : > { %p10_p4 = scmp.ge.s32.totalorder %s13_s12, 4  }
 0x127   :  { %12 = sbr.rel (!%p10_p4) target bundleno = 1 (0x1), region = 62 }

// kernel: forward.10
= control target key start
LH: loop header
LB: loop body
LE: loop exit
PB: predicated region body
PF: predicated region fallthrough
CT: control target
= control target key end

     0   :  { %vm434_vm0 = vcmask 523264   ;;  %s1114_s1 = inlined_call_operand.vmem [shape: bf16[576,128], index: 1, kind: input, shape index: {}]   ;;  %s1115_s0 = inlined_call_operand.vmem [shape: bf16[64,576], index: 0, kind: input, shape index: {}]   ;;  %s1116_s2 = inlined_call_operand.vmem [shape: f32[1,128], index: 2, kind: input, shape index: {}]   ;;  %s1117_s3 = inlined_call_operand.vmem [shape: f32[64,128], index: 3, kind: output, shape index: {}]  }
   0x1   :  { %v835_v0 = vld [vmem:[%s1114_s1 + $0x78] sm:$0xff]   ;;  %v839_v4 = vld [vmem:[%s1114_s1 + $0x70] sm:$0xff]   ;;  %v843_v8 = vld [vmem:[%s1114_s1 + $0x68] sm:$0xff]  }
   0x2   :  { %v836_v1 = vld [vmem:[%s1114_s1 + $0xf8] sm:$0xff]   ;;  %723 = vmatprep.subr.bf16.mxu0 %v835_v0  ;;  %v840_v5 = vld [vmem:[%s1114_s1 + $0xf0] sm:$0xff]   ;;  %v844_v9 = vld [vmem:[%s1114_s1 + $0xe8] sm:$0xff]  }
   0x3   :  { %v837_v2 = vld [vmem:[%s1114_s1 + $0x38] sm:$0xff]   ;;  %763 = vmatprep.subr.bf16.mxu1 %v836_v1  ;;  %v841_v6 = vld [vmem:[%s1114_s1 + $0x30] sm:$0xff]   ;;  %v845_v10 = vld [vmem:[%s1114_s1 + $0x28] sm:$0xff]  }
   0x4   :  { %v838_v3 = vld [vmem:[%s1114_s1 + $0xb8] sm:$0xff]   ;;  %724 = vmatpush3.bf16.msra.mxu0 %v837_v2  ;;  %v842_v7 = vld [vmem:[%s1114_s1 + $0xb0] sm:$0xff]   ;;  %v846_v11 = vld [vmem:[%s1114_s1 + $0xa8] sm:$0xff]  }
   0x5   :  { %764 = vmatpush3.bf16.msra.mxu1 %v838_v3  ;;  %725 = vmatprep.subr.bf16.mxu0 %v839_v4  ;;  %v847_v12 = vld [vmem:[%s1114_s1 + $0x60] sm:$0xff]   ;;  %v851_v16 = vld [vmem:[%s1114_s1 + $0x58] sm:$0xff]   ;;  %v855_v20 = vld [vmem:[%s1114_s1 + $0x50] sm:$0xff]  }
   0x6   :  { %765 = vmatprep.subr.bf16.mxu1 %v840_v5  ;;  %v848_v13 = vld [vmem:[%s1114_s1 + $0xe0] sm:$0xff]   ;;  %v852_v17 = vld [vmem:[%s1114_s1 + $0xd8] sm:$0xff]   ;;  %v856_v21 = vld [vmem:[%s1114_s1 + $0xd0] sm:$0xff]  }
   0x7   :  { %v849_v14 = vld [vmem:[%s1114_s1 + $0x20] sm:$0xff]   ;;  %v853_v18 = vld [vmem:[%s1114_s1 + $0x18] sm:$0xff]   ;;  %v857_v22 = vld [vmem:[%s1114_s1 + $0x10] sm:$0xff]  }
   0x8   :  { %726 = vmatpush3.bf16.msra.mxu0 %v841_v6  ;;  %v850_v15 = vld [vmem:[%s1114_s1 + $0xa0] sm:$0xff]   ;;  %v854_v19 = vld [vmem:[%s1114_s1 + $0x98] sm:$0xff]   ;;  %v858_v23 = vld [vmem:[%s1114_s1 + $0x90] sm:$0xff]  }
   0x9   :  { %766 = vmatpush3.bf16.msra.mxu1 %v842_v7  ;;  %727 = vmatprep.subr.bf16.mxu0 %v843_v8  ;;  %v859_v24 = vld [vmem:[%s1114_s1 + $0x48] sm:$0xff]   ;;  %v863_v28 = vld [vmem:[%s1114_s1 + $0x40] sm:$0xff]   ;;  %v873_v36 = vld [vmem:[%s1114_s1 + $0x118] sm:$0xff]  }
   0xa   :  { %767 = vmatprep.subr.bf16.mxu1 %v844_v9  ;;  %v860_v25 = vld [vmem:[%s1114_s1 + $0xc8] sm:$0xff]   ;;  %v864_v29 = vld [vmem:[%s1114_s1 + $0xc0] sm:$0xff]   ;;  %v880_v39 = vld [vmem:[%s1114_s1 + $0x110] sm:$0xff]  }
   0xb   :  { %v861_v26 = vld [vmem:[%s1114_s1 + $0x8] sm:$0xff]   ;;  %v865_v30 = vld [vmem:[%s1114_s1] sm:$0xff]   ;;  %v883_v43 = vld [vmem:[%s1115_s0 + $0x5c] ss:$20 sps:$4 sm:$0xff]  }
   0xc   :  { %728 = vmatpush3.bf16.msra.mxu0 %v845_v10  ;;  %v862_v27 = vld [vmem:[%s1114_s1 + $0x88] sm:$0xff]   ;;  %v866_v31 = vld [vmem:[%s1114_s1 + $0x80] sm:$0xff]   ;;  %v888_v48 = vld [vmem:[%s1115_s0 + $0x7c] ss:$20 sps:$4 sm:$0xff]  }
   0xd   :  { %768 = vmatpush3.bf16.msra.mxu1 %v846_v11  ;;  %729 = vmatprep.subr.bf16.mxu0 %v847_v12  ;;  %v867_v32 = vld [vmem:[%s1115_s0] ss:$20 sps:$4 sm:$0xff]   ;;  %v869_v33 = vld [vmem:[%s1115_s0 + $0x4] ss:$20 sps:$4 sm:$0xff]   ;;  %v870_v34 = vld [vmem:[%s1115_s0 + $0x8] ss:$20 sps:$4 sm:$0xff]  }
   0xe   :  { %769 = vmatprep.subr.bf16.mxu1 %v848_v13  ;;  %v872_v35 = vld [vmem:[%s1115_s0 + $0xc] ss:$20 sps:$4 sm:$0xff]   ;;  %479 = vmatprep.mubr.bf16.mxu0 %v869_v33  ;;  %v876_v38 = vld [vmem:[%s1115_s0 + $0x34] ss:$20 sps:$4 sm:$0xff]   ;;  %v879_v41 = vld [vmem:[%s1115_s0 + $0x30] ss:$20 sps:$4 sm:$0xff]  }
   0xf   :  { %544 = vmatprep.mubr.bf16.mxu1 %v872_v35  ;;  %v874_v37 = vld [vmem:[%s1115_s0 + $0x2c] ss:$20 sps:$4 sm:$0xff]   ;;  %v878_v40 = vld [vmem:[%s1115_s0 + $0x28] ss:$20 sps:$4 sm:$0xff]   ;;  %v885_v46 = vld [vmem:[%s1115_s0 + $0x50] ss:$20 sps:$4 sm:$0xff]  }
  0x10   :  { %730 = vmatpush3.bf16.msra.mxu0 %v849_v14  ;;  %v881_v42 = vld [vmem:[%s1115_s0 + $0x54] ss:$20 sps:$4 sm:$0xff]   ;;  %v894_v45 = vld [vmem:[%s1114_s1 + $0x100] sm:$0xff]   ;;  %v886_v47 = vld [vmem:[%s1115_s0 + $0x58] ss:$20 sps:$4 sm:$0xff]  }
  0x11   :  { %770 = vmatpush3.bf16.msra.mxu1 %v850_v15  ;;  %731 = vmatprep.subr.bf16.mxu0 %v851_v16  ;;  %v887_v44 = vld [vmem:[%s1114_s1 + $0x108] sm:$0xff]   ;;  %v890_v49 = vld [vmem:[%s1115_s0 + $0x84] ss:$20 sps:$4 sm:$0xff]   ;;  %v893_v51 = vld [vmem:[%s1115_s0 + $0x80] ss:$20 sps:$4 sm:$0xff]  }
  0x12   :  { %771 = vmatprep.subr.bf16.mxu1 %v852_v17  ;;  %v892_v50 = vld [vmem:[%s1115_s0 + $0x78] ss:$20 sps:$4 sm:$0xff]   ;;  %v895_v52 = vld [vmem:[%s1115_s0 + $0x10] ss:$20 sps:$4 sm:$0xff]   ;;  %v896_v53 = vld [vmem:[%s1115_s0 + $0x60] ss:$20 sps:$4 sm:$0xff]  }
  0x13   :  { %v897_v54 = vld [vmem:[%s1115_s0 + $0x38] ss:$20 sps:$4 sm:$0xff]   ;;  %v898_v55 = vld [vmem:[%s1115_s0 + $0x88] ss:$20 sps:$4 sm:$0xff]  }
  0x14   :  { %732 = vmatpush3.bf16.msra.mxu0 %v853_v18 }
  0x15   :  { %772 = vmatpush3.bf16.msra.mxu1 %v854_v19  ;;  %733 = vmatprep.subr.bf16.mxu0 %v855_v20  ;;  %v662_v19 = vld [vmem:[%s1116_s2] ss:$0 sm:$0xff] }
  0x16   :  { %773 = vmatprep.subr.bf16.mxu1 %v856_v21 }
  0x18   :  { %734 = vmatpush3.bf16.msra.mxu0 %v857_v22 }
  0x19   :  { %774 = vmatpush3.bf16.msra.mxu1 %v858_v23  ;;  %735 = vmatprep.subr.bf16.mxu0 %v859_v24 }
  0x1a   :  { %775 = vmatprep.subr.bf16.mxu1 %v860_v25 }
  0x1c   :  { %736 = vmatpush3.bf16.msra.mxu0 %v861_v26 }
  0x1d   :  { %776 = vmatpush3.bf16.msra.mxu1 %v862_v27  ;;  %737 = vmatprep.subr.bf16.mxu0 %v863_v28 }
  0x1e   :  { %777 = vmatprep.subr.bf16.mxu1 %v864_v29 }
  0x20   :  { %738 = vmatpush3.bf16.msra.mxu0 %v865_v30 }
  0x21   :  { %778 = vmatpush3.bf16.msra.mxu1 %v866_v31  ;;  %811 = vmatprep.subr.bf16.mxu0 %v873_v36 }
  0x22   :  { %827 = vmatprep.subr.bf16.mxu1 %v873_v36 }
  0x23   :  { %480 = vmatmul.mubr.bf16.vlgmr.msra.gmra.mxu0 %v867_v32 }
  0x24   :  { %545 = vmatmul.mubr.bf16.vlgmr.msra.gmra.mxu1 %v870_v34  ;;  %812 = vmatpush3.bf16.msra.mxu0 %v873_v36 }
  0x25   :  { %831 = vmatpush3.bf16.msra.mxu1 %v873_v36  ;;  %487 = vmatprep.mubr.bf16.mxu0 %v874_v37 }
  0x26   :  { %552 = vmatprep.mubr.bf16.mxu1 %v876_v38  ;;  %813 = vmatprep.subr.bf16.mxu0 %v880_v39 }
  0x27   :  { %828 = vmatprep.subr.bf16.mxu1 %v880_v39 }
  0x28   :  { %814 = vmatpush3.bf16.msra.mxu0 %v880_v39 }
  0x29   :  { %832 = vmatpush3.bf16.msra.mxu1 %v880_v39  ;;  %815 = vmatprep.subr.bf16.mxu0 %v887_v44 }
  0x2a   :  { %829 = vmatprep.subr.bf16.mxu1 %v887_v44 }
  0x2b   :  { %488 = vmatmul.mubr.bf16.gmra.mxu0 %v878_v40 }
  0x2c   :  { %553 = vmatmul.mubr.bf16.gmra.mxu1 %v879_v41  ;;  %495 = vmatprep.mubr.bf16.mxu0 %v881_v42 }
  0x2d   :  { %560 = vmatprep.mubr.bf16.mxu1 %v883_v43  ;;  %816 = vmatpush3.bf16.msra.mxu0 %v887_v44 }
  0x2e   :  { %833 = vmatpush3.bf16.msra.mxu1 %v887_v44  ;;  %817 = vmatprep.subr.bf16.mxu0 %v894_v45 }
  0x2f   :  { %830 = vmatprep.subr.bf16.mxu1 %v894_v45 }
  0x31   :  { %818 = vmatpush3.bf16.msra.mxu0 %v894_v45 }
  0x32   :  { %834 = vmatpush3.bf16.msra.mxu1 %v894_v45 }
  0x33   :  { %496 = vmatmul.mubr.bf16.gmra.mxu0 %v885_v46 }
  0x34   :  { %561 = vmatmul.mubr.bf16.gmra.mxu1 %v886_v47  ;;  %503 = vmatprep.mubr.bf16.mxu0 %v888_v48 }
  0x35   :  { %568 = vmatprep.mubr.bf16.mxu1 %v890_v49 }
  0x3b   :  { %504 = vmatmul.mubr.bf16.gmra.mxu0 %v892_v50 }
  0x3c   :  { %569 = vmatmul.mubr.bf16.gmra.mxu1 %v893_v51  ;;  %819 = vmatprep.mubr.msk.bf16.mxu0 %vm434_vm0, %v895_v52 }
  0x3d   :  { %823 = vmatprep.mubr.msk.bf16.mxu1 %vm434_vm0, %v896_v53 }
  0x43   :  { %820 = vmatmul.mubr.msk.bf16.vlgmr.msra.gmra.mxu0 %vm434_vm0, %v897_v54 }
  0x44   :  { %824 = vmatmul.mubr.msk.bf16.vlgmr.msra.gmra.mxu1 %vm434_vm0, %v898_v55 }
  0xe3   :  { %v739_v56 = vpop.f32.mrf.mxu0 }
  0xe4   :  { %v779_v57 = vpop.f32.mrf.mxu1 }
  0xe5   :  { %v740_v58 = vpop.f32.mrf.mxu0 }
  0xe6   :  { %v780_v59 = vpop.f32.mrf.mxu1  ;;  %v741_v17 = vadd.f32 %v740_v58, %v739_v56 }
  0xe7   :  { %v742_v60 = vpop.f32.mrf.mxu0  ;;  %v781_v34 = vadd.f32 %v780_v59, %v779_v57 }
  0xe8   :  { %v782_v61 = vpop.f32.mrf.mxu1  ;;  %v482_v27 = vadd.f32 %v741_v17, %v662_v19 }
  0xe9   :  { %v743_v62 = vpop.f32.mrf.mxu0 }
  0xea   :  { %v783_v63 = vpop.f32.mrf.mxu1  ;;  %v744_v28 = vadd.f32 %v743_v62, %v742_v60  ;;  %v547_v46 = vadd.f32 %v781_v34, %v482_v27 }
  0xeb   :  { %v745_v0 = vpop.f32.mrf.mxu0  ;;  %v784_v52 = vadd.f32 %v783_v63, %v782_v61 }
  0xec   :  { %v785_v1 = vpop.f32.mrf.mxu1  ;;  %v485_v43 = vadd.f32 %v744_v28, %v662_v19 }
  0xed   :  { %v746_v2 = vpop.f32.mrf.mxu0 }
  0xee   :  { %v786_v3 = vpop.f32.mrf.mxu1  ;;  %v747_v15 = vadd.f32 %v746_v2, %v745_v0  ;;  %v550_v63 = vadd.f32 %v784_v52, %v485_v43 }
  0xef   :  { %v748_v4 = vpop.f32.mrf.mxu0  ;;  %v787_v30 = vadd.f32 %v786_v3, %v785_v1 }
  0xf0   :  { %v788_v5 = vpop.f32.mrf.mxu1  ;;  %v490_v23 = vadd.f32 %v747_v15, %v662_v19 }
  0xf1   :  { %v749_v6 = vpop.f32.mrf.mxu0 }
  0xf2   :  { %v789_v7 = vpop.f32.mrf.mxu1  ;;  %v750_v24 = vadd.f32 %v749_v6, %v748_v4  ;;  %v555_v41 = vadd.f32 %v787_v30, %v490_v23 }
  0xf3   :  { %v751_v8 = vpop.f32.mrf.mxu0  ;;  %v790_v47 = vadd.f32 %v789_v7, %v788_v5 }
  0xf4   :  { %v791_v9 = vpop.f32.mrf.mxu1  ;;  %v493_v38 = vadd.f32 %v750_v24, %v662_v19 }
  0xf5   :  { %v752_v10 = vpop.f32.mrf.mxu0 }
  0xf6   :  { %v792_v11 = vpop.f32.mrf.mxu1  ;;  %v753_v21 = vadd.f32 %v752_v10, %v751_v8  ;;  %v558_v60 = vadd.f32 %v790_v47, %v493_v38 }
  0xf7   :  { %v754_v12 = vpop.f32.mrf.mxu0  ;;  %v793_v44 = vadd.f32 %v792_v11, %v791_v9 }
  0xf8   :  { %v794_v13 = vpop.f32.mrf.mxu1  ;;  %v498_v35 = vadd.f32 %v753_v21, %v662_v19 }
  0xf9   :  { %v755_v14 = vpop.f32.mrf.mxu0 }
  0xfa   :  { %v795_v16 = vpop.f32.mrf.mxu1  ;;  %v756_v36 = vadd.f32 %v755_v14, %v754_v12  ;;  %v563_v56 = vadd.f32 %v793_v44, %v498_v35 }
  0xfb   :  { %v757_v18 = vpop.f32.mrf.mxu0  ;;  %v796_v0 = vadd.f32 %v795_v16, %v794_v13 }
  0xfc   :  { %v797_v20 = vpop.f32.mrf.mxu1  ;;  %v501_v53 = vadd.f32 %v756_v36, %v662_v19 }
  0xfd   :  { %v758_v22 = vpop.f32.mrf.mxu0 }
  0xfe   :  { %v759_v25 = vadd.f32 %v758_v22, %v757_v18  ;;  %v798_v26 = vpop.f32.mrf.mxu1  ;;  %v566_v9 = vadd.f32 %v796_v0, %v501_v53 }
  0xff   :  { %v760_v29 = vpop.f32.mrf.mxu0  ;;  %v799_v32 = vadd.f32 %v798_v26, %v797_v20 }
 0x100   :  { %v506_v31 = vadd.f32 %v759_v25, %v662_v19  ;;  %v800_v33 = vpop.f32.mrf.mxu1 }
 0x101   :  { %v761_v37 = vpop.f32.mrf.mxu0 }
 0x102   :  { %v762_v39 = vadd.f32 %v761_v37, %v760_v29  ;;  %v801_v40 = vpop.f32.mrf.mxu1  ;;  %v571_v42 = vadd.f32 %v799_v32, %v506_v31 }
 0x103   :  { %v821_v45 = vpop.f32.mrf.mxu0  ;;  %v802_v49 = vadd.f32 %v801_v40, %v800_v33 }
 0x104   :  { %v509_v48 = vadd.f32 %v762_v39, %v662_v19  ;;  %v620_v50 = vadd.f32 %v821_v45, %v555_v41  ;;  %v825_v51 = vpop.f32.mrf.mxu1 }
 0x105   :  { %v636_v54 = vadd.f32 %v825_v51, %v571_v42  ;;  %v611_v55 = vpop.f32.mrf.mxu0 }
 0x106   :  { %v644_v57 = vmax.f32 %v620_v50, 0.0  ;;  %v612_v58 = vadd.f32 %v611_v55, %v547_v46  ;;  %v627_v59 = vpop.f32.mrf.mxu1  ;;  %v574_v62 = vadd.f32 %v802_v49, %v509_v48 }
 0x107   :  { %v648_v1 = vmax.f32 %v636_v54, 0.0  ;;  %v628_v2 = vadd.f32 %v627_v59, %v563_v56  ;;  %v822_v3 = vpop.f32.mrf.mxu0 }
 0x108   :  { %652 = vst [vmem:[%s1117_s3 + $0x10] sm:$0xff] %v644_v57  ;;  %v642_v4 = vmax.f32 %v612_v58, 0.0  ;;  %v623_v5 = vadd.f32 %v822_v3, %v558_v60  ;;  %v826_v61 = vpop.f32.mrf.mxu1 }
 0x109   :  { %656 = vst [vmem:[%s1117_s3 + $0x30] sm:$0xff] %v648_v1  ;;  %v646_v6 = vmax.f32 %v628_v2, 0.0  ;;  %v639_v7 = vadd.f32 %v826_v61, %v574_v62  ;;  %v614_v8 = vpop.f32.mrf.mxu0 }
 0x10a   :  { %650 = vst [vmem:[%s1117_s3] sm:$0xff] %v642_v4  ;;  %v645_v10 = vmax.f32 %v623_v5, 0.0  ;;  %v615_v11 = vadd.f32 %v614_v8, %v550_v63  ;;  %v630_v12 = vpop.f32.mrf.mxu1 }
 0x10b   :  { %654 = vst [vmem:[%s1117_s3 + $0x20] sm:$0xff] %v646_v6  ;;  %v649_v13 = vmax.f32 %v639_v7, 0.0  ;;  %v631_v14 = vadd.f32 %v630_v12, %v566_v9 }
 0x10c   :  { %653 = vst [vmem:[%s1117_s3 + $0x18] sm:$0xff] %v645_v10  ;;  %v643_v15 = vmax.f32 %v615_v11, 0.0 }
 0x10d   :  { %657 = vst [vmem:[%s1117_s3 + $0x38] sm:$0xff] %v649_v13  ;;  %v647_v16 = vmax.f32 %v631_v14, 0.0 }
 0x10e   :  { %651 = vst [vmem:[%s1117_s3 + $0x8] sm:$0xff] %v643_v15 }
 0x10f   :  { %655 = vst [vmem:[%s1117_s3 + $0x28] sm:$0xff] %v647_v16 }

// kernel: forward.11
= control target key start
LH: loop header
LB: loop body
LE: loop exit
PB: predicated region body
PF: predicated region fallthrough
CT: control target
= control target key end

     0   :  { %s5701_s0 = inlined_call_operand.vmem [shape: f32[2,32,64], index: 0, kind: input, shape index: {}]   ;;  %s5702_s1 = inlined_call_operand.vmem [shape: f32[32,64], index: 1, kind: input, shape index: {}]   ;;  %s5703_s2 = inlined_call_operand.vmem [shape: f32[16,64], index: 2, kind: input, shape index: {}]   ;;  %s5704_s3 = inlined_call_operand.vmem [shape: f32[64,192], index: 3, kind: input, shape index: {}]   ;;  %s5705_s4 = inlined_call_operand.vmem [shape: f32[1,192], index: 4, kind: input, shape index: {}]   ;;  %s5706_s5 = inlined_call_operand.vmem [shape: f32[64,64], index: 5, kind: input, shape index: {}]   ;;  %s5707_s6 = inlined_call_operand.vmem [shape: f32[1,64], index: 6, kind: input, shape index: {}]   ;;  %s5708_s7 = inlined_call_operand.vmem [shape: f32[64,64], index: 7, kind: input, shape index: {}]   ;;  %s5709_s8 = inlined_call_operand.vmem [shape: f32[1,64], index: 8, kind: input, shape index: {}]   ;;  %s5710_s9 = inlined_call_operand.vmem [shape: f32[64,128], index: 9, kind: input, shape index: {}]   ;;  %s5711_s10 = inlined_call_operand.vmem [shape: f32[1,128], index: 10, kind: input, shape index: {}]   ;;  %s5712_s11 = inlined_call_operand.vmem [shape: f32[64,64], index: 11, kind: input, shape index: {}]   ;;  %s5713_s12 = inlined_call_operand.vmem [shape: f32[1,64], index: 12, kind: input, shape index: {}]   ;;  %s5714_s13 = inlined_call_operand.vmem [shape: f32[1,64], index: 13, kind: input, shape index: {}]   ;;  %s5715_s14 = inlined_call_operand.vmem [shape: f32[1,64], index: 14, kind: input, shape index: {}]   ;;  %s5716_s15 = inlined_call_operand.vmem [shape: f32[1,64], index: 15, kind: input, shape index: {}]   ;;  %s5717_s16 = inlined_call_operand.vmem [shape: f32[1,64], index: 16, kind: input, shape index: {}]   ;;  %s5718_s17 = inlined_call_operand.vmem [shape: f32[1,64], index: 17, kind: input, shape index: {}]   ;;  %s5719_s18 = inlined_call_operand.vmem [shape: f32[1,64], index: 18, kind: input, shape index: {}]   ;;  %s5720_s19 = inlined_call_operand.vmem [shape: f32[64,256], index: 19, kind: input, shape index: {}]   ;;  %s5721_s20 = inlined_call_operand.vmem [shape: f32[1,256], index: 20, kind: input, shape index: {}]   ;;  %s5722_s21 = inlined_call_operand.vmem [shape: f32[256,64], index: 21, kind: input, shape index: {}]   ;;  %s5723_s22 = inlined_call_operand.vmem [shape: f32[1,64], index: 22, kind: input, shape index: {}]   ;;  %s5724_s23 = inlined_call_operand.vmem [shape: f32[64,128], index: 23, kind: input, shape index: {}]   ;;  %s5725_s24 = inlined_call_operand.vmem [shape: f32[1,128], index: 24, kind: input, shape index: {}]   ;;  %s5726_s25 = inlined_call_operand.hbm [shape: f32[2,16,128], index: 25, kind: output, shape index: {}]  }
   0x1   :  { %5760 = sst [smem:[#allocation12_spill]] %s5701_s0 }
   0x2   :  { %5761 = sst [smem:[#allocation13_spill]] %s5702_s1 }
   0x3   :  { %5762 = sst [smem:[#allocation14_spill]] %s5703_s2 }
   0x4   :  { %5763 = sst [smem:[#allocation15_spill]] %s5704_s3 }
   0x5   :  { %5764 = sst [smem:[#allocation16_spill]] %s5705_s4 }
   0x6   :  { %5765 = sst [smem:[#allocation17_spill]] %s5706_s5 }
   0x7   :  { %5766 = sst [smem:[#allocation18_spill]] %s5707_s6 }
   0x8   :  { %5767 = sst [smem:[#allocation19_spill]] %s5708_s7 }
   0x9   :  { %5768 = sst [smem:[#allocation20_spill]] %s5709_s8 }
   0xa   :  { %5769 = sst [smem:[#allocation21_spill]] %s5710_s9 }
   0xb   :  { %5770 = sst [smem:[#allocation22_spill]] %s5711_s10 }
   0xc   :  { %5771 = sst [smem:[#allocation23_spill]] %s5725_s24 }
   0xd   :  { %5772 = sst [smem:[#allocation24_spill]] %s5726_s25 }
   0xe   :  { %30 = vsyncpa [#allocation3], 0 }
   0xf   :  { %32 = vsyncpa [#allocation3 + $0x1], 0  ;;  %s4871_s29 = smov 0   ;;  %s4873_s2 = smov 0  }
  0x10   :  { %s4875_s6 = smov 0   ;;  %s4877_s30 = smov 0  }
  0x11 LB: > { %5773 = sst [smem:[#allocation5_spill]] %s4716_s29  ;;  %s4892_s7 = sadd.s32 4294967295, %s4728_s30   ;;  %s4728_s30 = sphi %s4877_s30, %s5808_s30   ;;  %s4724_s6 = sphi %s4875_s6, %s5810_s6   ;;  %s4720_s2 = sphi %s4873_s2, %s5812_s2   ;;  %s4716_s29 = sphi %s4871_s29, %s5811_s29  }
  0x12   : > { %5774 = sst [smem:[#allocation6_spill]] %s4724_s6  ;;  %s3991_s3 = sadd.s32 4294967294, %s4728_s30  }
  0x13   : > { %5775 = sst [smem:[#allocation7_spill]] %s4728_s30  ;;  %s4896_s26 = sadd.s32 1, %s4728_s30  }
  0x14   : > { %5776 = sst [smem:[#allocation8_spill]] %s4896_s26  ;;  %s575_s1 = sadd.s32 1, %s4724_s6 }
  0x15   : > { %s572_s8 = ssub.s32 %s4728_s30, %s4896_s26  ;;  %p585_p0 = scmp.ne.s32.totalorder %s4724_s6, %s4720_s2 }
  0x16   : > { %p573_p1 = scmp.eq.s32.totalorder %s572_s8, 0  ;;  %p586_p2 = scmp.eq.s32.totalorder %s4892_s7, 1 }
  0x17   : > { %p591_p3 = scmp.ne.s32.totalorder %s4720_s2, %s4716_s29  ;;  %p592_p4 = scmp.eq.s32.totalorder %s3991_s3, 1 }
  0x18   : > { %s4907_s27 = scalar_select %p573_p1, %s4724_s6, %s575_s1  }
  0x19   : > { %p4909_p5 = por %p586_p2, %p585_p0  ;;  %p4913_p6 = por %p592_p4, %p591_p3 }
  0x1a   : > { %5777 = sst [smem:[#allocation9_spill]] %s4907_s27  ;;  %p3994_p7 = scmp.ge.s32.totalorder %s4728_s30, 1 }
  0x1b   : > { %s5778_s4 = scalar_select %p4909_p5, 1, 0 }
  0x1c   : > { %s5780_s28 = scalar_select %p4913_p6, 1, 0 }
  0x1d   : > { %5779 = sst [smem:[#allocation10_spill]] %s5778_s4  ;;  %p690_p8 = scmp.lt.s32.totalorder %s4728_s30, 3 }
  0x1e   : > { %5781 = sst [smem:[#allocation11_spill]] %s5780_s28 }
  0x1f   : > { %p691_p9 = pnand %p3994_p7, %p690_p8 }
  0x20   : > { %s5782_s0 = sld [smem:[#allocation15_spill]] (!%p691_p9)  ;;  %s5750_s8 = smov (!%p691_p9), 64  }
  0x21   : > { %694 = sbr.rel (%p691_p9) target bundleno = 7346 (0x1cb2), region = 120  ;;  %s5783_s6 = sld [smem:[#allocation14_spill]] (!%p691_p9) }
  0x22   : > { %s5785_s5 = sld [smem:[#allocation16_spill]] (!%p691_p9)  ;;  %s5742_s27 = smov (!%p691_p9), 48  }
  0x23   : > { %s5748_s3 = smov (!%p691_p9), 112   ;;  %s5786_s1 = sld [smem:[#allocation17_spill]] (!%p691_p9) }
  0x24   : > { %s5746_s29 = smov (!%p691_p9), 96   ;;  %s5740_s28 = smov (!%p691_p9), 16  }
  0x25   : > { %p758_p10 = scmp.lt.s32.totalorder (!%p691_p9), %s4892_s7, 1  ;;  %s5789_s30 = sld [smem:[#allocation13_spill]] (!%p691_p9) }
  0x26   : > { %v792_v0 = vld [vmem:[%s5782_s0 + $0x78] sm:$0xff]  ;;  %v791_v1 = vld [vmem:[%s5782_s0 + $0x70] sm:$0xff]  ;;  %v790_v2 = vld [vmem:[%s5782_s0 + $0x68] sm:$0xff]  ;;  %v4730_v4 = vmov 0.0   ;;  %vm805_vm0 = vcmask 523264   ;;  %v795_v19 = vlaneseq  ;;  %vm895_vm1 = vcmask 130048  }
  0x27   : > { %828 = vmatprep.subr.mxu0 %v792_v0  ;;  %v789_v3 = vld [vmem:[%s5782_s0 + $0x60] sm:$0xff]  ;;  %876 = vmatprep.mubr.f32.mxu0 %v4730_v4  ;;  %v788_v5 = vld [vmem:[%s5782_s0 + $0x58] sm:$0xff]  ;;  %v787_v6 = vld [vmem:[%s5782_s0 + $0x50] sm:$0xff]  ;;  %s5784_s26 = smov %s5783_s6  ;;  %s5791_s4 = sld [smem:[#allocation12_spill]]  ;;  %vm2387_vm2 = vcmask 261120  }
  0x28   : > { %829 = vmatpush1.msra.mxu0 %v791_v1  ;;  %v786_v7 = vld [vmem:[%s5782_s0 + $0x48] sm:$0xff]  ;;  %v785_v8 = vld [vmem:[%s5782_s0 + $0x40] sm:$0xff]  ;;  %v784_v9 = vld [vmem:[%s5782_s0 + $0x38] sm:$0xff]  ;;  %v4983_v20 = vshrl.u32 %v795_v19, 7  ;;  %s5793_s10 = sld [smem:[#allocation22_spill]]  ;;  %s5797_s9 = smov 48  }
  0x29   : > { %830 = vmatprep.subr.mxu0 %v790_v2  ;;  %v783_v10 = vld [vmem:[%s5782_s0 + $0x30] sm:$0xff]  ;;  %v782_v11 = vld [vmem:[%s5782_s0 + $0x28] sm:$0xff]  ;;  %v781_v12 = vld [vmem:[%s5782_s0 + $0x20] sm:$0xff] }
  0x2a   : > { %831 = vmatpush1.msra.mxu0 %v789_v3  ;;  %v780_v13 = vld [vmem:[%s5782_s0 + $0x18] sm:$0xff]  ;;  %v779_v14 = vld [vmem:[%s5782_s0 + $0x10] sm:$0xff]  ;;  %v778_v15 = vld [vmem:[%s5782_s0 + $0x8] sm:$0xff]  ;;  %v797_v21 = vsub.s32 0, %v4983_v20  ;;  %v801_v29 = vsub.s32 1, %v4983_v20 }
  0x2b   : > { %832 = vmatprep.subr.mxu0 %v788_v5  ;;  %v777_v16 = vld [vmem:[%s5782_s0] sm:$0xff]  ;;  %v4979_v18 = vld [vmem:[%s5784_s26 + $0x8] sm:$0xff]  ;;  %s5790_s25 = smov %s5789_s30  ;;  %s5795_s0 = smov 64  }
  0x2c   : > { %833 = vmatpush1.msra.mxu0 %v787_v6  ;;  %v4971_v17 = vld [vmem:[%s5783_s6] sm:$0xff]  ;;  %v1085_v62 = vld [vmem:[%s5786_s1 + $0x8] sm:$0xff]  ;;  %s5744_s6 = smov 80  }
  0x2d   : > { %834 = vmatprep.subr.mxu0 %v786_v7  ;;  %v793_v22 = vld [vmem:[%s5785_s5] sm:$0x3]  ;;  %s5738_s5 = smov 32  }
  0x2e   : > { %835 = vmatpush1.msra.mxu0 %v785_v8  ;;  %v798_v23 = vrot.slane %v793_v22, %v797_v21  ;;  %v802_v32 = vrot.slane %v793_v22, %v801_v29  ;;  %v1084_v63 = vld [vmem:[%s5786_s1] sm:$0xff] }
  0x2f   : > { %836 = vmatprep.subr.mxu0 %v784_v9  ;;  %v4088_v20 = vld [vmem:[%s5723_s22] ss:$0 sm:$0xff] }
  0x30   : > { %837 = vmatpush1.msra.mxu0 %v783_v10 }
  0x31   : > { %838 = vmatprep.subr.mxu0 %v782_v11 }
  0x32   : > { %839 = vmatpush1.msra.mxu0 %v781_v12 }
  0x33   : > { %840 = vmatprep.subr.mxu0 %v780_v13 }
  0x34   : > { %841 = vmatpush1.msra.mxu0 %v779_v14 }
  0x35   : > { %842 = vmatprep.subr.mxu0 %v778_v15 }
  0x36   : > { %843 = vmatpush1.msra.mxu0 %v777_v16 }
  0x37   : > { %3998 = vmatmul.mubr.msk.f32.vlgmr.msra.gmra.mxu0 %vm805_vm0, %v4971_v17  ;;  %4318 = vmatprep.subr.mxu0 %v1085_v62 }
  0x38   : > { %882 = vmatprep.mubr.f32.mxu0 %v4730_v4  ;;  %4319 = vmatpush3.msra.mxu0 %v1085_v62 }
  0x39   : > { %4320 = vmatprep.subr.mxu0 %v1084_v63 }
  0x3a   : > { %4321 = vmatpush3.msra.mxu0 %v1084_v63 }
  0x3b   : > { %3999 = vmatmul.mubr.msk.f32.gmra.mxu0 %vm805_vm0, %v4979_v18 }
  0xf7   : > { %v878_v24 = vpop.f32.mrf.mxu0 }
  0xf8   : > { %v4991_v25 = vadd.f32 %v878_v24, %v798_v23 }
  0xf9   : > { %v880_v26 = vpop.f32.mrf.mxu0 }
  0xfa   : > { %4287 = vmatprep.mubr.msk.f32.mxu1 %vm895_vm1, %v4991_v25  ;;  %v5011_v35 = vadd.f32 %v880_v26, %v802_v32 }
  0xfb   : > { %v884_v27 = vpop.f32.mrf.mxu0 }
  0xfc   : > { %v4995_v28 = vadd.f32 %v884_v27, %v798_v23 }
  0xfd   : > { %v886_v31 = vpop.f32.mrf.mxu0 }
  0xfe   : > { %893 = vrot.lane.b32.xlu0 %v4995_v28, %s5750_s8  ;;  %v5006_v34 = vadd.f32 %v886_v31, %v802_v32 }
 0x102   : > { %891 = vrot.lane.b32.xlu0 %v4991_v25, %s5750_s8  ;;  %s759_s8 = scalar_select %p758_p10, %s4892_s7, 1 }
 0x170   : > { %v894_v30 = vpop.permute.xlu0 %893 }
 0x171   : > { %4283 = vmatprep.subr.msk.mxu1 %vm895_vm1, %v894_v30 }
 0x172   : > { %4284 = vmatpush3.xpose.msk.msra.mxu1 %vm895_vm1, %v894_v30  ;;  %v1291_v30 = vld [vmem:[%s5786_s1 + $0x18] sm:$0xff] }
 0x174   : > { %v892_v33 = vpop.permute.xlu0 %891 }
 0x175   : > { %4285 = vmatprep.subr.msk.mxu1 %vm895_vm1, %v892_v33 }
 0x176   : > { %4286 = vmatpush3.xpose.msk.msra.mxu1 %vm895_vm1, %v892_v33 }
 0x177   : > { %4290 = vmatprep.subr.mxu1 %v5006_v34 }
 0x179   : > { %4288 = vmatmul.mubr.msk.f32.vlgmr.msra.gmra.mxu1 %vm895_vm1, %v4995_v28 }
 0x17a   : > { %4291 = vmatpush3.msra.mxu1 %v5006_v34 }
 0x17b   : > { %4292 = vmatprep.subr.mxu1 %v5011_v35 }
 0x17c   : > { %4293 = vmatpush3.msra.mxu1 %v5011_v35 }
 0x239   : > { %v4289_v36 = vpop.f32.mrf.mxu1 }
 0x23a   : > { %v980_v39 = vmul.f32 0.25, %v4289_v36 }
 0x23b   : > { %v970_v37 = vpop.f32.mrf.mxu1 }
 0x23c   : > { %v979_v38 = vmul.f32 0.25, %v970_v37  ;;  %v984_v41 = vsel %vm895_vm1, %v980_v39, -inf }
 0x23e   : > { %v981_v40 = vsel %vm895_vm1, %v979_v38, -inf }
 0x23f   : > { %982 = vmax.xlane.f32.xlu1 %v981_v40 }
 0x243   : > { %985 = vmax.xlane.f32.xlu1 %v984_v41 }
 0x2c8   : > { %v983_v42 = vpop.xlane.xlu1 %982 }
 0x2c9   : > { %v987_v43 = vsub.f32 %v979_v38, %v983_v42 }
 0x2cb   : > { %v989_v44 = vmul.f32 1.442695, %v987_v43 }
 0x2cc   : > { %v986_v45 = vpop.xlane.xlu1 %985 }
 0x2cd   : > { %4592 = vpow2.f32 %v989_v44  ;;  %v988_v46 = vsub.f32 %v980_v39, %v986_v45 }
 0x2cf   : > { %v991_v47 = vmul.f32 1.442695, %v988_v46 }
 0x2d1   : > { %4594 = vpow2.f32 %v991_v47 }
 0x2da   : > { %v4593_v48 = vpop.eup %4592 }
 0x2db   : > { %v993_v49 = vsel %vm895_vm1, %v4593_v48, 0.0 }
 0x2dc   : > { %994 = vadd.xlane.f32.xlu0 %v993_v49 }
 0x2de   : > { %v4595_v50 = vpop.eup %4594 }
 0x2df   : > { %v996_v51 = vsel %vm895_vm1, %v4595_v50, 0.0 }
 0x2e0   : > { %997 = vadd.xlane.f32.xlu1 %v996_v51 }
 0x2f1   : > { %1092 = vrot.lane.b32.xlu1 %v4995_v28, %s5742_s27 }
 0x2f5   : > { %1090 = vrot.lane.b32.xlu1 %v4991_v25, %s5742_s27  ;;  %s5788_s27 = sld [smem:[#allocation21_spill]] }
 0x2f9   : > { %1086 = vrot.lane.b32.xlu1 %v4991_v25, %s5748_s3 }
 0x2fd   : > { %1088 = vrot.lane.b32.xlu1 %v4995_v28, %s5748_s3 }
 0x365   : > { %v995_v52 = vpop.xlane.xlu0 %994 }
 0x366   : > { %4596 = vrcp.f32 %v995_v52 }
 0x369   : > { %v998_v53 = vpop.xlane.xlu1 %997 }
 0x36a   : > { %4598 = vrcp.f32 %v998_v53 }
 0x36d   : > { %v1093_v54 = vpop.permute.xlu1 %1092 }
 0x36e   : > { %4297 = vmatprep.subr.msk.mxu1 %vm895_vm1, %v1093_v54 }
 0x371   : > { %v1091_v56 = vpop.permute.xlu1 %1090 }
 0x373   : > { %v4597_v55 = vpop.eup %4596 }
 0x374   : > { %v1001_v57 = vmul.f32 %v4597_v55, %v4593_v48 }
 0x375   : > { %v1087_v60 = vpop.permute.xlu1 %1086 }
 0x376   : > { %4294 = vmatprep.mubr.msk.f32.mxu1 %vm895_vm1, %v1001_v57 }
 0x377   : > { %v4599_v58 = vpop.eup %4598 }
 0x378   : > { %v1002_v59 = vmul.f32 %v4599_v58, %v4595_v50 }
 0x379   : > { %v1089_v61 = vpop.permute.xlu1 %1088 }
 0x37a   : > { %4295 = vmatmul.mubr.msk.f32.vlgmr.msra.gmra.mxu1 %vm895_vm1, %v1002_v59 }
 0x37b   : > { %4298 = vmatpush3.xpose.msk.msra.mxu1 %vm895_vm1, %v1093_v54  ;;  %4301 = vmatprep.mubr.msk.f32.mxu1 %vm895_vm1, %v1087_v60 }
 0x37c   : > { %4299 = vmatprep.subr.msk.mxu1 %vm895_vm1, %v1091_v56 }
 0x37f   : > { %4300 = vmatpush3.xpose.msk.msra.mxu1 %vm895_vm1, %v1091_v56 }
 0x382   : > { %4302 = vmatmul.mubr.msk.f32.vlgmr.msra.gmra.mxu1 %vm895_vm1, %v1089_v61 }
 0x43a   : > { %v4296_v0 = vpop.f32.mrf.mxu1 }
 0x43c   : > { %v1075_v1 = vpop.f32.mrf.mxu1 }
 0x43d   : > { %4322 = vmatprep.mubr.msk.f32.mxu0 %vm895_vm1, %v1075_v1 }
 0x43e   : > { %4323 = vmatmul.mubr.msk.f32.vlgmr.msra.gmra.mxu0 %vm895_vm1, %v4296_v0 }
 0x442   : > { %v4303_v2 = vpop.f32.mrf.mxu1 }
 0x443   : > { %v1178_v3 = vmul.f32 0.25, %v4303_v2 }
 0x444   : > { %v1168_v5 = vpop.f32.mrf.mxu1 }
 0x445   : > { %v1177_v6 = vmul.f32 0.25, %v1168_v5  ;;  %v1182_v7 = vsel %vm895_vm1, %v1178_v3, -inf }
 0x446   : > { %1183 = vmax.xlane.f32.xlu1 %v1182_v7 }
 0x447   : > { %v1179_v8 = vsel %vm895_vm1, %v1177_v6, -inf }
 0x448   : > { %1180 = vmax.xlane.f32.xlu0 %v1179_v8 }
 0x457   : > { %1458 = vrot.lane.b32.xlu1 %v4991_v25, %s5738_s5 }
 0x45b   : > { %1741 = vrot.lane.b32.xlu1 %v4991_v25, %s5744_s6 }
 0x45e   : > { %1205 = vrot.lane.b32.xlu0 %v5006_v34, %s5748_s3 }
 0x4cf   : > { %v1184_v9 = vpop.xlane.xlu1 %1183 }
 0x4d0   : > { %v1186_v10 = vsub.f32 %v1178_v3, %v1184_v9 }
 0x4d1   : > { %v1181_v11 = vpop.xlane.xlu0 %1180 }
 0x4d2   : > { %v1189_v12 = vmul.f32 1.442695, %v1186_v10  ;;  %v1185_v13 = vsub.f32 %v1177_v6, %v1181_v11 }
 0x4d3   : > { %v1459_v41 = vpop.permute.xlu1 %1458 }
 0x4d4   : > { %4600 = vpow2.f32 %v1189_v12  ;;  %v1187_v14 = vmul.f32 1.442695, %v1185_v13 }
 0x4d5   : > { %v1206_v15 = vpop.permute.xlu0 %1205 }
 0x4d6   : > { %4602 = vpow2.f32 %v1187_v14  ;;  %4304 = vmatprep.subr.mxu1 %v1206_v15 }
 0x4d7   : > { %4305 = vmatpush3.msra.mxu1 %v1206_v15  ;;  %v1742_v43 = vpop.permute.xlu1 %1741 }
 0x4e1   : > { %v4601_v16 = vpop.eup %4600 }
 0x4e2   : > { %v1194_v19 = vsel %vm895_vm1, %v4601_v16, 0.0 }
 0x4e3   : > { %v4603_v22 = vpop.eup %4602  ;;  %1195 = vadd.xlane.f32.xlu0 %v1194_v19 }
 0x4e4   : > { %v1191_v23 = vsel %vm895_vm1, %v4603_v22, 0.0 }
 0x4e7   : > { %1192 = vadd.xlane.f32.xlu0 %v1191_v23 }
 0x4fd   : > { %1203 = vrot.lane.b32.xlu0 %v5011_v35, %s5748_s3  ;;  %s5802_s3 = sld [smem:[#allocation23_spill]] }
 0x501   : > { %1460 = vrot.lane.b32.xlu0 %v4995_v28, %s5738_s5  ;;  %s5798_s5 = smov 96  }
 0x505   : > { %1454 = vrot.lane.b32.xlu0 %v4991_v25, %s5746_s29 }
 0x509   : > { %1456 = vrot.lane.b32.xlu0 %v4995_v28, %s5746_s29 }
 0x50d   : > { %1747 = vrot.lane.b32.xlu0 %v4995_v28, %s5740_s28 }
 0x511   : > { %1745 = vrot.lane.b32.xlu0 %v4991_v25, %s5740_s28  ;;  %v1290_v25 = vld [vmem:[%s5786_s1 + $0x10] sm:$0xff]  ;;  %s5787_s28 = sld [smem:[#allocation18_spill]] }
 0x515   : > { %1743 = vrot.lane.b32.xlu0 %v4995_v28, %s5744_s6 }
 0x56c   : > { %v1196_v24 = vpop.xlane.xlu0 %1195 }
 0x56d   : > { %4604 = vrcp.f32 %v1196_v24 }
 0x570   : > { %v1193_v26 = vpop.xlane.xlu0 %1192 }
 0x571   : > { %4606 = vrcp.f32 %v1193_v26 }
 0x574   : > { %v1204_v27 = vpop.permute.xlu0 %1203 }
 0x575   : > { %4306 = vmatprep.subr.mxu1 %v1204_v27 }
 0x576   : > { %4307 = vmatpush3.msra.mxu1 %v1204_v27 }
 0x577   : > { %4311 = vmatprep.subr.mxu1 %v1291_v30 }
 0x578   : > { %v1461_v28 = vpop.permute.xlu0 %1460 }
 0x57a   : > { %v4605_v31 = vpop.eup %4604 }
 0x57b   : > { %v1200_v36 = vmul.f32 %v4605_v31, %v4601_v16 }
 0x57c   : > { %v1455_v37 = vpop.permute.xlu0 %1454 }
 0x57e   : > { %v4607_v32 = vpop.eup %4606 }
 0x57f   : > { %v1199_v33 = vmul.f32 %v4607_v32, %v4603_v22  ;;  %v1657_v32 = vld [vmem:[%s5786_s1 + $0x28] sm:$0xff] }
 0x580   : > { %v1457_v39 = vpop.permute.xlu0 %1456 }
 0x581   : > { %4308 = vmatprep.mubr.msk.f32.mxu1 %vm895_vm1, %v1199_v33  ;;  %v1656_v33 = vld [vmem:[%s5786_s1 + $0x20] sm:$0xff] }
 0x582   : > { %4309 = vmatmul.mubr.msk.f32.vlgmr.msra.gmra.mxu1 %vm895_vm1, %v1200_v36  ;;  %v4324_v36 = vpop.f32.mrf.mxu0 }
 0x583   : > { %4312 = vmatpush3.msra.mxu1 %v1291_v30 }
 0x584   : > { %4313 = vmatprep.subr.mxu1 %v1290_v25  ;;  %v1748_v42 = vpop.permute.xlu0 %1747 }
 0x585   : > { %4314 = vmatpush3.msra.mxu1 %v1290_v25  ;;  %v1445_v25 = vpop.f32.mrf.mxu0 }
 0x586   : > { %4325 = vmatprep.subr.msk.mxu1 %vm895_vm1, %v1461_v28 }
 0x588   : > { %v1746_v44 = vpop.permute.xlu0 %1745 }
 0x58c   : > { %v1744_v45 = vpop.permute.xlu0 %1743 }
 0x642   : > { %v4310_v38 = vpop.f32.mrf.mxu1 }
 0x644   : > { %v1281_v40 = vpop.f32.mrf.mxu1 }
 0x645   : > { %4315 = vmatprep.mubr.msk.f32.mxu1 %vm895_vm1, %v1281_v40 }
 0x646   : > { %4316 = vmatmul.mubr.msk.f32.vlgmr.msra.gmra.mxu1 %vm895_vm1, %v4310_v38 }
 0x647   : > { %4326 = vmatpush3.xpose.msk.msra.mxu1 %vm895_vm1, %v1461_v28  ;;  %4329 = vmatprep.mubr.msk.f32.mxu1 %vm895_vm1, %v1455_v37 }
 0x648   : > { %4327 = vmatprep.subr.msk.mxu1 %vm895_vm1, %v1459_v41 }
 0x64b   : > { %4328 = vmatpush3.xpose.msk.msra.mxu1 %vm895_vm1, %v1459_v41 }
 0x64c   : > { %4346 = vmatprep.subr.msk.mxu1 %vm895_vm1, %v1748_v42 }
 0x64e   : > { %4330 = vmatmul.mubr.msk.f32.vlgmr.msra.gmra.mxu1 %vm895_vm1, %v1457_v39 }
 0x64f   : > { %4347 = vmatpush3.xpose.msk.msra.mxu1 %vm895_vm1, %v1748_v42  ;;  %4350 = vmatprep.mubr.msk.f32.mxu1 %vm895_vm1, %v1742_v43 }
 0x650   : > { %4348 = vmatprep.subr.msk.mxu1 %vm895_vm1, %v1746_v44 }
 0x653   : > { %4349 = vmatpush3.xpose.msk.msra.mxu1 %vm895_vm1, %v1746_v44  ;;  %v1944_v44 = vld [vmem:[%s5786_s1 + $0x38] sm:$0xff] }
 0x656   : > { %4351 = vmatmul.mubr.msk.f32.vlgmr.msra.gmra.mxu1 %vm895_vm1, %v1744_v45  ;;  %v1943_v45 = vld [vmem:[%s5786_s1 + $0x30] sm:$0xff]  ;;  %s5804_s1 = sld [smem:[#allocation24_spill]] }
 0x706   : > { %v5092_v46 = vpop.f32.mrf.mxu1 }
 0x708   : > { %v5094_v47 = vpop.f32.mrf.mxu1 }
 0x70e   : > { %v4331_v48 = vpop.f32.mrf.mxu1 }
 0x70f   : > { %v1546_v49 = vmul.f32 0.25, %v4331_v48  ;;  %v1451_v48 = vadd.f32 %v4324_v36, %v5092_v46 }
 0x710   : > { %v1536_v50 = vpop.f32.mrf.mxu1 }
 0x711   : > { %v1545_v51 = vmul.f32 0.25, %v1536_v50  ;;  %v1550_v52 = vsel %vm895_vm1, %v1546_v49, -inf  ;;  %v1446_v50 = vadd.f32 %v1445_v25, %v5094_v47 }
 0x712   : > { %1551 = vmax.xlane.f32.xlu0 %v1550_v52 }
 0x713   : > { %v1547_v53 = vsel %vm895_vm1, %v1545_v51, -inf }
 0x714   : > { %1548 = vmax.xlane.f32.xlu1 %v1547_v53 }
 0x716   : > { %v4352_v0 = vpop.f32.mrf.mxu1 }
 0x717   : > { %v1833_v3 = vmul.f32 0.25, %v4352_v0 }
 0x718   : > { %v1823_v1 = vpop.f32.mrf.mxu1 }
 0x719   : > { %v1832_v2 = vmul.f32 0.25, %v1823_v1  ;;  %v1837_v6 = vsel %vm895_vm1, %v1833_v3, -inf  ;;  %v2187_v1 = vld [vmem:[%s5788_s27 + $0x38] sm:$0xff] }
 0x71b   : > { %v1834_v5 = vsel %vm895_vm1, %v1832_v2, -inf }
 0x79b   : > { %v1552_v54 = vpop.xlane.xlu0 %1551 }
 0x79c   : > { %v1554_v55 = vsub.f32 %v1546_v49, %v1552_v54 }
 0x79d   : > { %v1549_v56 = vpop.xlane.xlu1 %1548 }
 0x79e   : > { %v1557_v57 = vmul.f32 1.442695, %v1554_v55  ;;  %v1553_v58 = vsub.f32 %v1545_v51, %v1549_v56 }
 0x7a0   : > { %4608 = vpow2.f32 %v1557_v57  ;;  %v1555_v59 = vmul.f32 1.442695, %v1553_v58  ;;  %v4032_v57 = vld [vmem:[%s5787_s28] ss:$0 sm:$0xff] }
 0x7a2   : > { %4610 = vpow2.f32 %v1555_v59 }
 0x7ad   : > { %v4609_v60 = vpop.eup %4608 }
 0x7ae   : > { %v1562_v61 = vsel %vm895_vm1, %v4609_v60, 0.0 }
 0x7af   : > { %v4611_v62 = vpop.eup %4610  ;;  %1563 = vadd.xlane.f32.xlu1 %v1562_v61 }
 0x7b0   : > { %v1559_v63 = vsel %vm895_vm1, %v4611_v62, 0.0 }
 0x7b1   : > { %1560 = vadd.xlane.f32.xlu0 %v1559_v63 }
 0x7c0   : > { %1569 = vrot.lane.b32.xlu1 %v5011_v35, %s5746_s29 }
 0x7c7   : > { %1571 = vrot.lane.b32.xlu0 %v5006_v34, %s5746_s29 }
 0x7e4   : > { %1835 = vmax.xlane.f32.xlu1 %v1834_v5  ;;  %v2183_v5 = vld [vmem:[%s5788_s27 + $0x18] sm:$0xff] }
 0x7e6   : > { %1838 = vmax.xlane.f32.xlu0 %v1837_v6 }
 0x838   : > { %v1564_v7 = vpop.xlane.xlu1 %1563 }
 0x839   : > { %4612 = vrcp.f32 %v1564_v7 }
 0x83a   : > { %v1561_v8 = vpop.xlane.xlu0 %1560 }
 0x83b   : > { %4614 = vrcp.f32 %v1561_v8  ;;  %v2182_v8 = vld [vmem:[%s5788_s27 + $0x10] sm:$0xff] }
 0x83c   : > { %v1570_v10 = vpop.permute.xlu1 %1569 }
 0x83e   : > { %v1572_v9 = vpop.permute.xlu0 %1571 }
 0x83f   : > { %4332 = vmatprep.subr.mxu0 %v1572_v9 }
 0x840   : > { %4333 = vmatpush3.msra.mxu0 %v1572_v9  ;;  %v2181_v9 = vld [vmem:[%s5788_s27 + $0x8] sm:$0xff] }
 0x841   : > { %4334 = vmatprep.subr.mxu0 %v1570_v10 }
 0x842   : > { %4335 = vmatpush3.msra.mxu0 %v1570_v10 }
 0x843   : > { %4339 = vmatprep.subr.mxu0 %v1657_v32 }
 0x846   : > { %v4613_v11 = vpop.eup %4612 }
 0x847   : > { %v1568_v14 = vmul.f32 %v4613_v11, %v4609_v60  ;;  %v768_v11 = vld [vmem:[%s5790_s25 + $0x8] sm:$0xff] }
 0x848   : > { %v4615_v12 = vpop.eup %4614 }
 0x849   : > { %v1567_v13 = vmul.f32 %v4615_v12, %v4611_v62 }
 0x84b   : > { %4336 = vmatprep.mubr.msk.f32.mxu0 %vm895_vm1, %v1567_v13  ;;  %v769_v13 = vld [vmem:[%s5790_s25 + $0x10] sm:$0xff] }
 0x84c   : > { %4337 = vmatmul.mubr.msk.f32.vlgmr.msra.gmra.mxu0 %vm895_vm1, %v1568_v14  ;;  %v2180_v14 = vld [vmem:[%s5788_s27] sm:$0xff] }
 0x84d   : > { %4340 = vmatpush3.msra.mxu0 %v1657_v32 }
 0x84e   : > { %4341 = vmatprep.subr.mxu0 %v1656_v33 }
 0x84f   : > { %4342 = vmatpush3.msra.mxu0 %v1656_v33 }
 0x86d   : > { %v1836_v15 = vpop.xlane.xlu1 %1835 }
 0x86e   : > { %v1840_v16 = vsub.f32 %v1832_v2, %v1836_v15  ;;  %v2186_v2 = vld [vmem:[%s5788_s27 + $0x30] sm:$0xff] }
 0x86f   : > { %v1839_v19 = vpop.xlane.xlu0 %1838 }
 0x870   : > { %v1842_v22 = vmul.f32 1.442695, %v1840_v16  ;;  %v1841_v23 = vsub.f32 %v1833_v3, %v1839_v19  ;;  %v767_v3 = vld [vmem:[%s5789_s30] sm:$0xff]  ;;  %s5796_s30 = smov 112  }
 0x872   : > { %4616 = vpow2.f32 %v1842_v22  ;;  %v1844_v24 = vmul.f32 1.442695, %v1841_v23  ;;  %v770_v22 = vld [vmem:[%s5790_s25 + $0x18] sm:$0xff] }
 0x874   : > { %4618 = vpow2.f32 %v1844_v24 }
 0x87f   : > { %v4617_v26 = vpop.eup %4616 }
 0x880   : > { %v1846_v27 = vsel %vm895_vm1, %v4617_v26, 0.0 }
 0x881   : > { %v4619_v30 = vpop.eup %4618  ;;  %1847 = vadd.xlane.f32.xlu0 %v1846_v27 }
 0x882   : > { %v1849_v31 = vsel %vm895_vm1, %v4619_v30, 0.0 }
 0x883   : > { %1850 = vadd.xlane.f32.xlu1 %v1849_v31 }
 0x894   : > { %1856 = vrot.lane.b32.xlu1 %v5011_v35, %s5744_s6 }
 0x897   : > { %1858 = vrot.lane.b32.xlu0 %v5006_v34, %s5744_s6  ;;  %s4099_s6 = sshll.u32 %s759_s8, 5  ;;  %s5792_s8 = sld [smem:[#allocation19_spill]] }
 0x898   : > { %s762_s24 = scalar_lea.vmem %s5791_s4, %s4099_s6  ;;  %s755_s6 = sand.u32 1, %s4720_s2  }
 0x899   : > { %v763_v6 = vld [vmem:[%s762_s24] sm:$0xff]  ;;  %v764_v10 = vld [vmem:[%s762_s24 + $0x8] sm:$0xff]  ;;  %v765_v12 = vld [vmem:[%s762_s24 + $0x10] sm:$0xff] }
 0x89a   : > { %v771_v7 = vadd.f32 %v767_v3, %v763_v6  ;;  %v772_v15 = vadd.f32 %v768_v11, %v764_v10  ;;  %v773_v16 = vadd.f32 %v769_v13, %v765_v12  ;;  %v766_v19 = vld [vmem:[%s762_s24 + $0x18] sm:$0xff]  ;;  %s5794_s24 = sld [smem:[#allocation20_spill]] }
 0x89b   : > { %v774_v23 = vadd.f32 %v770_v22, %v766_v19 }
 0x8a0   : > { %v4035_v3 = vld [vmem:[%s5794_s24] ss:$0 sm:$0xff] }
 0x90a   : > { %v1848_v28 = vpop.xlane.xlu0 %1847 }
 0x90b   : > { %4620 = vrcp.f32 %v1848_v28 }
 0x90c   : > { %v4338_v37 = vpop.f32.mrf.mxu0  ;;  %v1851_v38 = vpop.xlane.xlu1 %1850 }
 0x90d   : > { %4622 = vrcp.f32 %v1851_v38  ;;  %v2090_v38 = vld [vmem:[%s5792_s8 + $0x30] sm:$0xff] }
 0x90e   : > { %v1647_v39 = vpop.f32.mrf.mxu0  ;;  %v1859_v40 = vpop.permute.xlu0 %1858 }
 0x90f   : > { %4343 = vmatprep.mubr.msk.f32.mxu0 %vm895_vm1, %v1647_v39  ;;  %4353 = vmatprep.subr.mxu0 %v1859_v40  ;;  %v2089_v39 = vld [vmem:[%s5792_s8 + $0x28] sm:$0xff] }
 0x910   : > { %4344 = vmatmul.mubr.msk.f32.vlgmr.msra.gmra.mxu0 %vm895_vm1, %v4338_v37  ;;  %v1857_v41 = vpop.permute.xlu1 %1856  ;;  %v2091_v37 = vld [vmem:[%s5792_s8 + $0x38] sm:$0xff] }
 0x911   : > { %4354 = vmatpush3.msra.mxu0 %v1859_v40  ;;  %4367 = vmatprep.subr.mxu1 %v2091_v37  ;;  %v2088_v40 = vld [vmem:[%s5792_s8 + $0x20] sm:$0xff] }
 0x912   : > { %4355 = vmatprep.subr.mxu0 %v1857_v41  ;;  %4368 = vmatpush3.msra.mxu1 %v2091_v37 }
 0x913   : > { %4356 = vmatpush3.msra.mxu0 %v1857_v41  ;;  %4369 = vmatprep.subr.mxu1 %v2090_v38  ;;  %v2087_v41 = vld [vmem:[%s5792_s8 + $0x18] sm:$0xff] }
 0x914   : > { %4360 = vmatprep.subr.mxu0 %v1944_v44  ;;  %4370 = vmatpush3.msra.mxu1 %v2090_v38 }
 0x915   : > { %4371 = vmatprep.subr.mxu1 %v2089_v39 }
 0x916   : > { %4372 = vmatpush3.msra.mxu1 %v2089_v39 }
 0x917   : > { %4373 = vmatprep.subr.mxu1 %v2088_v40 }
 0x918   : > { %v4621_v35 = vpop.eup %4620  ;;  %4374 = vmatpush3.msra.mxu1 %v2088_v40 }
 0x919   : > { %v1854_v34 = vmul.f32 %v4621_v35, %v4617_v26  ;;  %v2086_v35 = vld [vmem:[%s5792_s8 + $0x10] sm:$0xff]  ;;  %4375 = vmatprep.subr.mxu1 %v2087_v41 }
 0x91a   : > { %v4623_v42 = vpop.eup %4622  ;;  %4376 = vmatpush3.msra.mxu1 %v2087_v41 }
 0x91b   : > { %4357 = vmatprep.mubr.msk.f32.mxu0 %vm895_vm1, %v1854_v34  ;;  %v1855_v43 = vmul.f32 %v4623_v42, %v4619_v30  ;;  %v2085_v34 = vld [vmem:[%s5792_s8 + $0x8] sm:$0xff]  ;;  %4377 = vmatprep.subr.mxu1 %v2086_v35  ;;  %v2084_v42 = vld [vmem:[%s5792_s8] sm:$0xff] }
 0x91c   : > { %4378 = vmatpush3.msra.mxu1 %v2086_v35 }
 0x91d   : > { %4358 = vmatmul.mubr.msk.f32.vlgmr.msra.gmra.mxu0 %vm895_vm1, %v1855_v43  ;;  %4379 = vmatprep.subr.mxu1 %v2085_v34 }
 0x91e   : > { %4361 = vmatpush3.msra.mxu0 %v1944_v44  ;;  %4380 = vmatpush3.msra.mxu1 %v2085_v34  ;;  %v4038_v44 = vld [vmem:[%s5793_s10] ss:$0 sm:$0xff] }
 0x91f   : > { %4362 = vmatprep.subr.mxu0 %v1943_v45  ;;  %4381 = vmatprep.subr.mxu1 %v2084_v42 }
 0x920   : > { %4363 = vmatpush3.msra.mxu0 %v1943_v45  ;;  %4382 = vmatpush3.msra.mxu1 %v2084_v42 }
 0x921   : > { %4386 = vmatprep.subr.mxu0 %v2187_v1 }
 0x9d0   : > { %v4345_v49 = vpop.f32.mrf.mxu0 }
 0x9d1   : > { %v1740_v51 = vadd.f32 %v4345_v49, %v1451_v48 }
 0x9d2   : > { %v1730_v52 = vpop.f32.mrf.mxu0 }
 0x9d3   : > { %v1739_v53 = vadd.f32 %v1730_v52, %v1446_v50 }
 0x9dd   : > { %v4359_v54 = vpop.f32.mrf.mxu0 }
 0x9df   : > { %v1934_v55 = vpop.f32.mrf.mxu0 }
 0x9e0   : > { %4364 = vmatprep.mubr.msk.f32.mxu0 %vm895_vm1, %v1934_v55 }
 0x9e1   : > { %4365 = vmatmul.mubr.msk.f32.vlgmr.msra.gmra.mxu0 %vm895_vm1, %v4359_v54 }
 0x9e2   : > { %4387 = vmatpush3.msra.mxu0 %v2187_v1  ;;  %4402 = vmatprep.mubr.msk.f32.mxu0 %vm805_vm0, %v771_v7 }
 0x9e3   : > { %4388 = vmatprep.subr.mxu0 %v2186_v2 }
 0x9e4   : > { %4389 = vmatpush3.msra.mxu0 %v2186_v2 }
 0xaa1   : > { %v4366_v56 = vpop.f32.mrf.mxu0 }
 0xaa2   : > { %v2027_v58 = vadd.f32 %v4366_v56, %v1740_v51 }
 0xaa3   : > { %v2017_v46 = vpop.f32.mrf.mxu0 }
 0xaa4   : > { %v2036_v59 = vadd.f32 %v4032_v57, %v2027_v58  ;;  %v2026_v47 = vadd.f32 %v2017_v46, %v1739_v53 }
 0xaa6   : > { %v2035_v60 = vadd.f32 %v4032_v57, %v2026_v47  ;;  %v2038_v61 = vadd.f32 %v2036_v59, %v4979_v18  ;;  %v2185_v18 = vld [vmem:[%s5788_s27 + $0x28] sm:$0xff]  ;;  %v4033_v59 = vld [vmem:[%s5714_s13] ss:$0 sm:$0xff] }
 0xaa7   : > { %4390 = vmatprep.subr.mxu0 %v2185_v18 }
 0xaa8   : > { %v2042_v62 = vsel %vm805_vm0, %v2038_v61, 0.0  ;;  %v2037_v63 = vadd.f32 %v2035_v60, %v4971_v17  ;;  %v2184_v17 = vld [vmem:[%s5788_s27 + $0x20] sm:$0xff]  ;;  %4391 = vmatpush3.msra.mxu0 %v2185_v18 }
 0xaa9   : > { %2043 = vadd.xlane.f32.xlu0 %v2042_v62  ;;  %4392 = vmatprep.subr.mxu0 %v2184_v17 }
 0xaaa   : > { %v2039_v0 = vsel %vm805_vm0, %v2037_v63, 0.0  ;;  %4393 = vmatpush3.msra.mxu0 %v2184_v17 }
 0xaab   : > { %2040 = vadd.xlane.f32.xlu1 %v2039_v0  ;;  %4394 = vmatprep.subr.mxu0 %v2183_v5 }
 0xaac   : > { %4395 = vmatpush3.msra.mxu0 %v2183_v5 }
 0xaad   : > { %4396 = vmatprep.subr.mxu0 %v2182_v8 }
 0xaae   : > { %4397 = vmatpush3.msra.mxu0 %v2182_v8 }
 0xaaf   : > { %4398 = vmatprep.subr.mxu0 %v2181_v9 }
 0xab0   : > { %4399 = vmatpush3.msra.mxu0 %v2181_v9 }
 0xab1   : > { %4400 = vmatprep.subr.mxu0 %v2180_v14 }
 0xab2   : > { %4401 = vmatpush3.msra.mxu0 %v2180_v14 }
 0xab3   : > { %4403 = vmatmul.mubr.msk.f32.vlgmr.msra.gmra.mxu0 %vm805_vm0, %v772_v15 }
 0xab4   : > { %4405 = vmatprep.mubr.msk.f32.mxu0 %vm805_vm0, %v773_v16 }
 0xab7   : > { %4406 = vmatmul.mubr.msk.f32.gmra.mxu0 %vm805_vm0, %v774_v23 }
 0xb32   : > { %v2044_v24 = vpop.xlane.xlu0 %2043 }
 0xb33   : > { %v2047_v26 = vmul.f32 0.015625, %v2044_v24 }
 0xb34   : > { %v2041_v27 = vpop.xlane.xlu1 %2040 }
 0xb35   : > { %v2049_v30 = vsub.f32 %v2038_v61, %v2047_v26  ;;  %v2046_v31 = vmul.f32 0.015625, %v2041_v27 }
 0xb37   : > { %v2048_v32 = vsub.f32 %v2037_v63, %v2046_v31  ;;  %v2051_v33 = vmul.f32 %v2049_v30, %v2049_v30  ;;  %v4034_v63 = vld [vmem:[%s5715_s14] ss:$0 sm:$0xff] }
 0xb39   : > { %v2055_v36 = vsel %vm805_vm0, %v2051_v33, 0.0  ;;  %v2050_v25 = vmul.f32 %v2048_v32, %v2048_v32 }
 0xb3a   : > { %2056 = vadd.xlane.f32.xlu1 %v2055_v36 }
 0xb3b   : > { %v2052_v28 = vsel %vm805_vm0, %v2050_v25, 0.0 }
 0xb3c   : > { %2053 = vadd.xlane.f32.xlu0 %v2052_v28 }
 0xb73   : > { %v4404_v43 = vpop.f32.mrf.mxu0 }
 0xb74   : > { %v5215_v45 = vadd.f32 %v4404_v43, %v4038_v44 }
 0xb75   : > { %v2273_v48 = vpop.f32.mrf.mxu0 }
 0xb76   : > { %v5217_v49 = vadd.f32 %v4038_v44, %v2273_v48  ;;  %v2504_v48 = vld [vmem:[%s5712_s11 + $0x8] sm:$0xff] }
 0xb77   : > { %v4407_v50 = vpop.f32.mrf.mxu0 }
 0xb78   : > { %v5219_v51 = vadd.f32 %v4407_v50, %v4038_v44  ;;  %v2503_v50 = vld [vmem:[%s5712_s11] sm:$0xff] }
 0xb79   : > { %v2283_v0 = vpop.f32.mrf.mxu0 }
 0xb7a   : > { %4408 = vmatprep.subr.msk.mxu1 %vm895_vm1, %v5219_v51  ;;  %v5233_v18 = vadd.f32 %v4038_v44, %v2283_v0 }
 0xbc3   : > { %v2057_v52 = vpop.xlane.xlu1 %2056 }
 0xbc4   : > { %v2059_v53 = vmul.f32 0.015625, %v2057_v52 }
 0xbc5   : > { %v2054_v54 = vpop.xlane.xlu0 %2053 }
 0xbc6   : > { %v2061_v55 = vadd.f32 1e-05, %v2059_v53  ;;  %v2058_v56 = vmul.f32 0.015625, %v2054_v54 }
 0xbc8   : > { %4624 = vrsqrt.f32 %v2061_v55  ;;  %v2060_v57 = vadd.f32 1e-05, %v2058_v56 }
 0xbca   : > { %4626 = vrsqrt.f32 %v2060_v57 }
 0xbd5   : > { %v4625_v58 = vpop.eup %4624 }
 0xbd6   : > { %v2065_v46 = vmul.f32 %v4625_v58, %v2049_v30 }
 0xbd7   : > { %v4627_v47 = vpop.eup %4626 }
 0xbd8   : > { %v2064_v60 = vmul.f32 %v4627_v47, %v2048_v32  ;;  %v2074_v61 = vmul.f32 %v4033_v59, %v2065_v46 }
 0xbda   : > { %v2073_v62 = vmul.f32 %v4033_v59, %v2064_v60  ;;  %v5231_v2 = vadd.f32 %v4034_v63, %v2074_v61 }
 0xbdc   : > { %v5229_v1 = vadd.f32 %v4034_v63, %v2073_v62 }
 0xbde   : > { %4383 = vmatprep.mubr.msk.f32.mxu1 %vm805_vm0, %v5229_v1 }
 0xbdf   : > { %4384 = vmatmul.mubr.msk.f32.vlgmr.msra.gmra.mxu1 %vm805_vm0, %v5231_v2 }
 0xbe0   : > { %4409 = vmatpush3.xpose.msk.msra.mxu1 %vm895_vm1, %v5219_v51 }
 0xbe1   : > { %4410 = vmatprep.subr.msk.mxu1 %vm895_vm1, %v5233_v18 }
 0xbe4   : > { %4411 = vmatpush3.xpose.msk.msra.mxu1 %vm895_vm1, %v5233_v18 }
 0xbe5   : > { %4412 = vmatprep.subr.msk.mxu1 %vm895_vm1, %v5215_v45 }
 0xbe8   : > { %4413 = vmatpush3.xpose.msk.msra.mxu1 %vm895_vm1, %v5215_v45 }
 0xbe9   : > { %4414 = vmatprep.subr.msk.mxu1 %vm895_vm1, %v5217_v49 }
 0xbec   : > { %4415 = vmatpush3.xpose.msk.msra.mxu1 %vm895_vm1, %v5217_v49 }
 0xc9f   : > { %v4385_v17 = vpop.f32.mrf.mxu1 }
 0xca0   : > { %v5258_v7 = vadd.f32 %v4385_v17, %v4035_v3 }
 0xca1   : > { %v2171_v5 = vpop.f32.mrf.mxu1 }
 0xca2   : > { %v5256_v6 = vadd.f32 %v4035_v3, %v2171_v5 }
 0xca4   : > { %4416 = vmatprep.mubr.msk.f32.mxu1 %vm895_vm1, %v5256_v6 }
 0xca5   : > { %4417 = vmatmul.mubr.msk.f32.vlgmr.msra.gmra.mxu1 %vm895_vm1, %v5258_v7 }
 0xd65   : > { %v4418_v8 = vpop.f32.mrf.mxu1 }
 0xd66   : > { %v2386_v9 = vmul.f32 0.25, %v4418_v8 }
 0xd67   : > { %v2376_v10 = vpop.f32.mrf.mxu1 }
 0xd68   : > { %v2385_v11 = vmul.f32 0.25, %v2376_v10  ;;  %v2391_v12 = vsel %vm2387_vm2, %v2386_v9, -inf }
 0xd69   : > { %2392 = vmax.xlane.f32.xlu1 %v2391_v12 }
 0xd6a   : > { %v2388_v13 = vsel %vm2387_vm2, %v2385_v11, -inf }
 0xd6b   : > { %2389 = vmax.xlane.f32.xlu0 %v2388_v13 }
 0xd7a   : > { %2414 = vrot.lane.b32.xlu1 %v5233_v18, %s5795_s0 }
 0xd7e   : > { %2412 = vrot.lane.b32.xlu1 %v5215_v45, %s5795_s0 }
 0xd81   : > { %2416 = vrot.lane.b32.xlu0 %v5219_v51, %s5795_s0 }
 0xdf2   : > { %v2393_v14 = vpop.xlane.xlu1 %2392 }
 0xdf3   : > { %v2395_v15 = vsub.f32 %v2386_v9, %v2393_v14  ;;  %v2722_v14 = vld [vmem:[%s5712_s11 + $0x18] sm:$0xff] }
 0xdf4   : > { %v2390_v16 = vpop.xlane.xlu0 %2389 }
 0xdf5   : > { %v2398_v19 = vmul.f32 1.442695, %v2395_v15  ;;  %v2394_v22 = vsub.f32 %v2385_v11, %v2390_v16 }
 0xdf6   : > { %v2415_v23 = vpop.permute.xlu1 %2414 }
 0xdf7   : > { %4628 = vpow2.f32 %v2398_v19  ;;  %v2396_v24 = vmul.f32 1.442695, %v2394_v22 }
 0xdf8   : > { %v2417_v26 = vpop.permute.xlu0 %2416 }
 0xdf9   : > { %4630 = vpow2.f32 %v2396_v24  ;;  %4419 = vmatprep.subr.mxu0 %v2417_v26 }
 0xdfa   : > { %4420 = vmatpush3.msra.mxu0 %v2417_v26  ;;  %v2413_v27 = vpop.permute.xlu1 %2412 }
 0xdfb   : > { %4421 = vmatprep.subr.mxu0 %v2415_v23 }
 0xdfc   : > { %4422 = vmatpush3.msra.mxu0 %v2415_v23  ;;  %v2721_v23 = vld [vmem:[%s5712_s11 + $0x10] sm:$0xff] }
 0xdfd   : > { %4423 = vmatprep.subr.mxu0 %v2413_v27 }
 0xdfe   : > { %4424 = vmatpush3.msra.mxu0 %v2413_v27 }
 0xe04   : > { %v4629_v30 = vpop.eup %4628 }
 0xe05   : > { %v2403_v31 = vsel %vm2387_vm2, %v4629_v30, 0.0 }
 0xe06   : > { %v4631_v32 = vpop.eup %4630  ;;  %2404 = vadd.xlane.f32.xlu1 %v2403_v31 }
 0xe07   : > { %v2400_v33 = vsel %vm2387_vm2, %v4631_v32, 0.0 }
 0xe08   : > { %2401 = vadd.xlane.f32.xlu0 %v2400_v33 }
 0xe17   : > { %2515 = vrot.lane.b32.xlu1 %v5219_v51, %s5796_s30 }
 0xe1b   : > { %2511 = vrot.lane.b32.xlu1 %v5215_v45, %s5796_s30 }
 0xe1e   : > { %2410 = vrot.lane.b32.xlu0 %v5217_v49, %s5795_s0  ;;  %s5799_s0 = smov 32  }
 0xe1f   : > { %2505 = vrot.lane.b32.xlu1 %v5256_v6, %s5796_s30 }
 0xe22   : > { %2513 = vrot.lane.b32.xlu0 %v5233_v18, %s5796_s30 }
 0xe26   : > { %2509 = vrot.lane.b32.xlu0 %v5217_v49, %s5796_s30 }
 0xe2a   : > { %2507 = vrot.lane.b32.xlu0 %v5258_v7, %s5796_s30  ;;  %s5800_s30 = smov 80  }
 0xe8f   : > { %v2405_v36 = vpop.xlane.xlu1 %2404 }
 0xe90   : > { %4632 = vrcp.f32 %v2405_v36 }
 0xe91   : > { %v2402_v25 = vpop.xlane.xlu0 %2401 }
 0xe92   : > { %4634 = vrcp.f32 %v2402_v25 }
 0xe93   : > { %v2516_v37 = vpop.permute.xlu1 %2515 }
 0xe95   : > { %v2411_v28 = vpop.permute.xlu0 %2410 }
 0xe96   : > { %4425 = vmatprep.subr.mxu0 %v2411_v28 }
 0xe97   : > { %4426 = vmatpush3.msra.mxu0 %v2411_v28  ;;  %v2512_v38 = vpop.permute.xlu1 %2511 }
 0xe98   : > { %4430 = vmatprep.subr.msk.mxu0 %vm895_vm1, %v2516_v37 }
 0xe99   : > { %v2514_v42 = vpop.permute.xlu0 %2513 }
 0xe9b   : > { %v2506_v34 = vpop.permute.xlu1 %2505 }
 0xe9d   : > { %v4633_v39 = vpop.eup %4632  ;;  %v2510_v43 = vpop.permute.xlu0 %2509 }
 0xe9e   : > { %v2409_v35 = vmul.f32 %v4633_v39, %v4629_v30 }
 0xe9f   : > { %v4635_v40 = vpop.eup %4634 }
 0xea0   : > { %v2408_v41 = vmul.f32 %v4635_v40, %v4631_v32 }
 0xea1   : > { %v2508_v44 = vpop.permute.xlu0 %2507 }
 0xea2   : > { %4427 = vmatprep.mubr.msk.f32.mxu0 %vm2387_vm2, %v2408_v41 }
 0xea3   : > { %4428 = vmatmul.mubr.msk.f32.vlgmr.msra.gmra.mxu0 %vm2387_vm2, %v2409_v35 }
 0xea4   : > { %4431 = vmatpush3.xpose.msk.msra.mxu0 %vm895_vm1, %v2516_v37  ;;  %4438 = vmatprep.mubr.msk.f32.mxu0 %vm895_vm1, %v2506_v34 }
 0xea5   : > { %4432 = vmatprep.subr.msk.mxu0 %vm895_vm1, %v2514_v42 }
 0xea8   : > { %4433 = vmatpush3.xpose.msk.msra.mxu0 %vm895_vm1, %v2514_v42 }
 0xea9   : > { %4434 = vmatprep.subr.msk.mxu0 %vm895_vm1, %v2512_v38 }
 0xeac   : > { %4435 = vmatpush3.xpose.msk.msra.mxu0 %vm895_vm1, %v2512_v38 }
 0xead   : > { %4436 = vmatprep.subr.msk.mxu0 %vm895_vm1, %v2510_v43 }
 0xeb0   : > { %4437 = vmatpush3.xpose.msk.msra.mxu0 %vm895_vm1, %v2510_v43 }
 0xeb1   : > { %4459 = vmatprep.subr.mxu0 %v2504_v48 }
 0xeb3   : > { %4439 = vmatmul.mubr.msk.f32.vlgmr.msra.gmra.mxu0 %vm895_vm1, %v2508_v44 }
 0xeb4   : > { %4460 = vmatpush3.msra.mxu0 %v2504_v48 }
 0xeb5   : > { %4461 = vmatprep.subr.mxu0 %v2503_v50 }
 0xeb6   : > { %4462 = vmatpush3.msra.mxu0 %v2503_v50 }
 0xf63   : > { %v4429_v52 = vpop.f32.mrf.mxu0 }
 0xf65   : > { %v2494_v53 = vpop.f32.mrf.mxu0 }
 0xf66   : > { %4463 = vmatprep.mubr.msk.f32.mxu0 %vm895_vm1, %v2494_v53 }
 0xf67   : > { %4464 = vmatmul.mubr.msk.f32.vlgmr.msra.gmra.mxu0 %vm895_vm1, %v4429_v52 }
 0xf73   : > { %v4440_v54 = vpop.f32.mrf.mxu0 }
 0xf74   : > { %v2605_v55 = vmul.f32 0.25, %v4440_v54 }
 0xf75   : > { %v2595_v56 = vpop.f32.mrf.mxu0 }
 0xf76   : > { %v2604_v57 = vmul.f32 0.25, %v2595_v56  ;;  %v2609_v58 = vsel %vm2387_vm2, %v2605_v55, -inf }
 0xf77   : > { %2610 = vmax.xlane.f32.xlu0 %v2609_v58 }
 0xf78   : > { %v2606_v46 = vsel %vm2387_vm2, %v2604_v57, -inf }
 0xf79   : > { %2607 = vmax.xlane.f32.xlu1 %v2606_v46 }
 0xf8a   : > { %2632 = vrot.lane.b32.xlu1 %v5233_v18, %s5797_s9 }
 0xf8d   : > { %2634 = vrot.lane.b32.xlu0 %v5219_v51, %s5797_s9 }
0x1000   : > { %v2611_v59 = vpop.xlane.xlu0 %2610 }
0x1001   : > { %v2613_v47 = vsub.f32 %v2605_v55, %v2611_v59 }
0x1002   : > { %v2608_v60 = vpop.xlane.xlu1 %2607 }
0x1003   : > { %v2616_v61 = vmul.f32 1.442695, %v2613_v47  ;;  %v2612_v62 = vsub.f32 %v2604_v57, %v2608_v60  ;;  %v3102_v60 = vld [vmem:[%s5712_s11 + $0x28] sm:$0xff] }
0x1004   : > { %v2635_v63 = vpop.permute.xlu0 %2634 }
0x1005   : > { %4636 = vpow2.f32 %v2616_v61  ;;  %v2614_v0 = vmul.f32 1.442695, %v2612_v62  ;;  %4441 = vmatprep.subr.mxu1 %v2635_v63 }
0x1006   : > { %4442 = vmatpush3.msra.mxu1 %v2635_v63  ;;  %v2633_v17 = vpop.permute.xlu1 %2632 }
0x1007   : > { %4638 = vpow2.f32 %v2614_v0  ;;  %4443 = vmatprep.subr.mxu1 %v2633_v17 }
0x1008   : > { %4444 = vmatpush3.msra.mxu1 %v2633_v17 }
0x1012   : > { %v4637_v3 = vpop.eup %4636 }
0x1013   : > { %v2621_v5 = vsel %vm2387_vm2, %v4637_v3, 0.0 }
0x1014   : > { %v4639_v8 = vpop.eup %4638  ;;  %2622 = vadd.xlane.f32.xlu1 %v2621_v5 }
0x1015   : > { %v2618_v9 = vsel %vm2387_vm2, %v4639_v8, 0.0 }
0x1016   : > { %2619 = vadd.xlane.f32.xlu0 %v2618_v9 }
0x1025   : > { %2630 = vrot.lane.b32.xlu1 %v5215_v45, %s5797_s9 }
0x1027   : > { %v4465_v17 = vpop.f32.mrf.mxu0 }
0x1029   : > { %2895 = vrot.lane.b32.xlu1 %v5219_v51, %s5798_s5 }
0x102c   : > { %2628 = vrot.lane.b32.xlu0 %v5217_v49, %s5797_s9  ;;  %s5801_s9 = smov 16  }
0x102d   : > { %2891 = vrot.lane.b32.xlu1 %v5215_v45, %s5798_s5 }
0x1030   : > { %2893 = vrot.lane.b32.xlu0 %v5233_v18, %s5798_s5 }
0x1031   : > { %2885 = vrot.lane.b32.xlu1 %v5256_v6, %s5798_s5 }
0x1034   : > { %2889 = vrot.lane.b32.xlu0 %v5217_v49, %s5798_s5 }
0x1038   : > { %2887 = vrot.lane.b32.xlu0 %v5258_v7, %s5798_s5  ;;  %s5661_s5 = scalar_lea.sflag [#allocation3], %s755_s6 }
0x109d   : > { %v2623_v10 = vpop.xlane.xlu1 %2622 }
0x109e   : > { %4640 = vrcp.f32 %v2623_v10 }
0x109f   : > { %v2620_v11 = vpop.xlane.xlu0 %2619 }
0x10a0   : > { %4642 = vrcp.f32 %v2620_v11 }
0x10a1   : > { %v2631_v12 = vpop.permute.xlu1 %2630 }
0x10a2   : > { %4445 = vmatprep.subr.mxu1 %v2631_v12 }
0x10a3   : > { %v2629_v13 = vpop.permute.xlu0 %2628  ;;  %4446 = vmatpush3.msra.mxu1 %v2631_v12 }
0x10a4   : > { %4447 = vmatprep.subr.mxu1 %v2629_v13 }
0x10a5   : > { %4448 = vmatpush3.msra.mxu1 %v2629_v13  ;;  %v2896_v24 = vpop.permute.xlu1 %2895 }
0x10a6   : > { %4452 = vmatprep.subr.mxu1 %v2722_v14 }
0x10a7   : > { %v2894_v32 = vpop.permute.xlu0 %2893 }
0x10a9   : > { %v2892_v26 = vpop.permute.xlu1 %2891 }
0x10ab   : > { %v4641_v15 = vpop.eup %4640  ;;  %v2890_v33 = vpop.permute.xlu0 %2889 }
0x10ac   : > { %v2627_v22 = vmul.f32 %v4641_v15, %v4637_v3  ;;  %v2876_v3 = vpop.f32.mrf.mxu0 }
0x10ad   : > { %v4643_v16 = vpop.eup %4642  ;;  %v2886_v31 = vpop.permute.xlu1 %2885 }
0x10ae   : > { %v2626_v19 = vmul.f32 %v4643_v16, %v4639_v8 }
0x10af   : > { %v2888_v36 = vpop.permute.xlu0 %2887 }
0x10b0   : > { %4449 = vmatprep.mubr.msk.f32.mxu1 %vm2387_vm2, %v2626_v19 }
0x10b1   : > { %4450 = vmatmul.mubr.msk.f32.vlgmr.msra.gmra.mxu1 %vm2387_vm2, %v2627_v22 }
0x10b2   : > { %4453 = vmatpush3.msra.mxu1 %v2722_v14 }
0x10b3   : > { %4454 = vmatprep.subr.mxu1 %v2721_v23 }
0x10b4   : > { %4455 = vmatpush3.msra.mxu1 %v2721_v23 }
0x10b5   : > { %4466 = vmatprep.subr.msk.mxu1 %vm895_vm1, %v2896_v24 }
0x1171   : > { %v4451_v27 = vpop.f32.mrf.mxu1 }
0x1173   : > { %v2712_v30 = vpop.f32.mrf.mxu1 }
0x1174   : > { %4456 = vmatprep.mubr.msk.f32.mxu1 %vm895_vm1, %v2712_v30 }
0x1175   : > { %4457 = vmatmul.mubr.msk.f32.vlgmr.msra.gmra.mxu1 %vm895_vm1, %v4451_v27 }
0x1176   : > { %4467 = vmatpush3.xpose.msk.msra.mxu1 %vm895_vm1, %v2896_v24  ;;  %4474 = vmatprep.mubr.msk.f32.mxu1 %vm895_vm1, %v2886_v31 }
0x1177   : > { %4468 = vmatprep.subr.msk.mxu1 %vm895_vm1, %v2894_v32 }
0x117a   : > { %4469 = vmatpush3.xpose.msk.msra.mxu1 %vm895_vm1, %v2894_v32 }
0x117b   : > { %4470 = vmatprep.subr.msk.mxu1 %vm895_vm1, %v2892_v26 }
0x117e   : > { %4471 = vmatpush3.xpose.msk.msra.mxu1 %vm895_vm1, %v2892_v26 }
0x117f   : > { %4472 = vmatprep.subr.msk.mxu1 %vm895_vm1, %v2890_v33 }
0x1182   : > { %4473 = vmatpush3.xpose.msk.msra.mxu1 %vm895_vm1, %v2890_v33 }
0x1185   : > { %4475 = vmatmul.mubr.msk.f32.vlgmr.msra.gmra.mxu1 %vm895_vm1, %v2888_v36 }
0x1235   : > { %v5352_v25 = vpop.f32.mrf.mxu1 }
0x1236   : > { %v2882_v14 = vadd.f32 %v4465_v17, %v5352_v25 }
0x1237   : > { %v5354_v28 = vpop.f32.mrf.mxu1 }
0x1238   : > { %v2877_v16 = vadd.f32 %v2876_v3, %v5354_v28 }
0x1245   : > { %v4476_v37 = vpop.f32.mrf.mxu1 }
0x1246   : > { %v2985_v38 = vmul.f32 0.25, %v4476_v37 }
0x1247   : > { %v2975_v39 = vpop.f32.mrf.mxu1 }
0x1248   : > { %v2984_v40 = vmul.f32 0.25, %v2975_v39  ;;  %v2989_v41 = vsel %vm2387_vm2, %v2985_v38, -inf }
0x1249   : > { %2990 = vmax.xlane.f32.xlu0 %v2989_v41 }
0x124a   : > { %v2986_v35 = vsel %vm2387_vm2, %v2984_v40, -inf }
0x124b   : > { %2987 = vmax.xlane.f32.xlu1 %v2986_v35 }
0x125c   : > { %3012 = vrot.lane.b32.xlu1 %v5233_v18, %s5799_s0 }
0x125f   : > { %3014 = vrot.lane.b32.xlu0 %v5219_v51, %s5799_s0 }
0x12d2   : > { %v2991_v34 = vpop.xlane.xlu0 %2990 }
0x12d3   : > { %v2993_v42 = vsub.f32 %v2985_v38, %v2991_v34 }
0x12d4   : > { %v2988_v43 = vpop.xlane.xlu1 %2987 }
0x12d5   : > { %v2996_v44 = vmul.f32 1.442695, %v2993_v42  ;;  %v2992_v48 = vsub.f32 %v2984_v40, %v2988_v43 }
0x12d6   : > { %v3015_v50 = vpop.permute.xlu0 %3014 }
0x12d7   : > { %4644 = vpow2.f32 %v2996_v44  ;;  %v2994_v52 = vmul.f32 1.442695, %v2992_v48  ;;  %4477 = vmatprep.subr.mxu0 %v3015_v50  ;;  %v3403_v48 = vld [vmem:[%s5712_s11 + $0x38] sm:$0xff] }
0x12d8   : > { %4478 = vmatpush3.msra.mxu0 %v3015_v50  ;;  %v3013_v53 = vpop.permute.xlu1 %3012 }
0x12d9   : > { %4646 = vpow2.f32 %v2994_v52  ;;  %4479 = vmatprep.subr.mxu0 %v3013_v53 }
0x12da   : > { %4480 = vmatpush3.msra.mxu0 %v3013_v53 }
0x12e4   : > { %v4645_v54 = vpop.eup %4644 }
0x12e5   : > { %v3001_v55 = vsel %vm2387_vm2, %v4645_v54, 0.0 }
0x12e6   : > { %v4647_v56 = vpop.eup %4646  ;;  %3002 = vadd.xlane.f32.xlu1 %v3001_v55 }
0x12e7   : > { %v2998_v57 = vsel %vm2387_vm2, %v4647_v56, 0.0 }
0x12e8   : > { %2999 = vadd.xlane.f32.xlu0 %v2998_v57  ;;  %v4083_v57 = vld [vmem:[%s5713_s12] ss:$0 sm:$0xff] }
0x12f7   : > { %3010 = vrot.lane.b32.xlu1 %v5215_v45, %s5799_s0 }
0x12fb   : > { %3196 = vrot.lane.b32.xlu1 %v5219_v51, %s5800_s30 }
0x12fe   : > { %3008 = vrot.lane.b32.xlu0 %v5217_v49, %s5799_s0 }
0x12ff   : > { %3192 = vrot.lane.b32.xlu1 %v5215_v45, %s5800_s30 }
0x1302   : > { %3194 = vrot.lane.b32.xlu0 %v5233_v18, %s5800_s30 }
0x1303   : > { %3186 = vrot.lane.b32.xlu1 %v5256_v6, %s5800_s30 }
0x1306   : > { %3190 = vrot.lane.b32.xlu0 %v5217_v49, %s5800_s30 }
0x130a   : > { %3188 = vrot.lane.b32.xlu0 %v5258_v7, %s5800_s30  ;;  %v3101_v7 = vld [vmem:[%s5712_s11 + $0x20] sm:$0xff]  ;;  %s4100_s30 = sshll.u32 %s4892_s7, 8  ;;  %s4738_s7 = smov [#allocation2]  }
0x130b   : > { %s5659_s8 = scalar_lea.hbm %s5804_s1, %s4100_s30  ;;  %s4672_s28 = sshll.u32 %s4738_s7, 4  ;;  %s4673_s28 = int_to_ptr.vmem [resolvable:$false] %s4672_s28 }
0x136f   : > { %v3003_v58 = vpop.xlane.xlu1 %3002 }
0x1370   : > { %4648 = vrcp.f32 %v3003_v58 }
0x1371   : > { %v3000_v46 = vpop.xlane.xlu0 %2999 }
0x1372   : > { %4650 = vrcp.f32 %v3000_v46 }
0x1373   : > { %v3011_v59 = vpop.permute.xlu1 %3010 }
0x1374   : > { %4481 = vmatprep.subr.mxu0 %v3011_v59 }
0x1375   : > { %v3009_v47 = vpop.permute.xlu0 %3008  ;;  %4482 = vmatpush3.msra.mxu0 %v3011_v59 }
0x1376   : > { %4483 = vmatprep.subr.mxu0 %v3009_v47 }
0x1377   : > { %4484 = vmatpush3.msra.mxu0 %v3009_v47  ;;  %v3197_v0 = vpop.permute.xlu1 %3196 }
0x1378   : > { %4488 = vmatprep.subr.mxu0 %v3102_v60 }
0x1379   : > { %v3195_v11 = vpop.permute.xlu0 %3194 }
0x137b   : > { %v3193_v5 = vpop.permute.xlu1 %3192 }
0x137d   : > { %v4649_v6 = vpop.eup %4648  ;;  %v3191_v12 = vpop.permute.xlu0 %3190 }
0x137e   : > { %v3007_v63 = vmul.f32 %v4649_v6, %v4645_v54 }
0x137f   : > { %v4651_v61 = vpop.eup %4650  ;;  %v3187_v10 = vpop.permute.xlu1 %3186 }
0x1380   : > { %v3006_v62 = vmul.f32 %v4651_v61, %v4647_v56 }
0x1381   : > { %v3189_v13 = vpop.permute.xlu0 %3188 }
0x1382   : > { %4485 = vmatprep.mubr.msk.f32.mxu0 %vm2387_vm2, %v3006_v62 }
0x1383   : > { %4486 = vmatmul.mubr.msk.f32.vlgmr.msra.gmra.mxu0 %vm2387_vm2, %v3007_v63 }
0x1384   : > { %4489 = vmatpush3.msra.mxu0 %v3102_v60 }
0x1385   : > { %4490 = vmatprep.subr.mxu0 %v3101_v7 }
0x1386   : > { %4491 = vmatpush3.msra.mxu0 %v3101_v7 }
0x1387   : > { %4495 = vmatprep.subr.msk.mxu0 %vm895_vm1, %v3197_v0 }
0x1443   : > { %v4487_v8 = vpop.f32.mrf.mxu0 }
0x1445   : > { %v3092_v9 = vpop.f32.mrf.mxu0 }
0x1446   : > { %4492 = vmatprep.mubr.msk.f32.mxu0 %vm895_vm1, %v3092_v9 }
0x1447   : > { %4493 = vmatmul.mubr.msk.f32.vlgmr.msra.gmra.mxu0 %vm895_vm1, %v4487_v8 }
0x1448   : > { %4496 = vmatpush3.xpose.msk.msra.mxu0 %vm895_vm1, %v3197_v0  ;;  %4503 = vmatprep.mubr.msk.f32.mxu0 %vm895_vm1, %v3187_v10 }
0x1449   : > { %4497 = vmatprep.subr.msk.mxu0 %vm895_vm1, %v3195_v11 }
0x144c   : > { %4498 = vmatpush3.xpose.msk.msra.mxu0 %vm895_vm1, %v3195_v11  ;;  %v3557_v11 = vld [vmem:[%s5720_s19 + $0x78] sm:$0xff] }
0x144d   : > { %4499 = vmatprep.subr.msk.mxu0 %vm895_vm1, %v3193_v5 }
0x1450   : > { %4500 = vmatpush3.xpose.msk.msra.mxu0 %vm895_vm1, %v3193_v5 }
0x1451   : > { %4501 = vmatprep.subr.msk.mxu0 %vm895_vm1, %v3191_v12 }
0x1454   : > { %4502 = vmatpush3.xpose.msk.msra.mxu0 %vm895_vm1, %v3191_v12  ;;  %v3556_v12 = vld [vmem:[%s5720_s19 + $0x70] sm:$0xff] }
0x1457   : > { %4504 = vmatmul.mubr.msk.f32.vlgmr.msra.gmra.mxu0 %vm895_vm1, %v3189_v13  ;;  %v3555_v13 = vld [vmem:[%s5720_s19 + $0x68] sm:$0xff] }
0x1507   : > { %v4494_v15 = vpop.f32.mrf.mxu0 }
0x1508   : > { %v5402_v19 = vadd.f32 %v4494_v15, %v2882_v14  ;;  %v3554_v14 = vld [vmem:[%s5720_s19 + $0x60] sm:$0xff]  ;;  %v3553_v15 = vld [vmem:[%s5720_s19 + $0x58] sm:$0xff] }
0x1509   : > { %v3175_v22 = vpop.f32.mrf.mxu0 }
0x150a   : > { %v5404_v23 = vadd.f32 %v3175_v22, %v2877_v16  ;;  %v3552_v16 = vld [vmem:[%s5720_s19 + $0x50] sm:$0xff]  ;;  %v3550_v22 = vld [vmem:[%s5720_s19 + $0x40] sm:$0xff] }
0x1517   : > { %v4505_v24 = vpop.f32.mrf.mxu0 }
0x1518   : > { %v3286_v26 = vmul.f32 0.25, %v4505_v24  ;;  %v3548_v24 = vld [vmem:[%s5720_s19 + $0x30] sm:$0xff] }
0x1519   : > { %v3276_v27 = vpop.f32.mrf.mxu0 }
0x151a   : > { %v3285_v30 = vmul.f32 0.25, %v3276_v27  ;;  %v3290_v31 = vsel %vm2387_vm2, %v3286_v26, -inf  ;;  %v3546_v27 = vld [vmem:[%s5720_s19 + $0x20] sm:$0xff] }
0x151b   : > { %3291 = vmax.xlane.f32.xlu0 %v3290_v31  ;;  %v3544_v31 = vld [vmem:[%s5720_s19 + $0x10] sm:$0xff] }
0x151c   : > { %v3287_v32 = vsel %vm2387_vm2, %v3285_v30, -inf }
0x151d   : > { %3288 = vmax.xlane.f32.xlu1 %v3287_v32  ;;  %v3543_v32 = vld [vmem:[%s5720_s19 + $0x8] sm:$0xff] }
0x152e   : > { %3313 = vrot.lane.b32.xlu1 %v5233_v18, %s5801_s9 }
0x1531   : > { %3315 = vrot.lane.b32.xlu0 %v5219_v51, %s5801_s9 }
0x15a4   : > { %v3292_v33 = vpop.xlane.xlu0 %3291 }
0x15a5   : > { %v3294_v36 = vsub.f32 %v3286_v26, %v3292_v33  ;;  %v3547_v26 = vld [vmem:[%s5720_s19 + $0x28] sm:$0xff]  ;;  %v3542_v33 = vld [vmem:[%s5720_s19] sm:$0xff] }
0x15a6   : > { %v3289_v25 = vpop.xlane.xlu1 %3288 }
0x15a7   : > { %v3297_v28 = vmul.f32 1.442695, %v3294_v36  ;;  %v3293_v37 = vsub.f32 %v3285_v30, %v3289_v25  ;;  %v3545_v30 = vld [vmem:[%s5720_s19 + $0x18] sm:$0xff] }
0x15a8   : > { %v3316_v38 = vpop.permute.xlu0 %3315  ;;  %v3688_v36 = vld [vmem:[%s5722_s21 + $0xf8] sm:$0xff] }
0x15a9   : > { %4652 = vpow2.f32 %v3297_v28  ;;  %v3295_v39 = vmul.f32 1.442695, %v3293_v37  ;;  %4506 = vmatprep.subr.mxu1 %v3316_v38  ;;  %v3672_v25 = vld [vmem:[%s5722_s21 + $0x78] sm:$0xff]  ;;  %v3687_v28 = vld [vmem:[%s5722_s21 + $0xf0] sm:$0xff]  ;;  %4235 = vmatprep.subr.mxu0 %v3688_v36 }
0x15aa   : > { %4507 = vmatpush3.msra.mxu1 %v3316_v38  ;;  %v3314_v40 = vpop.permute.xlu1 %3313  ;;  %v3671_v37 = vld [vmem:[%s5722_s21 + $0x70] sm:$0xff]  ;;  %4236 = vmatpush3.msra.mxu0 %v3672_v25  ;;  %v3686_v38 = vld [vmem:[%s5722_s21 + $0xe8] sm:$0xff] }
0x15ab   : > { %4654 = vpow2.f32 %v3295_v39  ;;  %4508 = vmatprep.subr.mxu1 %v3314_v40  ;;  %4237 = vmatprep.subr.mxu0 %v3687_v28  ;;  %v3670_v39 = vld [vmem:[%s5722_s21 + $0x68] sm:$0xff] }
0x15ac   : > { %4509 = vmatpush3.msra.mxu1 %v3314_v40  ;;  %4238 = vmatpush3.msra.mxu0 %v3671_v37  ;;  %v3685_v40 = vld [vmem:[%s5722_s21 + $0xe0] sm:$0xff] }
0x15ad   : > { %4239 = vmatprep.subr.mxu0 %v3686_v38 }
0x15ae   : > { %4240 = vmatpush3.msra.mxu0 %v3670_v39 }
0x15af   : > { %4241 = vmatprep.subr.mxu0 %v3685_v40 }
0x15b6   : > { %v4653_v41 = vpop.eup %4652 }
0x15b7   : > { %v3302_v18 = vsel %vm2387_vm2, %v4653_v41, 0.0 }
0x15b8   : > { %v4655_v35 = vpop.eup %4654  ;;  %3303 = vadd.xlane.f32.xlu1 %v3302_v18  ;;  %v3684_v18 = vld [vmem:[%s5722_s21 + $0xd8] sm:$0xff] }
0x15b9   : > { %v3299_v51 = vsel %vm2387_vm2, %v4655_v35, 0.0 }
0x15ba   : > { %3300 = vadd.xlane.f32.xlu0 %v3299_v51  ;;  %v3683_v51 = vld [vmem:[%s5722_s21 + $0xd0] sm:$0xff] }
0x15c9   : > { %3311 = vrot.lane.b32.xlu1 %v5215_v45, %s5801_s9 }
0x15d0   : > { %3309 = vrot.lane.b32.xlu0 %v5217_v49, %s5801_s9  ;;  %v3402_v49 = vld [vmem:[%s5712_s11 + $0x30] sm:$0xff]  ;;  %s3995_s9 = sshll.u32 %s755_s6, 4 }
0x15d1   : > { %s757_s24 = scalar_lea.vmem [#allocation2], %s3995_s9 }
0x15d2   : > { %s3929_s0 = sshll.u32 %s757_s24, 4  ;;  %s5654_s0 = int_to_ptr.vmem [resolvable:$true] %s3929_s0 }
0x15d3   : > { %s4668_s9 = scalar_lea.vmem %s5654_s0, 256  ;;  %p4675_p0 = scmp.lt.s32.totalorder %s5654_s0, %s4673_s28 }
0x15d4   : > { %p4669_p11 = scmp.ne.s32.totalorder %s5654_s0, %s4668_s9 }
0x15d6   : > { %p4670_p12 = pnand %p4669_p11, %p4909_p5 }
0x15d8   : > { %p4671_p13 = pneg %p4670_p12 }
0x1641   : > { %v3304_v34 = vpop.xlane.xlu1 %3303 }
0x1642   : > { %4656 = vrcp.f32 %v3304_v34  ;;  %v3667_v34 = vld [vmem:[%s5722_s21 + $0x50] sm:$0xff] }
0x1643   : > { %v3301_v42 = vpop.xlane.xlu0 %3300 }
0x1644   : > { %4658 = vrcp.f32 %v3301_v42  ;;  %v3682_v42 = vld [vmem:[%s5722_s21 + $0xc8] sm:$0xff] }
0x1645   : > { %v3312_v43 = vpop.permute.xlu1 %3311 }
0x1646   : > { %4510 = vmatprep.subr.mxu1 %v3312_v43 }
0x1647   : > { %v3310_v44 = vpop.permute.xlu0 %3309  ;;  %4511 = vmatpush3.msra.mxu1 %v3312_v43  ;;  %v3666_v43 = vld [vmem:[%s5722_s21 + $0x48] sm:$0xff] }
0x1648   : > { %4512 = vmatprep.subr.mxu1 %v3310_v44 }
0x1649   : > { %4513 = vmatpush3.msra.mxu1 %v3310_v44  ;;  %v3681_v44 = vld [vmem:[%s5722_s21 + $0xc0] sm:$0xff] }
0x164a   : > { %4517 = vmatprep.subr.mxu1 %v3403_v48 }
0x164f   : > { %v4657_v50 = vpop.eup %4656 }
0x1650   : > { %v3308_v53 = vmul.f32 %v4657_v50, %v4653_v41  ;;  %v3669_v41 = vld [vmem:[%s5722_s21 + $0x60] sm:$0xff]  ;;  %v3680_v50 = vld [vmem:[%s5722_s21 + $0xb8] sm:$0xff] }
0x1651   : > { %v4659_v45 = vpop.eup %4658  ;;  %4242 = vmatpush3.msra.mxu0 %v3669_v41 }
0x1652   : > { %v3307_v52 = vmul.f32 %v4659_v45, %v4655_v35  ;;  %v3668_v35 = vld [vmem:[%s5722_s21 + $0x58] sm:$0xff]  ;;  %4243 = vmatprep.subr.mxu0 %v3684_v18 }
0x1653   : > { %4244 = vmatpush3.msra.mxu0 %v3668_v35  ;;  %v3664_v45 = vld [vmem:[%s5722_s21 + $0x38] sm:$0xff] }
0x1654   : > { %4514 = vmatprep.mubr.msk.f32.mxu1 %vm2387_vm2, %v3307_v52  ;;  %4245 = vmatprep.subr.mxu0 %v3683_v51  ;;  %v3679_v52 = vld [vmem:[%s5722_s21 + $0xb0] sm:$0xff] }
0x1655   : > { %4515 = vmatmul.mubr.msk.f32.vlgmr.msra.gmra.mxu1 %vm2387_vm2, %v3308_v53  ;;  %4246 = vmatpush3.msra.mxu0 %v3667_v34  ;;  %v3663_v53 = vld [vmem:[%s5722_s21 + $0x30] sm:$0xff] }
0x1656   : > { %4518 = vmatpush3.msra.mxu1 %v3403_v48  ;;  %4247 = vmatprep.subr.mxu0 %v3682_v42  ;;  %v3665_v48 = vld [vmem:[%s5722_s21 + $0x40] sm:$0xff] }
0x1657   : > { %4519 = vmatprep.subr.mxu1 %v3402_v49  ;;  %4248 = vmatpush3.msra.mxu0 %v3666_v43 }
0x1658   : > { %4520 = vmatpush3.msra.mxu1 %v3402_v49  ;;  %4249 = vmatprep.subr.mxu0 %v3681_v44  ;;  %v3678_v49 = vld [vmem:[%s5722_s21 + $0xa8] sm:$0xff] }
0x1659   : > { %3592 = vmatprep.subr.mxu1 %v3557_v11  ;;  %4250 = vmatpush3.msra.mxu0 %v3665_v48  ;;  %v3658_v11 = vld [vmem:[%s5722_s21 + $0x8] sm:$0xff] }
0x165a   : > { %4251 = vmatprep.subr.mxu0 %v3680_v50 }
0x165b   : > { %4252 = vmatpush3.msra.mxu0 %v3664_v45 }
0x165c   : > { %4253 = vmatprep.subr.mxu0 %v3679_v52 }
0x165d   : > { %4254 = vmatpush3.msra.mxu0 %v3663_v53 }
0x165e   : > { %4255 = vmatprep.subr.mxu0 %v3678_v49 }
0x1715   : > { %v4516_v54 = vpop.f32.mrf.mxu1 }
0x1717   : > { %v3393_v55 = vpop.f32.mrf.mxu1 }
0x1718   : > { %4521 = vmatprep.mubr.msk.f32.mxu1 %vm895_vm1, %v3393_v55  ;;  %v3677_v55 = vld [vmem:[%s5722_s21 + $0xa0] sm:$0xff] }
0x1719   : > { %4522 = vmatmul.mubr.msk.f32.vlgmr.msra.gmra.mxu1 %vm895_vm1, %v4516_v54  ;;  %v3662_v54 = vld [vmem:[%s5722_s21 + $0x28] sm:$0xff] }
0x171a   : > { %3640 = vmatprep.mubr.f32.mxu1 %v4730_v4  ;;  %3593 = vmatpush1.msra.mxu1 %v3556_v12  ;;  %v3673_v12 = vld [vmem:[%s5722_s21 + $0x80] sm:$0xff] }
0x171b   : > { %3594 = vmatprep.subr.mxu1 %v3555_v13  ;;  %4256 = vmatpush3.msra.mxu0 %v3662_v54  ;;  %v3657_v13 = vld [vmem:[%s5722_s21] sm:$0xff] }
0x171c   : > { %3595 = vmatpush1.msra.mxu1 %v3554_v14  ;;  %4257 = vmatprep.subr.mxu0 %v3677_v55  ;;  %v3558_v14 = vld [vmem:[%s5721_s20] sm:$0x3]  ;;  %v3824_v55 = vld [vmem:[%s5724_s23 + $0x38] sm:$0xff] }
0x171d   : > { %3596 = vmatprep.subr.mxu1 %v3553_v15  ;;  %v3563_v15 = vrot.slane %v3558_v14, %v797_v21 }
0x171e   : > { %3597 = vmatpush1.msra.mxu1 %v3552_v16  ;;  %v3567_v16 = vrot.slane %v3558_v14, %v801_v29 }
0x17d9   : > { %v4523_v56 = vpop.f32.mrf.mxu1 }
0x17da   : > { %v3486_v58 = vadd.f32 %v4523_v56, %v5402_v19  ;;  %v3551_v19 = vld [vmem:[%s5720_s19 + $0x48] sm:$0xff]  ;;  %v3661_v56 = vld [vmem:[%s5722_s21 + $0x20] sm:$0xff] }
0x17db   : > { %v3476_v46 = vpop.f32.mrf.mxu1  ;;  %3598 = vmatprep.subr.mxu1 %v3551_v19  ;;  %4258 = vmatpush3.msra.mxu0 %v3661_v56  ;;  %v3823_v56 = vld [vmem:[%s5724_s23 + $0x30] sm:$0xff] }
0x17dc   : > { %v3495_v59 = vadd.f32 %v4083_v57, %v3486_v58  ;;  %v3485_v47 = vadd.f32 %v3476_v46, %v5404_v23  ;;  %3599 = vmatpush1.msra.mxu1 %v3550_v22  ;;  %v3549_v23 = vld [vmem:[%s5720_s19 + $0x38] sm:$0xff] }
0x17dd   : > { %3600 = vmatprep.subr.mxu1 %v3549_v23 }
0x17de   : > { %v3494_v60 = vadd.f32 %v4083_v57, %v3485_v47  ;;  %v3497_v6 = vadd.f32 %v3495_v59, %v5231_v2  ;;  %3601 = vmatpush1.msra.mxu1 %v3548_v24 }
0x17df   : > { %3602 = vmatprep.subr.mxu1 %v3547_v26 }
0x17e0   : > { %v3501_v61 = vsel %vm805_vm0, %v3497_v6, 0.0  ;;  %v3496_v62 = vadd.f32 %v3494_v60, %v5229_v1  ;;  %3603 = vmatpush1.msra.mxu1 %v3546_v27 }
0x17e1   : > { %3502 = vadd.xlane.f32.xlu0 %v3501_v61  ;;  %3604 = vmatprep.subr.mxu1 %v3545_v30 }
0x17e2   : > { %v3498_v63 = vsel %vm805_vm0, %v3496_v62, 0.0  ;;  %3605 = vmatpush1.msra.mxu1 %v3544_v31 }
0x17e3   : > { %3499 = vadd.xlane.f32.xlu1 %v3498_v63  ;;  %3606 = vmatprep.subr.mxu1 %v3543_v32 }
0x17e4   : > { %3607 = vmatpush1.msra.mxu1 %v3542_v33 }
0x17e5   : > { %4524 = vmatprep.subr.mxu1 %v3824_v55 }
0x186a   : > { %v3503_v7 = vpop.xlane.xlu0 %3502 }
0x186b   : > { %v3505_v0 = vmul.f32 0.015625, %v3503_v7  ;;  %v4084_v7 = vld [vmem:[%s5716_s15] ss:$0 sm:$0xff] }
0x186c   : > { %v3500_v17 = vpop.xlane.xlu1 %3499 }
0x186d   : > { %v5438_v3 = vsub.f32 %v3497_v6, %v3505_v0  ;;  %v3504_v5 = vmul.f32 0.015625, %v3500_v17  ;;  %v4085_v17 = vld [vmem:[%s5717_s16] ss:$0 sm:$0xff] }
0x186f   : > { %v5440_v8 = vsub.f32 %v3496_v62, %v3504_v5  ;;  %v3509_v9 = vmul.f32 %v5438_v3, %v5438_v3 }
0x1871   : > { %v3513_v2 = vsel %vm805_vm0, %v3509_v9, 0.0  ;;  %v3508_v1 = vmul.f32 %v5440_v8, %v5440_v8 }
0x1872   : > { %3514 = vadd.xlane.f32.xlu1 %v3513_v2 }
0x1873   : > { %v3510_v10 = vsel %vm805_vm0, %v3508_v1, 0.0  ;;  %v3675_v1 = vld [vmem:[%s5722_s21 + $0x90] sm:$0xff] }
0x1874   : > { %3511 = vadd.xlane.f32.xlu0 %v3510_v10  ;;  %v3674_v10 = vld [vmem:[%s5722_s21 + $0x88] sm:$0xff] }
0x18fb   : > { %v3515_v57 = vpop.xlane.xlu1 %3514 }
0x18fc   : > { %v3517_v58 = vmul.f32 0.015625, %v3515_v57  ;;  %v3822_v57 = vld [vmem:[%s5724_s23 + $0x28] sm:$0xff] }
0x18fd   : > { %v3512_v46 = vpop.xlane.xlu0 %3511 }
0x18fe   : > { %v3519_v59 = vadd.f32 1e-05, %v3517_v58  ;;  %v3516_v47 = vmul.f32 0.015625, %v3512_v46  ;;  %v3821_v58 = vld [vmem:[%s5724_s23 + $0x20] sm:$0xff]  ;;  %v3820_v46 = vld [vmem:[%s5724_s23 + $0x18] sm:$0xff] }
0x1900   : > { %4660 = vrsqrt.f32 %v3519_v59  ;;  %v3518_v60 = vadd.f32 1e-05, %v3516_v47  ;;  %v3819_v59 = vld [vmem:[%s5724_s23 + $0x10] sm:$0xff]  ;;  %v3818_v47 = vld [vmem:[%s5724_s23 + $0x8] sm:$0xff] }
0x1902   : > { %4662 = vrsqrt.f32 %v3518_v60  ;;  %v3817_v60 = vld [vmem:[%s5724_s23] sm:$0xff] }
0x190d   : > { %v4661_v6 = vpop.eup %4660 }
0x190e   : > { %v3523_v63 = vmul.f32 %v4661_v6, %v5438_v3  ;;  %v3676_v3 = vld [vmem:[%s5722_s21 + $0x98] sm:$0xff] }
0x190f   : > { %v4663_v61 = vpop.eup %4662  ;;  %4259 = vmatprep.subr.mxu0 %v3676_v3 }
0x1910   : > { %v3522_v62 = vmul.f32 %v4663_v61, %v5440_v8  ;;  %v3532_v9 = vmul.f32 %v4084_v7, %v3523_v63  ;;  %v3660_v8 = vld [vmem:[%s5722_s21 + $0x18] sm:$0xff] }
0x1911   : > { %4260 = vmatpush3.msra.mxu0 %v3660_v8 }
0x1912   : > { %v3531_v0 = vmul.f32 %v4084_v7, %v3522_v62  ;;  %v3541_v2 = vadd.f32 %v4085_v17, %v3532_v9  ;;  %4261 = vmatprep.subr.mxu0 %v3675_v1 }
0x1914   : > { %v3540_v5 = vadd.f32 %v4085_v17, %v3531_v0 }
0x1916   : > { %4086 = vmatmul.mubr.msk.f32.vlgmr.msra.gmra.mxu1 %vm805_vm0, %v3540_v5 }
0x1917   : > { %3646 = vmatprep.mubr.f32.mxu1 %v4730_v4  ;;  %v3659_v4 = vld [vmem:[%s5722_s21 + $0x10] sm:$0xff]  ;;  %4525 = vmatpush3.msra.mxu1 %v3824_v55 }
0x1918   : > { %4262 = vmatpush3.msra.mxu0 %v3659_v4  ;;  %4526 = vmatprep.subr.mxu1 %v3823_v56 }
0x1919   : > { %4263 = vmatprep.subr.mxu0 %v3674_v10  ;;  %4527 = vmatpush3.msra.mxu1 %v3823_v56 }
0x191a   : > { %4087 = vmatmul.mubr.msk.f32.gmra.mxu1 %vm805_vm0, %v3541_v2  ;;  %4264 = vmatpush3.msra.mxu0 %v3658_v11 }
0x191b   : > { %4265 = vmatprep.subr.mxu0 %v3673_v12  ;;  %4528 = vmatprep.subr.mxu1 %v3822_v57  ;;  %v4091_v12 = vld [vmem:[%s5802_s3] ss:$0 sm:$0xff]  ;;  %s4674_s3 = scalar_lea.vmem %s4673_s28, 512 }
0x191c   : > { %4266 = vmatpush3.msra.mxu0 %v3657_v13  ;;  %4529 = vmatpush3.msra.mxu1 %v3822_v57  ;;  %p4676_p1 = scmp.lt.s32.totalorder %s4674_s3, %s4668_s9 }
0x191d   : > { %4530 = vmatprep.subr.mxu1 %v3821_v58 }
0x191e   : > { %4531 = vmatpush3.msra.mxu1 %v3821_v58  ;;  %p4677_p2 = por %p4676_p1, %p4675_p0 }
0x191f   : > { %4532 = vmatprep.subr.mxu1 %v3820_v46 }
0x1920   : > { %4533 = vmatpush3.msra.mxu1 %v3820_v46  ;;  %p4678_p3 = pnand %p4677_p2, %p4671_p13 }
0x1921   : > { %4534 = vmatprep.subr.mxu1 %v3819_v59 }
0x1922   : > { %4535 = vmatpush3.msra.mxu1 %v3819_v59 }
0x1923   : > { %4536 = vmatprep.subr.mxu1 %v3818_v47 }
0x1924   : > { %4537 = vmatpush3.msra.mxu1 %v3818_v47 }
0x1925   : > { %4538 = vmatprep.subr.mxu1 %v3817_v60 }
0x1926   : > { %4539 = vmatpush3.msra.mxu1 %v3817_v60 }
0x19d6   : > { %v3642_v19 = vpop.f32.mrf.mxu1 }
0x19d7   : > { %v3643_v22 = vadd.f32 %v3642_v19, %v3563_v15 }
0x19d8   : > { %v3644_v23 = vpop.f32.mrf.mxu1 }
0x19d9   : > { %v3645_v24 = vadd.f32 %v3644_v23, %v3567_v16  ;;  %v3653_v30 = vmax.f32 %v3643_v22, 0.0 }
0x19da   : > { %v3648_v26 = vpop.f32.mrf.mxu1 }
0x19db   : > { %v3654_v27 = vmax.f32 %v3645_v24, 0.0  ;;  %v3649_v31 = vadd.f32 %v3648_v26, %v3563_v15 }
0x19dc   : > { %v3650_v32 = vpop.f32.mrf.mxu1 }
0x19dd   : > { %v3651_v33 = vadd.f32 %v3650_v32, %v3567_v16  ;;  %3760 = vmatprep.mubr.f32.mxu0 %v3654_v27  ;;  %v3655_v25 = vmax.f32 %v3649_v31, 0.0 }
0x19de   : > { %3761 = vmatmul.mubr.f32.vlgmr.msra.gmra.mxu0 %v3653_v30 }
0x19df   : > { %v3656_v36 = vmax.f32 %v3651_v33, 0.0 }
0x19e1   : > { %3765 = vmatprep.mubr.f32.mxu0 %v3656_v36 }
0x19e2   : > { %3766 = vmatmul.mubr.f32.gmra.mxu0 %v3655_v25 }
0x1a9e   : > { %v4267_v21 = vpop.f32.mrf.mxu0 }
0x1aa0   : > { %v4268_v29 = vpop.f32.mrf.mxu0 }
0x1aa1   : > { %v4269_v28 = vadd.f32 %v4268_v29, %v4267_v21 }
0x1aa2   : > { %v4270_v37 = vpop.f32.mrf.mxu0 }
0x1aa3   : > { %v3763_v38 = vadd.f32 %v4269_v28, %v4088_v20 }
0x1aa4   : > { %v4271_v39 = vpop.f32.mrf.mxu0 }
0x1aa5   : > { %v4272_v40 = vadd.f32 %v4271_v39, %v4270_v37  ;;  %v3771_v41 = vadd.f32 %v3763_v38, %v3540_v5  ;;  %v4089_v5 = vld [vmem:[%s5718_s17] ss:$0 sm:$0xff] }
0x1aa7   : > { %v3768_v18 = vadd.f32 %v4272_v40, %v4088_v20  ;;  %v3773_v35 = vsel %vm805_vm0, %v3771_v41, 0.0 }
0x1aa8   : > { %3774 = vadd.xlane.f32.xlu0 %v3773_v35 }
0x1aa9   : > { %v3772_v51 = vadd.f32 %v3768_v18, %v3541_v2  ;;  %v4090_v2 = vld [vmem:[%s5719_s18] ss:$0 sm:$0xff] }
0x1aab   : > { %v3776_v34 = vsel %vm805_vm0, %v3772_v51, 0.0 }
0x1aac   : > { %3777 = vadd.xlane.f32.xlu1 %v3776_v34 }
0x1b31   : > { %v3775_v42 = vpop.xlane.xlu0 %3774 }
0x1b32   : > { %v3779_v43 = vmul.f32 0.015625, %v3775_v42 }
0x1b34   : > { %v3781_v44 = vsub.f32 %v3771_v41, %v3779_v43 }
0x1b35   : > { %v3778_v48 = vpop.xlane.xlu1 %3777 }
0x1b36   : > { %v3780_v50 = vmul.f32 0.015625, %v3778_v48  ;;  %v3783_v45 = vmul.f32 %v3781_v44, %v3781_v44 }
0x1b38   : > { %v3782_v52 = vsub.f32 %v3772_v51, %v3780_v50  ;;  %v3785_v53 = vsel %vm805_vm0, %v3783_v45, 0.0 }
0x1b39   : > { %3786 = vadd.xlane.f32.xlu0 %v3785_v53 }
0x1b3a   : > { %v3784_v49 = vmul.f32 %v3782_v52, %v3782_v52 }
0x1b3c   : > { %v3788_v54 = vsel %vm805_vm0, %v3784_v49, 0.0 }
0x1b3d   : > { %3789 = vadd.xlane.f32.xlu1 %v3788_v54 }
0x1bc2   : > { %v3787_v6 = vpop.xlane.xlu0 %3786 }
0x1bc3   : > { %v3791_v61 = vmul.f32 0.015625, %v3787_v6 }
0x1bc5   : > { %v3793_v62 = vadd.f32 1e-05, %v3791_v61 }
0x1bc6   : > { %v3790_v63 = vpop.xlane.xlu1 %3789 }
0x1bc7   : > { %4664 = vrsqrt.f32 %v3793_v62  ;;  %v3792_v7 = vmul.f32 0.015625, %v3790_v63 }
0x1bc9   : > { %v3794_v0 = vadd.f32 1e-05, %v3792_v7 }
0x1bcb   : > { %4666 = vrsqrt.f32 %v3794_v0 }
0x1bd4   : > { %v4665_v17 = vpop.eup %4664 }
0x1bd5   : > { %v3797_v9 = vmul.f32 %v4665_v17, %v3781_v44 }
0x1bd7   : > { %v3806_v3 = vmul.f32 %v4089_v5, %v3797_v9 }
0x1bd8   : > { %v4667_v8 = vpop.eup %4666 }
0x1bd9   : > { %v3798_v1 = vmul.f32 %v4667_v8, %v3782_v52  ;;  %v3815_v4 = vadd.f32 %v4090_v2, %v3806_v3 }
0x1bdb   : > { %v3807_v10 = vmul.f32 %v4089_v5, %v3798_v1  ;;  %4540 = vmatprep.mubr.msk.f32.mxu1 %vm805_vm0, %v3815_v4 }
0x1bdd   : > { %v3816_v11 = vadd.f32 %v4090_v2, %v3807_v10 }
0x1bdf   : > { %4541 = vmatmul.mubr.msk.f32.vlgmr.msra.gmra.mxu1 %vm805_vm0, %v3816_v11 }
0x1c9f   : > { %v4542_v13 = vpop.f32.mrf.mxu1 }
0x1ca0   : > { %v3910_v14 = vadd.f32 %v4542_v13, %v4091_v12 }
0x1ca1   : > { %v3904_v15 = vpop.f32.mrf.mxu1 }
0x1ca2   : > { %3914 = vst [vmem:[%s757_s24 + $0x8] sm:$0xff] %v3910_v14  ;;  %v3905_v16 = vadd.f32 %v4091_v12, %v3904_v15 }
0x1ca4   : > { %3913 = vst [vmem:[%s757_s24] sm:$0xff] %v3905_v16 }
0x1ca5   : > { %4681 = shalt.err (!%p4678_p3)
}
0x1ca6   : > { %s4682_s6 = scalar_lea.hbm %s5659_s8, 256  ;;  %s4686_s26 = scalar_lea.hbm %s5804_s1, 512 }
0x1ca7   : > { %p4683_p4 = scmp.ne.s32.totalorder %s5659_s8, %s4682_s6  ;;  %p4687_p9 = scmp.lt.s32.totalorder %s5659_s8, %s5804_s1 }
0x1ca8   : > { %p4688_p10 = scmp.lt.s32.totalorder %s4686_s26, %s4682_s6 }
0x1ca9   : > { %p4684_p7 = pnand %p4683_p4, %p4909_p5 }
0x1caa   : > { %p4689_p11 = por %p4688_p10, %p4687_p9 }
0x1cab   : > { %p4685_p8 = pneg %p4684_p7 }
0x1cad   : > { %p4690_p12 = pnand %p4689_p11, %p4685_p8 }
0x1caf   : > { %4693 = shalt.err (!%p4690_p12)
}
0x1cb0   : > { %s4739_s9 = smov 128   ;;  %s4740_s28 = smov 8  }
0x1cb1   : > { %4543 = dma.vmem_to_hbm [thread:$0]  (%p4909_p5), %s5654_s0, 256, %s5659_s8, %s5661_s5, %s4739_s9, %s4739_s9, %s4740_s28  }
0x1cb2 PF: > { %s5805_s3 = sld [smem:[#allocation7_spill]] }
0x1cb3   : > { %s5806_s24 = sld [smem:[#allocation5_spill]] }
0x1cb8   : > { %p4549_p13 = scmp.ge.s32.totalorder %s5805_s3, 2 }
0x1cb9   : > { %s3944_s10 = sand.u32 1, %s5806_s24  }
0x1cba   : > { %p4546_p0 = pnand %p4549_p13, %p4913_p6  ;;  %s3945_s6 = scalar_lea.sflag [#allocation3], %s3944_s10 }
0x1cbc   : > { %p4547_p1 = pneg %p4546_p0 }
0x1cbe   : > { %4711 = dma.done.wait (%p4547_p1), %s3945_s6, 256  }
0x1cbf   : > { %4713 = vsyncadd (%p4547_p1), %s3945_s6, 4294967040  ;;  %s5808_s30 = sld [smem:[#allocation8_spill]]  ;;  %s5811_s29 = smov %s4720_s2 }
0x1cc0   : > { %s5809_s26 = sld [smem:[#allocation6_spill]] }
0x1cc1   : > { %s5810_s6 = sld [smem:[#allocation9_spill]] }
0x1cc5   : > { %p35_p2 = scmp.ge.s32.totalorder %s5808_s30, 4  }
0x1cc6   : > { %s5812_s2 = smov %s5809_s26 }
0x1cc7   :  { %37 = sbr.rel (!%p35_p2) target bundleno = 17 (0x11), region = 155 }
0x1ccc   :  { %3950 = vsyncpa [#allocation3], 1 }
0x1ccd   :  { %3952 = vsyncpa [#allocation3 + $0x1], 1 }

</bundles_post_ra>
